<compile_context>
chip_gen: v6e
topology: v6e:2x2x1
jax: 0.10.0
libtpu: 0.0.40
codegen_flags: <defaults>
</compile_context>

<pallas_src>
from functools import partial

import jax
import jax.numpy as jnp
import numpy as np
from jax.experimental import pallas as pl
from jax.experimental.pallas import tpu as pltpu

EPS = 1e-5


# ------------------------------ Pallas kernel ------------------------------ #

def _shortcut_fused_kernel(x_ref, wdw_ref, bdw_ref, wpw_ref, bpw_ref, o_ref,
                           *, stride, use_mxu):
    """Fused RepConvN (dw3x3 + merged dw1x1, folded BN, ReLU) + 1x1 ConvNormAct.

    x_ref:   (1, Cin, H, W)        one batch element, NCHW (W on the lane axis)
    wdw_ref: (9, Cin)              fused depthwise weights, tap-major (di*3+dj)
    bdw_ref: (1, Cin)              fused depthwise bias
    wpw_ref: (Cout, Cin)           fused pointwise weights (already transposed)
    bpw_ref: (1, Cout)             fused pointwise bias
    o_ref:   (1, Cout, Hout, Wout)
    """
    _, cin, h, w = x_ref.shape
    _, cout, ho, wo = o_ref.shape

    x = x_ref[...][0].astype(jnp.float32)                   # (Cin, H, W)

    # 1-pixel zero halo built in VMEM (no extra wrapper-side HBM pad pass).
    zc = jnp.zeros((cin, h, 1), jnp.float32)
    xp = jnp.concatenate([zc, x, zc], axis=2)                # (Cin, H, W+2)
    zr = jnp.zeros((cin, 1, w + 2), jnp.float32)
    xp = jnp.concatenate([zr, xp, zr], axis=1)               # (Cin, H+2, W+2)

    if stride == 1:
        def tap(di, dj):
            return xp[:, di:di + ho, dj:dj + wo]
    else:
        # stride == 2: dense load, then even/odd phase split via reshape +
        # static indexing (no strided slicing of refs or values).
        xpp = xp.reshape(cin, (h + 2) // 2, 2, (w + 2) // 2, 2)
        planes = {(rp, cp): xpp[:, :, rp, :, cp]
                  for rp in (0, 1) for cp in (0, 1)}         # each (Cin, (H+2)/2, (W+2)/2)

        def tap(di, dj):
            p = planes[(di % 2, dj % 2)]
            return p[:, di // 2:di // 2 + ho, dj // 2:dj // 2 + wo]

    wdw = wdw_ref[...]                                       # (9, Cin)
    bdw = bdw_ref[...].reshape(cin, 1, 1)                    # hoisted, built once

    acc = jnp.zeros((cin, ho, wo), jnp.float32)
    for di in range(3):
        for dj in range(3):
            acc = acc + tap(di, dj) * wdw[di * 3 + dj].reshape(cin, 1, 1)
    y = jnp.maximum(acc + bdw, 0.0)                          # (Cin, Hout, Wout), stays in VMEM

    wpw = wpw_ref[...]                                       # (Cout, Cin)
    bpw = bpw_ref[...].reshape(cout, 1, 1)
    if use_mxu:
        z = jnp.dot(wpw, y.reshape(cin, ho * wo),
                    preferred_element_type=jnp.float32).reshape(cout, ho, wo)
    else:
        # Tiny Cin/Cout: a K=Cin matmul uses <1% of the MXU -> VPU contraction.
        z = jnp.zeros((cout, ho, wo), jnp.float32)
        for ci in range(cin):
            z = z + y[ci][None, :, :] * wpw[:, ci].reshape(cout, 1, 1)
    z = jnp.maximum(z + bpw, 0.0)
    o_ref[...] = z[None].astype(o_ref.dtype)


# ------------------------------ wrapper (glue) ------------------------------ #

def _fold_bn(gamma, beta, mean, var):
    scale = gamma / jnp.sqrt(var + EPS)
    return scale, beta - mean * scale


def shortcut_forward(x_nchw, params, stride):
    """ShortCut forward.  x_nchw: (N, Cin, H, W)."""
    n, cin, h, w = x_nchw.shape
    cout = params["w_pw"].shape[1]
    if stride == 1 and cin == cout:
        return x_nchw                                        # nn.Identity

    if stride not in (1, 2):
        raise NotImplementedError("ShortCut kernel supports stride 1 or 2")
    if stride == 2 and (h % 2 or w % 2):
        raise NotImplementedError("stride-2 path assumes even H, W")

    # ---- fold BNs into conv weights / biases (tiny, plain JAX) ----
    s3, b3 = _fold_bn(*params["bn3"])
    s1, b1 = _fold_bn(*params["bn1"])
    w_dw = params["w3"] * s3                                 # (3,3,Cin)
    w_dw = w_dw.at[1, 1, :].add(params["w1"] * s1)           # merge 1x1 branch into center tap
    w_dw = w_dw.reshape(9, cin).astype(jnp.float32)
    b_dw = (b3 + b1).reshape(1, cin).astype(jnp.float32)

    spw, bpw = _fold_bn(*params["bn_pw"])
    wpw_t = (params["w_pw"] * spw).T.astype(jnp.float32)     # (Cout, Cin)
    b_pw = bpw.reshape(1, cout).astype(jnp.float32)

    ho = (h - 1) // stride + 1
    wo = (w - 1) // stride + 1
    use_mxu = cin >= 32                                      # tiny K wastes the MXU

    return pl.pallas_call(
        partial(_shortcut_fused_kernel, stride=stride, use_mxu=use_mxu),
        out_shape=jax.ShapeDtypeStruct((n, cout, ho, wo), x_nchw.dtype),
        grid=(n,),
        in_specs=[
            pl.BlockSpec((1, cin, h, w), lambda i: (i, 0, 0, 0)),
            pl.BlockSpec((9, cin), lambda i: (0, 0)),
            pl.BlockSpec((1, cin), lambda i: (0, 0)),
            pl.BlockSpec((cout, cin), lambda i: (0, 0)),
            pl.BlockSpec((1, cout), lambda i: (0, 0)),
        ],
        out_specs=pl.BlockSpec((1, cout, ho, wo), lambda i: (i, 0, 0, 0)),
        compiler_params=pltpu.CompilerParams(
            dimension_semantics=("parallel",),
            vmem_limit_bytes=32 * 1024 * 1024,
        ),
    )(x_nchw, w_dw, b_dw, wpw_t, b_pw)


# --------------------------- pure-JAX reference ----------------------------- #

def _bn_ref(y, gamma, beta, mean, var):
    rs = lambda v: v[None, :, None, None]
    return (y - rs(mean)) / jnp.sqrt(rs(var) + EPS) * rs(gamma) + rs(beta)


def shortcut_ref(x, params, stride):
    n, cin, h, w = x.shape
    cout = params["w_pw"].shape[1]
    if stride == 1 and cin == cout:
        return x
    w3 = jnp.transpose(params["w3"], (2, 0, 1))[:, None, :, :]        # (C,1,3,3)
    y3 = jax.lax.conv_general_dilated(x, w3, (stride, stride), ((1, 1), (1, 1)),
                                      feature_group_count=cin)
    w1 = params["w1"].reshape(cin, 1, 1, 1)
    y1 = jax.lax.conv_general_dilated(x, w1, (stride, stride), ((0, 0), (0, 0)),
                                      feature_group_count=cin)
    y = jax.nn.relu(_bn_ref(y3, *params["bn3"]) + _bn_ref(y1, *params["bn1"]))
    wp = jnp.transpose(params["w_pw"])[:, :, None, None]               # (Cout,Cin,1,1)
    z = jax.lax.conv_general_dilated(y, wp, (1, 1), ((0, 0), (0, 0)))
    return jax.nn.relu(_bn_ref(z, *params["bn_pw"]))


# --------------------------------- main ------------------------------------ #

def make_params(key, cin, cout):
    ks = list(jax.random.split(key, 15))

    def bn(c):
        gamma = 1.0 + 0.1 * jax.random.normal(ks.pop(), (c,), jnp.float32)
        beta = 0.1 * jax.random.normal(ks.pop(), (c,), jnp.float32)
        mean = 0.1 * jax.random.normal(ks.pop(), (c,), jnp.float32)
        var = 0.5 + jax.random.uniform(ks.pop(), (c,), jnp.float32)
        return gamma, beta, mean, var

    return {
        "w3": 0.1 * jax.random.normal(ks.pop(), (3, 3, cin), jnp.float32),   # dw 3x3
        "w1": 0.1 * jax.random.normal(ks.pop(), (cin,), jnp.float32),        # dw 1x1
        "w_pw": 0.1 * jax.random.normal(ks.pop(), (cin, cout), jnp.float32), # 1x1 pointwise
        "bn3": bn(cin),
        "bn1": bn(cin),
        "bn_pw": bn(cout),
    }


if __name__ == "__main__":
    key = jax.random.PRNGKey(0)
    kx, kp = jax.random.split(key)

    N, Cin, H, W = 2, 4, 16, 16
    Cout = 8

    x = jax.random.normal(kx, (N, Cin, H, W), jnp.float32)   # PyTorch-style NCHW
    params = make_params(kp, Cin, Cout)

    fwd = jax.jit(shortcut_forward, static_argnums=2)

    # stride-2 downsampling shortcut (the common bisenetv2 case)
    out2 = jax.block_until_ready(fwd(x, params, 2))
    ref2 = jax.block_until_ready(shortcut_ref(x, params, 2))
    assert out2.shape == (N, Cout, H // 2, W // 2), out2.shape
    np.testing.assert_allclose(np.asarray(out2), np.asarray(ref2), atol=1e-4, rtol=1e-4)

    # stride-1 channel-projection shortcut
    out1 = jax.block_until_ready(fwd(x, params, 1))
    ref1 = jax.block_until_ready(shortcut_ref(x, params, 1))
    np.testing.assert_allclose(np.asarray(out1), np.asarray(ref1), atol=1e-4, rtol=1e-4)

    # identity path (stride == 1 and Cin == Cout)
    params_id = make_params(kp, Cin, Cin)
    out_id = jax.block_until_ready(fwd(x, params_id, 1))
    np.testing.assert_allclose(np.asarray(out_id), np.asarray(x))

    print("KERNEL_OK")
</pallas_src>

<mosaic_0001>
module attributes {stable_mosaic.version = 11 : i64} {
  func.func @_shortcut_fused_kernel(%arg0: i32, %arg1: memref<1x4x16x16xf32, #tpu.memory_space<vmem>>, %arg2: memref<9x4xf32, #tpu.memory_space<vmem>>, %arg3: memref<1x4xf32, #tpu.memory_space<vmem>>, %arg4: memref<8x4xf32, #tpu.memory_space<vmem>>, %arg5: memref<1x8xf32, #tpu.memory_space<vmem>>, %arg6: memref<1x8x8x8xf32, #tpu.memory_space<vmem>>) attributes {dimension_semantics = [#tpu.dimension_semantics<parallel>], iteration_bounds = array<i64: 2>, scalar_prefetch = 0 : i64, scratch_operands = 0 : i64, tpu.core_type = #tpu.core_type<tc>, window_params = [{transform_indices = @transform_0, window_bounds = array<i64: 1, 4, 16, 16>}, {pipeline_mode = #tpu.pipeline_mode<synchronous>, transform_indices = @transform_1, window_bounds = array<i64: 9, 4>}, {pipeline_mode = #tpu.pipeline_mode<synchronous>, transform_indices = @transform_2, window_bounds = array<i64: 1, 4>}, {pipeline_mode = #tpu.pipeline_mode<synchronous>, transform_indices = @transform_3, window_bounds = array<i64: 8, 4>}, {pipeline_mode = #tpu.pipeline_mode<synchronous>, transform_indices = @transform_4, window_bounds = array<i64: 1, 8>}, {transform_indices = @transform_5, window_bounds = array<i64: 1, 8, 8, 8>}]} {
    %c0 = arith.constant 0 : index
    %c0_0 = arith.constant 0 : index
    %c0_1 = arith.constant 0 : index
    %c0_2 = arith.constant 0 : index
    %0 = vector.load %arg1[%c0, %c0_0, %c0_1, %c0_2] : memref<1x4x16x16xf32, #tpu.memory_space<vmem>>, vector<1x4x16x16xf32>
    %1 = vector.shape_cast %0 : vector<1x4x16x16xf32> to vector<4x16x16xf32>
    %cst = arith.constant 0.000000e+00 : f32
    %2 = vector.broadcast %cst : f32 to vector<4x16x1xf32>
    %3 = tpu.concatenate %2, %1, %2 in 2 : vector<4x16x1xf32>, vector<4x16x16xf32>, vector<4x16x1xf32> -> vector<4x16x18xf32>
    %cst_3 = arith.constant 0.000000e+00 : f32
    %4 = vector.broadcast %cst_3 : f32 to vector<4x1x18xf32>
    %5 = tpu.concatenate %4, %3, %4 in 1 : vector<4x1x18xf32>, vector<4x16x18xf32>, vector<4x1x18xf32> -> vector<4x18x18xf32>
    %6 = vector.shape_cast %5 : vector<4x18x18xf32> to vector<4x9x2x9x2xf32>
    %7 = vector.extract_strided_slice %6 {offsets = [0, 0, 0, 0, 0], sizes = [4, 9, 1, 9, 1], strides = [1, 1, 1, 1, 1]} : vector<4x9x2x9x2xf32> to vector<4x9x1x9x1xf32>
    %8 = vector.shape_cast %7 : vector<4x9x1x9x1xf32> to vector<4x9x9xf32>
    %9 = vector.extract_strided_slice %6 {offsets = [0, 0, 0, 0, 1], sizes = [4, 9, 1, 9, 1], strides = [1, 1, 1, 1, 1]} : vector<4x9x2x9x2xf32> to vector<4x9x1x9x1xf32>
    %10 = vector.shape_cast %9 : vector<4x9x1x9x1xf32> to vector<4x9x9xf32>
    %11 = vector.extract_strided_slice %6 {offsets = [0, 0, 1, 0, 0], sizes = [4, 9, 1, 9, 1], strides = [1, 1, 1, 1, 1]} : vector<4x9x2x9x2xf32> to vector<4x9x1x9x1xf32>
    %12 = vector.shape_cast %11 : vector<4x9x1x9x1xf32> to vector<4x9x9xf32>
    %13 = vector.extract_strided_slice %6 {offsets = [0, 0, 1, 0, 1], sizes = [4, 9, 1, 9, 1], strides = [1, 1, 1, 1, 1]} : vector<4x9x2x9x2xf32> to vector<4x9x1x9x1xf32>
    %14 = vector.shape_cast %13 : vector<4x9x1x9x1xf32> to vector<4x9x9xf32>
    %c0_4 = arith.constant 0 : index
    %c0_5 = arith.constant 0 : index
    %15 = vector.load %arg2[%c0_4, %c0_5] : memref<9x4xf32, #tpu.memory_space<vmem>>, vector<9x4xf32>
    %c0_6 = arith.constant 0 : index
    %c0_7 = arith.constant 0 : index
    %16 = vector.load %arg3[%c0_6, %c0_7] : memref<1x4xf32, #tpu.memory_space<vmem>>, vector<1x4xf32>
    %17 = vector.shape_cast %16 : vector<1x4xf32> to vector<4x1x1xf32>
    %cst_8 = arith.constant 0.000000e+00 : f32
    %18 = vector.broadcast %cst_8 : f32 to vector<4x8x8xf32>
    %19 = vector.extract_strided_slice %8 {offsets = [0, 0, 0], sizes = [4, 8, 8], strides = [1, 1, 1]} : vector<4x9x9xf32> to vector<4x8x8xf32>
    %20 = vector.extract_strided_slice %15 {offsets = [0, 0], sizes = [1, 4], strides = [1, 1]} : vector<9x4xf32> to vector<1x4xf32>
    %21 = vector.shape_cast %20 : vector<1x4xf32> to vector<4xf32>
    %22 = vector.shape_cast %21 : vector<4xf32> to vector<4x1x1xf32>
    %23 = vector.broadcast %22 : vector<4x1x1xf32> to vector<4x8x8xf32>
    %24 = arith.mulf %19, %23 : vector<4x8x8xf32>
    %25 = arith.addf %18, %24 : vector<4x8x8xf32>
    %26 = vector.extract_strided_slice %10 {offsets = [0, 0, 0], sizes = [4, 8, 8], strides = [1, 1, 1]} : vector<4x9x9xf32> to vector<4x8x8xf32>
    %27 = vector.extract_strided_slice %15 {offsets = [1, 0], sizes = [1, 4], strides = [1, 1]} : vector<9x4xf32> to vector<1x4xf32>
    %28 = vector.shape_cast %27 : vector<1x4xf32> to vector<4xf32>
    %29 = vector.shape_cast %28 : vector<4xf32> to vector<4x1x1xf32>
    %30 = vector.broadcast %29 : vector<4x1x1xf32> to vector<4x8x8xf32>
    %31 = arith.mulf %26, %30 : vector<4x8x8xf32>
    %32 = arith.addf %25, %31 : vector<4x8x8xf32>
    %33 = vector.extract_strided_slice %8 {offsets = [0, 0, 1], sizes = [4, 8, 8], strides = [1, 1, 1]} : vector<4x9x9xf32> to vector<4x8x8xf32>
    %34 = vector.extract_strided_slice %15 {offsets = [2, 0], sizes = [1, 4], strides = [1, 1]} : vector<9x4xf32> to vector<1x4xf32>
    %35 = vector.shape_cast %34 : vector<1x4xf32> to vector<4xf32>
    %36 = vector.shape_cast %35 : vector<4xf32> to vector<4x1x1xf32>
    %37 = vector.broadcast %36 : vector<4x1x1xf32> to vector<4x8x8xf32>
    %38 = arith.mulf %33, %37 : vector<4x8x8xf32>
    %39 = arith.addf %32, %38 : vector<4x8x8xf32>
    %40 = vector.extract_strided_slice %12 {offsets = [0, 0, 0], sizes = [4, 8, 8], strides = [1, 1, 1]} : vector<4x9x9xf32> to vector<4x8x8xf32>
    %41 = vector.extract_strided_slice %15 {offsets = [3, 0], sizes = [1, 4], strides = [1, 1]} : vector<9x4xf32> to vector<1x4xf32>
    %42 = vector.shape_cast %41 : vector<1x4xf32> to vector<4xf32>
    %43 = vector.shape_cast %42 : vector<4xf32> to vector<4x1x1xf32>
    %44 = vector.broadcast %43 : vector<4x1x1xf32> to vector<4x8x8xf32>
    %45 = arith.mulf %40, %44 : vector<4x8x8xf32>
    %46 = arith.addf %39, %45 : vector<4x8x8xf32>
    %47 = vector.extract_strided_slice %14 {offsets = [0, 0, 0], sizes = [4, 8, 8], strides = [1, 1, 1]} : vector<4x9x9xf32> to vector<4x8x8xf32>
    %48 = vector.extract_strided_slice %15 {offsets = [4, 0], sizes = [1, 4], strides = [1, 1]} : vector<9x4xf32> to vector<1x4xf32>
    %49 = vector.shape_cast %48 : vector<1x4xf32> to vector<4xf32>
    %50 = vector.shape_cast %49 : vector<4xf32> to vector<4x1x1xf32>
    %51 = vector.broadcast %50 : vector<4x1x1xf32> to vector<4x8x8xf32>
    %52 = arith.mulf %47, %51 : vector<4x8x8xf32>
    %53 = arith.addf %46, %52 : vector<4x8x8xf32>
    %54 = vector.extract_strided_slice %12 {offsets = [0, 0, 1], sizes = [4, 8, 8], strides = [1, 1, 1]} : vector<4x9x9xf32> to vector<4x8x8xf32>
    %55 = vector.extract_strided_slice %15 {offsets = [5, 0], sizes = [1, 4], strides = [1, 1]} : vector<9x4xf32> to vector<1x4xf32>
    %56 = vector.shape_cast %55 : vector<1x4xf32> to vector<4xf32>
    %57 = vector.shape_cast %56 : vector<4xf32> to vector<4x1x1xf32>
    %58 = vector.broadcast %57 : vector<4x1x1xf32> to vector<4x8x8xf32>
    %59 = arith.mulf %54, %58 : vector<4x8x8xf32>
    %60 = arith.addf %53, %59 : vector<4x8x8xf32>
    %61 = vector.extract_strided_slice %8 {offsets = [0, 1, 0], sizes = [4, 8, 8], strides = [1, 1, 1]} : vector<4x9x9xf32> to vector<4x8x8xf32>
    %62 = vector.extract_strided_slice %15 {offsets = [6, 0], sizes = [1, 4], strides = [1, 1]} : vector<9x4xf32> to vector<1x4xf32>
    %63 = vector.shape_cast %62 : vector<1x4xf32> to vector<4xf32>
    %64 = vector.shape_cast %63 : vector<4xf32> to vector<4x1x1xf32>
    %65 = vector.broadcast %64 : vector<4x1x1xf32> to vector<4x8x8xf32>
    %66 = arith.mulf %61, %65 : vector<4x8x8xf32>
    %67 = arith.addf %60, %66 : vector<4x8x8xf32>
    %68 = vector.extract_strided_slice %10 {offsets = [0, 1, 0], sizes = [4, 8, 8], strides = [1, 1, 1]} : vector<4x9x9xf32> to vector<4x8x8xf32>
    %69 = vector.extract_strided_slice %15 {offsets = [7, 0], sizes = [1, 4], strides = [1, 1]} : vector<9x4xf32> to vector<1x4xf32>
    %70 = vector.shape_cast %69 : vector<1x4xf32> to vector<4xf32>
    %71 = vector.shape_cast %70 : vector<4xf32> to vector<4x1x1xf32>
    %72 = vector.broadcast %71 : vector<4x1x1xf32> to vector<4x8x8xf32>
    %73 = arith.mulf %68, %72 : vector<4x8x8xf32>
    %74 = arith.addf %67, %73 : vector<4x8x8xf32>
    %75 = vector.extract_strided_slice %8 {offsets = [0, 1, 1], sizes = [4, 8, 8], strides = [1, 1, 1]} : vector<4x9x9xf32> to vector<4x8x8xf32>
    %76 = vector.extract_strided_slice %15 {offsets = [8, 0], sizes = [1, 4], strides = [1, 1]} : vector<9x4xf32> to vector<1x4xf32>
    %77 = vector.shape_cast %76 : vector<1x4xf32> to vector<4xf32>
    %78 = vector.shape_cast %77 : vector<4xf32> to vector<4x1x1xf32>
    %79 = vector.broadcast %78 : vector<4x1x1xf32> to vector<4x8x8xf32>
    %80 = arith.mulf %75, %79 : vector<4x8x8xf32>
    %81 = arith.addf %74, %80 : vector<4x8x8xf32>
    %82 = vector.broadcast %17 : vector<4x1x1xf32> to vector<4x8x8xf32>
    %83 = arith.addf %81, %82 : vector<4x8x8xf32>
    %cst_9 = arith.constant 0.000000e+00 : f32
    %84 = vector.broadcast %cst_9 : f32 to vector<4x8x8xf32>
    %85 = arith.maximumf %83, %84 : vector<4x8x8xf32>
    %c0_10 = arith.constant 0 : index
    %c0_11 = arith.constant 0 : index
    %86 = vector.load %arg4[%c0_10, %c0_11] : memref<8x4xf32, #tpu.memory_space<vmem>>, vector<8x4xf32>
    %c0_12 = arith.constant 0 : index
    %c0_13 = arith.constant 0 : index
    %87 = vector.load %arg5[%c0_12, %c0_13] : memref<1x8xf32, #tpu.memory_space<vmem>>, vector<1x8xf32>
    %88 = vector.shape_cast %87 : vector<1x8xf32> to vector<8x1x1xf32>
    %cst_14 = arith.constant 0.000000e+00 : f32
    %89 = vector.broadcast %cst_14 : f32 to vector<8x8x8xf32>
    %90 = vector.extract_strided_slice %85 {offsets = [0, 0, 0], sizes = [1, 8, 8], strides = [1, 1, 1]} : vector<4x8x8xf32> to vector<1x8x8xf32>
    %91 = vector.shape_cast %90 : vector<1x8x8xf32> to vector<8x8xf32>
    %92 = vector.shape_cast %91 : vector<8x8xf32> to vector<1x8x8xf32>
    %93 = vector.extract_strided_slice %86 {offsets = [0, 0], sizes = [8, 1], strides = [1, 1]} : vector<8x4xf32> to vector<8x1xf32>
    %94 = vector.shape_cast %93 : vector<8x1xf32> to vector<8xf32>
    %95 = vector.shape_cast %94 : vector<8xf32> to vector<8x1x1xf32>
    %96 = vector.broadcast %92 : vector<1x8x8xf32> to vector<8x8x8xf32>
    %97 = vector.broadcast %95 : vector<8x1x1xf32> to vector<8x8x8xf32>
    %98 = arith.mulf %96, %97 : vector<8x8x8xf32>
    %99 = arith.addf %89, %98 : vector<8x8x8xf32>
    %100 = vector.extract_strided_slice %85 {offsets = [1, 0, 0], sizes = [1, 8, 8], strides = [1, 1, 1]} : vector<4x8x8xf32> to vector<1x8x8xf32>
    %101 = vector.shape_cast %100 : vector<1x8x8xf32> to vector<8x8xf32>
    %102 = vector.shape_cast %101 : vector<8x8xf32> to vector<1x8x8xf32>
    %103 = vector.extract_strided_slice %86 {offsets = [0, 1], sizes = [8, 1], strides = [1, 1]} : vector<8x4xf32> to vector<8x1xf32>
    %104 = vector.shape_cast %103 : vector<8x1xf32> to vector<8xf32>
    %105 = vector.shape_cast %104 : vector<8xf32> to vector<8x1x1xf32>
    %106 = vector.broadcast %102 : vector<1x8x8xf32> to vector<8x8x8xf32>
    %107 = vector.broadcast %105 : vector<8x1x1xf32> to vector<8x8x8xf32>
    %108 = arith.mulf %106, %107 : vector<8x8x8xf32>
    %109 = arith.addf %99, %108 : vector<8x8x8xf32>
    %110 = vector.extract_strided_slice %85 {offsets = [2, 0, 0], sizes = [1, 8, 8], strides = [1, 1, 1]} : vector<4x8x8xf32> to vector<1x8x8xf32>
    %111 = vector.shape_cast %110 : vector<1x8x8xf32> to vector<8x8xf32>
    %112 = vector.shape_cast %111 : vector<8x8xf32> to vector<1x8x8xf32>
    %113 = vector.extract_strided_slice %86 {offsets = [0, 2], sizes = [8, 1], strides = [1, 1]} : vector<8x4xf32> to vector<8x1xf32>
    %114 = vector.shape_cast %113 : vector<8x1xf32> to vector<8xf32>
    %115 = vector.shape_cast %114 : vector<8xf32> to vector<8x1x1xf32>
    %116 = vector.broadcast %112 : vector<1x8x8xf32> to vector<8x8x8xf32>
    %117 = vector.broadcast %115 : vector<8x1x1xf32> to vector<8x8x8xf32>
    %118 = arith.mulf %116, %117 : vector<8x8x8xf32>
    %119 = arith.addf %109, %118 : vector<8x8x8xf32>
    %120 = vector.extract_strided_slice %85 {offsets = [3, 0, 0], sizes = [1, 8, 8], strides = [1, 1, 1]} : vector<4x8x8xf32> to vector<1x8x8xf32>
    %121 = vector.shape_cast %120 : vector<1x8x8xf32> to vector<8x8xf32>
    %122 = vector.shape_cast %121 : vector<8x8xf32> to vector<1x8x8xf32>
    %123 = vector.extract_strided_slice %86 {offsets = [0, 3], sizes = [8, 1], strides = [1, 1]} : vector<8x4xf32> to vector<8x1xf32>
    %124 = vector.shape_cast %123 : vector<8x1xf32> to vector<8xf32>
    %125 = vector.shape_cast %124 : vector<8xf32> to vector<8x1x1xf32>
    %126 = vector.broadcast %122 : vector<1x8x8xf32> to vector<8x8x8xf32>
    %127 = vector.broadcast %125 : vector<8x1x1xf32> to vector<8x8x8xf32>
    %128 = arith.mulf %126, %127 : vector<8x8x8xf32>
    %129 = arith.addf %119, %128 : vector<8x8x8xf32>
    %130 = vector.broadcast %88 : vector<8x1x1xf32> to vector<8x8x8xf32>
    %131 = arith.addf %129, %130 : vector<8x8x8xf32>
    %cst_15 = arith.constant 0.000000e+00 : f32
    %132 = vector.broadcast %cst_15 : f32 to vector<8x8x8xf32>
    %133 = arith.maximumf %131, %132 : vector<8x8x8xf32>
    %134 = vector.shape_cast %133 : vector<8x8x8xf32> to vector<1x8x8x8xf32>
    %c0_16 = arith.constant 0 : index
    %c0_17 = arith.constant 0 : index
    %c0_18 = arith.constant 0 : index
    %c0_19 = arith.constant 0 : index
    %135 = vector.load %arg6[%c0_16, %c0_17, %c0_18, %c0_19] : memref<1x8x8x8xf32, #tpu.memory_space<vmem>>, vector<1x8x8x8xf32>
    tpu.vector_store %arg6[%c0_16, %c0_17, %c0_18, %c0_19], %134 {strides = array<i32>} : memref<1x8x8x8xf32, #tpu.memory_space<vmem>>, vector<1x8x8x8xf32>,
    return
  }
  func.func @transform_0(%arg0: i32) -> (i32, i32, i32, i32) {
    %c0_i32 = arith.constant 0 : i32
    %c0_i32_0 = arith.constant 0 : i32
    %c0_i32_1 = arith.constant 0 : i32
    %c0_i32_2 = arith.constant 0 : i32
    return %arg0, %c0_i32, %c0_i32_0, %c0_i32_1 : i32, i32, i32, i32
  }
  func.func @transform_1(%arg0: i32) -> (i32, i32) {
    %c0_i32 = arith.constant 0 : i32
    %c0_i32_0 = arith.constant 0 : i32
    %c0_i32_1 = arith.constant 0 : i32
    return %c0_i32, %c0_i32_0 : i32, i32
  }
  func.func @transform_2(%arg0: i32) -> (i32, i32) {
    %c0_i32 = arith.constant 0 : i32
    %c0_i32_0 = arith.constant 0 : i32
    %c0_i32_1 = arith.constant 0 : i32
    return %c0_i32, %c0_i32_0 : i32, i32
  }
  func.func @transform_3(%arg0: i32) -> (i32, i32) {
    %c0_i32 = arith.constant 0 : i32
    %c0_i32_0 = arith.constant 0 : i32
    %c0_i32_1 = arith.constant 0 : i32
    return %c0_i32, %c0_i32_0 : i32, i32
  }
  func.func @transform_4(%arg0: i32) -> (i32, i32) {
    %c0_i32 = arith.constant 0 : i32
    %c0_i32_0 = arith.constant 0 : i32
    %c0_i32_1 = arith.constant 0 : i32
    return %c0_i32, %c0_i32_0 : i32, i32
  }
  func.func @transform_5(%arg0: i32) -> (i32, i32, i32, i32) {
    %c0_i32 = arith.constant 0 : i32
    %c0_i32_0 = arith.constant 0 : i32
    %c0_i32_1 = arith.constant 0 : i32
    %c0_i32_2 = arith.constant 0 : i32
    return %arg0, %c0_i32, %c0_i32_0, %c0_i32_1 : i32, i32, i32, i32
  }
}

</mosaic_0001>

<bundles_post_ra>
// kernel: shortcut_forward.1
= control target key start
LH: loop header
LB: loop body
LE: loop exit
PB: predicated region body
PF: predicated region fallthrough
CT: control target
= control target key end

     0   :  { %10 = vsyncpa [#allocation3], 0  ;;  %s10422_s0 = inlined_call_operand.hbm [shape: f32[2,4,16,16], index: 0, kind: input, shape index: {}]   ;;  %s10423_s1 = inlined_call_operand.vmem [shape: f32[9,4], index: 1, kind: input, shape index: {}]   ;;  %s10424_s2 = inlined_call_operand.vmem [shape: f32[1,4], index: 2, kind: input, shape index: {}]   ;;  %s10425_s3 = inlined_call_operand.vmem [shape: f32[8,4], index: 3, kind: input, shape index: {}]   ;;  %s10426_s4 = inlined_call_operand.vmem [shape: f32[1,8], index: 4, kind: input, shape index: {}]   ;;  %s10427_s5 = inlined_call_operand.hbm [shape: f32[2,8,8,8], index: 5, kind: output, shape index: {}]  }
   0x1   :  { %12 = vsyncpa [#allocation3 + $0x1], 0 }
   0x2   :  { %13 = vsyncpa [#allocation4], 0 }
   0x3   :  { %15 = vsyncpa [#allocation4 + $0x1], 0  ;;  %s6090_s18 = smov 0   ;;  %s6092_s19 = smov 0  }
   0x4   :  { %s6094_s20 = smov 0   ;;  %s6096_s21 = smov 0  }
   0x5 LB: > { %s6111_s22 = sadd.s32 4294967295, %s6034_s21   ;;  %s5844_s23 = sadd.s32 4294967294, %s6034_s21   ;;  %s6034_s21 = sphi %s6096_s21, %s11678_s21   ;;  %s6030_s20 = sphi %s6094_s20, %s11677_s20   ;;  %s6026_s19 = sphi %s6092_s19, %s11676_s19   ;;  %s6022_s18 = sphi %s6090_s18, %s11675_s18  }
   0x6   : > { %s6115_s24 = sadd.s32 1, %s6034_s21   ;;  %s28_s25 = sadd.s32 1, %s6030_s20 }
   0x7   : > { %s25_s26 = ssub.s32 %s6034_s21, %s6115_s24  ;;  %p35_p0 = scmp.ne.s32.totalorder %s6030_s20, %s6026_s19 }
   0x8   : > { %p26_p1 = scmp.eq.s32.totalorder %s25_s26, 0  ;;  %p36_p2 = scmp.eq.s32.totalorder %s6034_s21, 0 }
   0x9   : > { %p41_p3 = scmp.ne.s32.totalorder %s6026_s19, %s6022_s18  ;;  %p42_p4 = scmp.eq.s32.totalorder %s6111_s22, 0 }
   0xa   : > { %s6127_s27 = scalar_select %p26_p1, %s6030_s20, %s28_s25  }
   0xb   : > { %p6129_p5 = por %p36_p2, %p35_p0  ;;  %p6133_p6 = por %p42_p4, %p41_p3 }
   0xc   : > { %p149_p7 = scmp.eq.s32.totalorder %s6111_s22, 1  ;;  %p155_p8 = scmp.eq.s32.totalorder %s5844_s23, 1 }
   0xd   : > { %s10759_s29 = scalar_select %p6133_p6, 1, 0 }
   0xe   : > { %p5875_p10 = scmp.lt.s32.totalorder %s6034_s21, 2  ;;  %p6140_p11 = por %p149_p7, %p35_p0 }
   0xf   : > { %p6144_p12 = por %p155_p8, %p41_p3  ;;  %s187_s7 = sand.u32 1, %s6030_s20  }
  0x10   : > { %s10760_s30 = scalar_select %p6140_p11, 1, 0 }
  0x11   : > { %s10761_s6 = scalar_select %p6144_p12, 1, 0 }
  0x12   : > { %s5861_s8 = sshll.u32 %s6034_s21, 10  ;;  %s5847_s9 = sshll.u32 %s187_s7, 6 }
  0x13   : > { %s6153_s12 = scalar_lea.hbm %s10422_s0, %s5861_s8  ;;  %s191_s13 = scalar_lea.vmem [#allocation2], %s5847_s9 }
  0x14   : > { %s198_s14 = sshll.u32 %s191_s13, 4  ;;  %p6157_p13 = pnand %p5875_p10, %p6129_p5  ;;  %s6161_s14 = int_to_ptr.vmem [resolvable:$true] %s198_s14 }
  0x15   : > { %s6163_s16 = scalar_lea.sflag [#allocation3], %s187_s7  ;;  %s5942_s17 = scalar_lea.hbm %s6153_s12, 1024 }
  0x16   : > { %p5943_p0 = scmp.ne.s32.totalorder %s6153_s12, %s5942_s17  ;;  %p5944_p1 = pneg %p6157_p13 }
  0x17   : > { %s5947_s26 = scalar_lea.hbm %s10422_s0, 2048  ;;  %p5948_p4 = scmp.lt.s32.totalorder %s6153_s12, %s10422_s0 }
  0x18   : > { %p5945_p2 = pnand %p5944_p1, %p5943_p0  ;;  %p5949_p5 = scmp.lt.s32.totalorder %s5947_s26, %s5942_s17 }
  0x1a   : > { %p5946_p3 = pneg %p5945_p2  ;;  %p5950_p7 = por %p5949_p5, %p5948_p4 }
  0x1c   : > { %p5951_p8 = pnand %p5950_p7, %p5946_p3 }
  0x1e   : > { %5954 = shalt.err (!%p5951_p8)
}
  0x1f   : > { %s5955_s7 = scalar_lea.vmem %s6161_s14, 1024  ;;  %s6036_s9 = smov [#allocation2]  }
  0x20   : > { %p5956_p10 = scmp.ne.s32.totalorder %s6161_s14, %s5955_s7  ;;  %s5960_s10 = sshll.u32 %s6036_s9, 4  ;;  %s5961_s10 = int_to_ptr.vmem [resolvable:$false] %s5960_s10 }
  0x21   : > { %s5962_s11 = scalar_lea.vmem %s5961_s10, 2048  ;;  %p5963_p2 = scmp.lt.s32.totalorder %s6161_s14, %s5961_s10 }
  0x22   : > { %p5958_p9 = pnand %p5956_p10, %p5944_p1  ;;  %p5964_p12 = scmp.lt.s32.totalorder %s5962_s11, %s5955_s7 }
  0x24   : > { %p5959_p0 = pneg %p5958_p9  ;;  %p5965_p11 = por %p5964_p12, %p5963_p2 }
  0x26   : > { %p5966_p6 = pnand %p5965_p11, %p5959_p0 }
  0x28   : > { %5969 = shalt.err (!%p5966_p6)
}
  0x29   : > { %s6037_s13 = smov 128   ;;  %s6038_s17 = smov 8  }
  0x2a   : > { %5870 = dma.hbm_to_vmem [thread:$0]  (!%p6157_p13), %s6153_s12, 1024, %s6161_s14, %s6163_s16, %s6037_s13, %s6037_s13, %s6038_s17  }
  0x2b   : > { %p5850_p9 = scmp.ge.s32.totalorder %s6034_s21, 1  ;;  %p206_p1 = scmp.lt.s32.totalorder %s6034_s21, 3 }
  0x2d   : > { %p207_p3 = pnand %p5850_p9, %p206_p1 }
  0x2f   : > { %210 = sbr.rel (%p207_p3) target bundleno = 1427 (0x593), region = 40 }
  0x34   : > { %s6187_s23 = sand.u32 1, %s6026_s19   ;;  %p10763_p6 = scmp.ne.s32.totalorder %s10759_s29, 0 }
  0x35   : > { %s5851_s25 = sshll.u32 %s6187_s23, 6  ;;  %s213_s26 = scalar_lea.sflag [#allocation3], %s6187_s23 }
  0x36   : > { %s216_s28 = scalar_lea.vmem [#allocation2], %s5851_s25 }
  0x37   : > { %6013 = dma.done.wait (%p10763_p6), %s213_s26, 1024  }
  0x38   : > { %6015 = vsyncadd (%p10763_p6), %s213_s26, 4294966272  ;;  %v245_v0 = vld [vmem:[%s216_s28 + $0x10] sm:$0xff]  ;;  %v243_v1 = vld [vmem:[%s216_s28] sm:$0xff]  ;;  %s6039_s12 = smov 1   ;;  %vm283_vm0 = vcmask 7168   ;;  %vm292_vm1 = vcmask 138240  }
  0x39   : > { %263 = vrot.lane.b32.xlu1 %v245_v0, %s6039_s12  ;;  %259 = vrot.lane.b32.xlu0 %v243_v1, %s6039_s12  ;;  %v246_v2 = vld [vmem:[%s216_s28 + $0x18] sm:$0xff]  ;;  %v244_v3 = vld [vmem:[%s216_s28 + $0x8] sm:$0xff]  ;;  %vm309_vm2 = vcmask 1040384   ;;  %s6040_s29 = smov 126   ;;  %s6041_s14 = smov 124   ;;  %vm2821_vm3 = vcmask 1046528  }
  0x3a   : > { %v248_v4 = vld [vmem:[%s216_s28 + $0x28] sm:$0xff]  ;;  %v247_v5 = vld [vmem:[%s216_s28 + $0x20] sm:$0xff]  ;;  %v250_v6 = vld [vmem:[%s216_s28 + $0x38] sm:$0xff]  ;;  %s6042_s15 = smov 122   ;;  %s6043_s16 = smov 120   ;;  %vm5677_vm4 = vcmask 1041409  }
  0x3b   : > { %v249_v7 = vld [vmem:[%s216_s28 + $0x30] sm:$0xff]  ;;  %s6044_s8 = smov 118   ;;  %s6045_s7 = smov 116   ;;  %vm5679_vm5 = vcmask 1042434   ;;  %vm5681_vm6 = vcmask 1043459   ;;  %vm5683_vm7 = vcmask 1044484  }
  0x3c   : > { %s6046_s9 = smov 114   ;;  %s6047_s10 = smov 112   ;;  %vm5685_vm8 = vcmask 1045509   ;;  %vm5687_vm9 = vcmask 1046534   ;;  %vm5689_vm10 = vcmask 1047559   ;;  %vm5748_vm11 = vcmask 64512  }
  0x3d   : > { %265 = vrot.lane.b32.xlu1 %v246_v2, %s6039_s12  ;;  %261 = vrot.lane.b32.xlu0 %v244_v3, %s6039_s12  ;;  %s6050_s28 = smov 127   ;;  %s5758_s26 = scalar_lea.sflag [#allocation4], %s6187_s23 }
  0x3e   : > { %p11672_p12 = scmp.ne.s32.totalorder %s10760_s30, 0 }
  0x41   : > { %269 = vrot.lane.b32.xlu1 %v248_v4, %s6039_s12  ;;  %267 = vrot.lane.b32.xlu0 %v247_v5, %s6039_s12 }
  0x45   : > { %273 = vrot.lane.b32.xlu1 %v250_v6, %s6039_s12  ;;  %271 = vrot.lane.b32.xlu0 %v249_v7, %s6039_s12  ;;  %s6057_s12 = smov [#allocation5]  }
  0xab   : > { %v264_v8 = vpop.permute.xlu1 %263  ;;  %v260_v9 = vpop.permute.xlu0 %259 }
  0xac   : > { %v284_v10 = vsel %vm283_vm0, 0.0, %v260_v9  ;;  %v286_v12 = vsel %vm283_vm0, 0.0, %v264_v8 }
  0xad   : > { %v293_v11 = vsel %vm292_vm1, %v284_v10, 0.0  ;;  %v295_v19 = vsel %vm292_vm1, %v286_v12, 0.0 }
  0xae   : > { %v310_v13 = vrot.slane %v293_v11, 7  ;;  %v313_v25 = vrot.slane %v295_v19, 7 }
  0xaf   : > { %v266_v14 = vpop.permute.xlu1 %265  ;;  %v262_v15 = vpop.permute.xlu0 %261 }
  0xb0   : > { %v6201_v16 = vsel %vm309_vm2, 0.0, %v310_v13  ;;  %v287_v17 = vsel %vm283_vm0, 0.0, %v266_v14  ;;  %v285_v18 = vsel %vm283_vm0, 0.0, %v262_v15  ;;  %v6224_v35 = vsel %vm309_vm2, 0.0, %v313_v25 }
  0xb1   : > { %v296_v20 = vsel %vm292_vm1, %v287_v17, 0.0  ;;  %v294_v21 = vsel %vm292_vm1, %v285_v18, 0.0  ;;  %350 = vrot.lane.b32.xlu0 %v6201_v16, %s6040_s29 }
  0xb2   : > { %v311_v22 = vrot.slane %v294_v21, 7  ;;  %v314_v26 = vrot.slane %v296_v20, 7 }
  0xb3   : > { %v270_v23 = vpop.permute.xlu1 %269  ;;  %v268_v24 = vpop.permute.xlu0 %267 }
  0xb4   : > { %v6211_v27 = vsel %vm309_vm2, %v310_v13, %v311_v22  ;;  %v6214_v28 = vsel %vm309_vm2, %v311_v22, 0.0  ;;  %v288_v29 = vsel %vm283_vm0, 0.0, %v268_v24  ;;  %v289_v30 = vsel %vm283_vm0, 0.0, %v270_v23 }
  0xb5   : > { %10764 = vst [vmem:[#allocation8_spill] sm:$0xff] %v6214_v28  ;;  %354 = vrot.lane.b32.xlu0 %v6214_v28, %s6040_s29  ;;  %352 = vrot.lane.b32.xlu1 %v6211_v27, %s6040_s29  ;;  %v297_v31 = vsel %vm292_vm1, %v288_v29, 0.0  ;;  %v6227_v36 = vsel %vm309_vm2, %v313_v25, %v314_v26  ;;  %v298_v39 = vsel %vm292_vm1, %v289_v30, 0.0  ;;  %v6242_v43 = vsel %vm309_vm2, %v314_v26, 0.0 }
  0xb6   : > { %v316_v32 = vrot.slane %v297_v31, 7  ;;  %10765 = vst [vmem:[#allocation9_spill] sm:$0xff] %v6242_v43  ;;  %v317_v44 = vrot.slane %v298_v39, 7  ;;  %v10430_v22 = vlaneseq  ;;  %v6450_v31 = vld [vmem:[%s10423_s1] sm:$0xff] }
  0xb7   : > { %v274_v33 = vpop.permute.xlu1 %273  ;;  %v272_v34 = vpop.permute.xlu0 %271  ;;  %10782 = vst [vmem:[#allocation26_spill] sm:$0xff] %v6450_v31 }
  0xb8   : > { %v291_v37 = vsel %vm283_vm0, 0.0, %v274_v33  ;;  %v290_v38 = vsel %vm283_vm0, 0.0, %v272_v34  ;;  %v6237_v40 = vsel %vm309_vm2, 0.0, %v316_v32  ;;  %v6249_v45 = vsel %vm309_vm2, %v317_v44, 0.0 }
  0xb9   : > { %358 = vrot.lane.b32.xlu0 %v6227_v36, %s6040_s29  ;;  %356 = vrot.lane.b32.xlu1 %v6224_v35, %s6040_s29  ;;  %v300_v41 = vsel %vm292_vm1, %v291_v37, 0.0  ;;  %v299_v42 = vsel %vm292_vm1, %v290_v38, 0.0  ;;  %10766 = vst [vmem:[#allocation10_spill] sm:$0xff] %v6249_v45  ;;  %v6252_v48 = vsel %vm309_vm2, %v316_v32, %v317_v44  ;;  %v6434_v25 = vshrl.u32 %v10430_v22, 7  ;;  %v5853_v37 = vld [vmem:[%s10424_s2] ss:$0 sm:$0xff] }
  0xba   : > { %v320_v46 = vrot.slane %v300_v41, 7  ;;  %v319_v47 = vrot.slane %v299_v42, 7 }
  0xbb   : > { %10779 = vst [vmem:[#allocation23_spill] sm:$0xff] %v6434_v25  ;;  %v6443_v30 = vsub.s32 0, %v6434_v25  ;;  %v6453_v32 = vsub.s32 1, %v6434_v25 }
  0xbc   : > { %v6259_v49 = vsel %vm309_vm2, %v319_v47, %v320_v46  ;;  %v6262_v50 = vsel %vm309_vm2, 0.0, %v319_v47  ;;  %v6269_v51 = vsel %vm309_vm2, %v320_v46, 0.0 }
  0xbd   : > { %360 = vrot.lane.b32.xlu1 %v6242_v43, %s6040_s29  ;;  %362 = vrot.lane.b32.xlu0 %v6237_v40, %s6040_s29  ;;  %10767 = vst [vmem:[#allocation11_spill] sm:$0xff] %v6269_v51  ;;  %10781 = vst [vmem:[#allocation25_spill] sm:$0xff] %v6443_v30  ;;  %v2371_v38 = vrot.slane %v6450_v31, %v6443_v30  ;;  %v2458_v39 = vrot.slane %v6450_v31, %v6453_v32 }
  0xbe   : > { %10783 = vst [vmem:[#allocation27_spill] sm:$0xff] %v6453_v32 }
  0xc1   : > { %366 = vrot.lane.b32.xlu0 %v6249_v45, %s6040_s29  ;;  %364 = vrot.lane.b32.xlu1 %v6252_v48, %s6040_s29 }
  0xc5   : > { %368 = vrot.lane.b32.xlu1 %v6262_v50, %s6040_s29  ;;  %370 = vrot.lane.b32.xlu0 %v6259_v49, %s6040_s29 }
  0xc9   : > { %372 = vrot.lane.b32.xlu1 %v6269_v51, %s6040_s29  ;;  %386 = vrot.lane.b32.xlu0 %v6201_v16, %s6041_s14  ;;  %s5974_s29 = sshll.u32 %s6057_s12, 4  ;;  %s5975_s29 = int_to_ptr.vmem [resolvable:$false] %s5974_s29 }
  0xcd   : > { %388 = vrot.lane.b32.xlu1 %v6211_v27, %s6041_s14  ;;  %390 = vrot.lane.b32.xlu0 %v6214_v28, %s6041_s14 }
  0xd1   : > { %392 = vrot.lane.b32.xlu1 %v6224_v35, %s6041_s14  ;;  %394 = vrot.lane.b32.xlu0 %v6227_v36, %s6041_s14 }
  0xd5   : > { %396 = vrot.lane.b32.xlu1 %v6242_v43, %s6041_s14  ;;  %398 = vrot.lane.b32.xlu0 %v6237_v40, %s6041_s14 }
  0xd9   : > { %400 = vrot.lane.b32.xlu1 %v6252_v48, %s6041_s14  ;;  %402 = vrot.lane.b32.xlu0 %v6249_v45, %s6041_s14 }
  0xdd   : > { %404 = vrot.lane.b32.xlu1 %v6262_v50, %s6041_s14  ;;  %406 = vrot.lane.b32.xlu0 %v6259_v49, %s6041_s14 }
  0xe1   : > { %408 = vrot.lane.b32.xlu1 %v6269_v51, %s6041_s14  ;;  %422 = vrot.lane.b32.xlu0 %v6201_v16, %s6042_s15  ;;  %s5976_s14 = scalar_lea.vmem %s5975_s29, 2048 }
  0xe5   : > { %424 = vrot.lane.b32.xlu1 %v6211_v27, %s6042_s15  ;;  %426 = vrot.lane.b32.xlu0 %v6214_v28, %s6042_s15 }
  0xe9   : > { %428 = vrot.lane.b32.xlu1 %v6224_v35, %s6042_s15  ;;  %430 = vrot.lane.b32.xlu0 %v6227_v36, %s6042_s15 }
  0xed   : > { %432 = vrot.lane.b32.xlu1 %v6242_v43, %s6042_s15  ;;  %434 = vrot.lane.b32.xlu0 %v6237_v40, %s6042_s15 }
  0xf1   : > { %436 = vrot.lane.b32.xlu1 %v6252_v48, %s6042_s15  ;;  %438 = vrot.lane.b32.xlu0 %v6249_v45, %s6042_s15 }
  0xf5   : > { %440 = vrot.lane.b32.xlu1 %v6262_v50, %s6042_s15  ;;  %442 = vrot.lane.b32.xlu0 %v6259_v49, %s6042_s15 }
  0xf9   : > { %444 = vrot.lane.b32.xlu1 %v6269_v51, %s6042_s15  ;;  %458 = vrot.lane.b32.xlu0 %v6201_v16, %s6043_s16 }
  0xfd   : > { %460 = vrot.lane.b32.xlu1 %v6211_v27, %s6043_s16  ;;  %462 = vrot.lane.b32.xlu0 %v6214_v28, %s6043_s16 }
 0x101   : > { %464 = vrot.lane.b32.xlu1 %v6224_v35, %s6043_s16  ;;  %466 = vrot.lane.b32.xlu0 %v6227_v36, %s6043_s16 }
 0x105   : > { %468 = vrot.lane.b32.xlu1 %v6242_v43, %s6043_s16  ;;  %470 = vrot.lane.b32.xlu0 %v6237_v40, %s6043_s16 }
 0x109   : > { %472 = vrot.lane.b32.xlu1 %v6252_v48, %s6043_s16  ;;  %474 = vrot.lane.b32.xlu0 %v6249_v45, %s6043_s16 }
 0x10d   : > { %476 = vrot.lane.b32.xlu1 %v6262_v50, %s6043_s16  ;;  %478 = vrot.lane.b32.xlu0 %v6259_v49, %s6043_s16 }
 0x111   : > { %480 = vrot.lane.b32.xlu1 %v6269_v51, %s6043_s16  ;;  %494 = vrot.lane.b32.xlu0 %v6201_v16, %s6044_s8 }
 0x115   : > { %496 = vrot.lane.b32.xlu1 %v6211_v27, %s6044_s8  ;;  %498 = vrot.lane.b32.xlu0 %v6214_v28, %s6044_s8 }
 0x119   : > { %500 = vrot.lane.b32.xlu1 %v6224_v35, %s6044_s8  ;;  %502 = vrot.lane.b32.xlu0 %v6227_v36, %s6044_s8 }
 0x11d   : > { %504 = vrot.lane.b32.xlu1 %v6242_v43, %s6044_s8  ;;  %506 = vrot.lane.b32.xlu0 %v6237_v40, %s6044_s8 }
 0x121   : > { %508 = vrot.lane.b32.xlu1 %v6252_v48, %s6044_s8  ;;  %510 = vrot.lane.b32.xlu0 %v6249_v45, %s6044_s8 }
 0x123   : > { %v6318_v52 = vpop.permute.xlu0 %350 }
 0x125   : > { %512 = vrot.lane.b32.xlu1 %v6262_v50, %s6044_s8  ;;  %514 = vrot.lane.b32.xlu0 %v6259_v49, %s6044_s8 }
 0x127   : > { %v6322_v53 = vpop.permute.xlu1 %352  ;;  %v6324_v54 = vpop.permute.xlu0 %354 }
 0x128   : > { %10768 = vst [vmem:[#allocation12_spill] sm:$0xff] %v6324_v54 }
 0x129   : > { %516 = vrot.lane.b32.xlu1 %v6269_v51, %s6044_s8  ;;  %530 = vrot.lane.b32.xlu0 %v6201_v16, %s6045_s7 }
 0x12b   : > { %v6328_v55 = vpop.permute.xlu1 %356  ;;  %v6330_v56 = vpop.permute.xlu0 %358 }
 0x12d   : > { %532 = vrot.lane.b32.xlu1 %v6211_v27, %s6045_s7  ;;  %534 = vrot.lane.b32.xlu0 %v6214_v28, %s6045_s7 }
 0x12f   : > { %v6334_v57 = vpop.permute.xlu1 %360  ;;  %v6336_v58 = vpop.permute.xlu0 %362 }
 0x130   : > { %10769 = vst [vmem:[#allocation13_spill] sm:$0xff] %v6334_v57  ;;  %v6049_v57 = vmov 1934713408  }
 0x131   : > { %536 = vrot.lane.b32.xlu1 %v6224_v35, %s6045_s7  ;;  %538 = vrot.lane.b32.xlu0 %v6227_v36, %s6045_s7 }
 0x133   : > { %v6340_v59 = vpop.permute.xlu1 %364  ;;  %v6342_v60 = vpop.permute.xlu0 %366 }
 0x134   : > { %10770 = vst [vmem:[#allocation14_spill] sm:$0xff] %v6342_v60 }
 0x135   : > { %540 = vrot.lane.b32.xlu1 %v6242_v43, %s6045_s7  ;;  %542 = vrot.lane.b32.xlu0 %v6237_v40, %s6045_s7 }
 0x137   : > { %v6346_v61 = vpop.permute.xlu1 %368  ;;  %v6348_v62 = vpop.permute.xlu0 %370 }
 0x139   : > { %544 = vrot.lane.b32.xlu1 %v6252_v48, %s6045_s7  ;;  %546 = vrot.lane.b32.xlu0 %v6249_v45, %s6045_s7 }
 0x13b   : > { %v6352_v63 = vpop.permute.xlu1 %372  ;;  %v6354_v0 = vpop.permute.xlu0 %386 }
 0x13c   : > { %10771 = vst [vmem:[#allocation15_spill] sm:$0xff] %v6352_v63 }
 0x13d   : > { %548 = vrot.lane.b32.xlu1 %v6262_v50, %s6045_s7  ;;  %550 = vrot.lane.b32.xlu0 %v6259_v49, %s6045_s7 }
 0x13f   : > { %v6358_v1 = vpop.permute.xlu1 %388  ;;  %v6360_v2 = vpop.permute.xlu0 %390 }
 0x140   : > { %10772 = vst [vmem:[#allocation16_spill] sm:$0xff] %v6360_v2 }
 0x141   : > { %552 = vrot.lane.b32.xlu1 %v6269_v51, %s6045_s7  ;;  %566 = vrot.lane.b32.xlu0 %v6201_v16, %s6046_s9 }
 0x143   : > { %v6364_v3 = vpop.permute.xlu1 %392  ;;  %v6366_v4 = vpop.permute.xlu0 %394 }
 0x145   : > { %568 = vrot.lane.b32.xlu1 %v6211_v27, %s6046_s9  ;;  %570 = vrot.lane.b32.xlu0 %v6214_v28, %s6046_s9 }
 0x147   : > { %v6370_v5 = vpop.permute.xlu1 %396  ;;  %v6372_v6 = vpop.permute.xlu0 %398 }
 0x148   : > { %10773 = vst [vmem:[#allocation17_spill] sm:$0xff] %v6370_v5 }
 0x149   : > { %572 = vrot.lane.b32.xlu1 %v6224_v35, %s6046_s9  ;;  %574 = vrot.lane.b32.xlu0 %v6227_v36, %s6046_s9 }
 0x14b   : > { %v6376_v7 = vpop.permute.xlu1 %400  ;;  %v6378_v8 = vpop.permute.xlu0 %402 }
 0x14c   : > { %10774 = vst [vmem:[#allocation18_spill] sm:$0xff] %v6378_v8 }
 0x14d   : > { %576 = vrot.lane.b32.xlu1 %v6242_v43, %s6046_s9  ;;  %578 = vrot.lane.b32.xlu0 %v6237_v40, %s6046_s9 }
 0x14f   : > { %v6382_v9 = vpop.permute.xlu1 %404  ;;  %v6384_v10 = vpop.permute.xlu0 %406 }
 0x151   : > { %580 = vrot.lane.b32.xlu1 %v6252_v48, %s6046_s9  ;;  %582 = vrot.lane.b32.xlu0 %v6249_v45, %s6046_s9 }
 0x153   : > { %v6388_v11 = vpop.permute.xlu1 %408  ;;  %v6390_v12 = vpop.permute.xlu0 %422 }
 0x154   : > { %10775 = vst [vmem:[#allocation19_spill] sm:$0xff] %v6388_v11 }
 0x155   : > { %584 = vrot.lane.b32.xlu1 %v6262_v50, %s6046_s9  ;;  %586 = vrot.lane.b32.xlu0 %v6259_v49, %s6046_s9 }
 0x157   : > { %v6394_v13 = vpop.permute.xlu1 %424  ;;  %v6396_v14 = vpop.permute.xlu0 %426 }
 0x158   : > { %10776 = vst [vmem:[#allocation20_spill] sm:$0xff] %v6396_v14 }
 0x159   : > { %588 = vrot.lane.b32.xlu1 %v6269_v51, %s6046_s9  ;;  %602 = vrot.lane.b32.xlu0 %v6201_v16, %s6047_s10 }
 0x15b   : > { %v6401_v15 = vpop.permute.xlu1 %428  ;;  %v6403_v17 = vpop.permute.xlu0 %430 }
 0x15d   : > { %604 = vrot.lane.b32.xlu1 %v6211_v27, %s6047_s10  ;;  %606 = vrot.lane.b32.xlu0 %v6214_v28, %s6047_s10  ;;  %v1062_v28 = vcombine.high %v6224_v35, %v6364_v3 }
 0x15f   : > { %v6409_v18 = vpop.permute.xlu1 %432  ;;  %v6411_v19 = vpop.permute.xlu0 %434 }
 0x160   : > { %10777 = vst [vmem:[#allocation21_spill] sm:$0xff] %v6409_v18  ;;  %v701_v18 = vunpack.c.l.s4 %v6049_v57  ;;  %v1061_v57 = vcombine.low %v6224_v35, %v6364_v3  ;;  %v1489_v3 = vcombine.high %v6237_v40, %v6372_v6 }
 0x161   : > { %608 = vrot.lane.b32.xlu1 %v6224_v35, %s6047_s10  ;;  %610 = vrot.lane.b32.xlu0 %v6227_v36, %s6047_s10  ;;  %v1247_v35 = vcombine.high %v6227_v36, %v6366_v4 }
 0x163   : > { %v6417_v20 = vpop.permute.xlu1 %436  ;;  %v6419_v21 = vpop.permute.xlu0 %438 }
 0x164   : > { %10778 = vst [vmem:[#allocation22_spill] sm:$0xff] %v6419_v21 }
 0x165   : > { %612 = vrot.lane.b32.xlu1 %v6242_v43, %s6047_s10  ;;  %614 = vrot.lane.b32.xlu0 %v6237_v40, %s6047_s10  ;;  %v702_v43 = vunpack.c.0.s8 %v701_v18 }
 0x167   : > { %v6425_v23 = vpop.permute.xlu1 %440  ;;  %v6427_v24 = vpop.permute.xlu0 %442 }
 0x169   : > { %616 = vrot.lane.b32.xlu1 %v6252_v48, %s6047_s10  ;;  %618 = vrot.lane.b32.xlu0 %v6249_v45, %s6047_s10 }
 0x16b   : > { %v6436_v26 = vpop.permute.xlu1 %444  ;;  %v6438_v29 = vpop.permute.xlu0 %458 }
 0x16c   : > { %10780 = vst [vmem:[#allocation24_spill] sm:$0xff] %v6436_v26 }
 0x16d   : > { %620 = vrot.lane.b32.xlu1 %v6262_v50, %s6047_s10  ;;  %622 = vrot.lane.b32.xlu0 %v6259_v49, %s6047_s10 }
 0x16f   : > { %v6455_v33 = vpop.permute.xlu1 %460  ;;  %v6457_v34 = vpop.permute.xlu0 %462 }
 0x170   : > { %10784 = vst [vmem:[#allocation28_spill] sm:$0xff] %v6457_v34 }
 0x171   : > { %624 = vrot.lane.b32.xlu1 %v6269_v51, %s6047_s10  ;;  %2350 = vbcast.lane.b32.xlu0 %v5853_v37, 256  ;;  %s10250_s10 = scalar_lea.vmem [#allocation5], %s5851_s25  ;;  %s5862_s25 = sshll.u32 %s6111_s22, 10 }
 0x172   : > { %s5771_s11 = sshll.u32 %s10250_s10, 4  ;;  %s10373_s22 = scalar_lea.hbm %s10427_s5, %s5862_s25  ;;  %s10375_s11 = int_to_ptr.vmem [resolvable:$true] %s5771_s11 }
 0x173   : > { %v6468_v41 = vpop.permute.xlu1 %464  ;;  %v6470_v42 = vpop.permute.xlu0 %466  ;;  %p5977_p5 = scmp.lt.s32.totalorder %s10375_s11, %s5975_s29 }
 0x175   : > { %2373 = vbcast.lane.b32.xlu1 %v2371_v38, 256  ;;  %2460 = vbcast.lane.b32.xlu0 %v2458_v39, 256 }
 0x177   : > { %v6472_v44 = vpop.permute.xlu1 %468  ;;  %v6474_v46 = vpop.permute.xlu0 %470 }
 0x178   : > { %10785 = vst [vmem:[#allocation29_spill] sm:$0xff] %v6472_v44 }
 0x17b   : > { %v6476_v47 = vpop.permute.xlu1 %472  ;;  %v6478_v22 = vpop.permute.xlu0 %474 }
 0x17c   : > { %10786 = vst [vmem:[#allocation30_spill] sm:$0xff] %v6478_v22  ;;  %v6048_v22 = vmov 1983009808  }
 0x17d   : > { %v637_v45 = vunpack.c.l.s4 %v6048_v22  ;;  %v635_v22 = vcombine.high %v6201_v16, %v6354_v0 }
 0x17f   : > { %v6480_v51 = vpop.permute.xlu1 %476  ;;  %v6482_v37 = vpop.permute.xlu0 %478 }
 0x180   : > { %10787 = vst [vmem:[#allocation31_spill] sm:$0xff] %v6482_v37 }
 0x183   : > { %v6484_v11 = vpop.permute.xlu1 %480  ;;  %v6486_v63 = vpop.permute.xlu0 %494 }
 0x184   : > { %10788 = vst [vmem:[#allocation32_spill] sm:$0xff] %v6484_v11  ;;  %v638_v11 = vunpack.c.0.s8 %v637_v45  ;;  %v820_v45 = vcombine.high %v6211_v27, %v6358_v1 }
 0x187   : > { %v6488_v26 = vpop.permute.xlu1 %496  ;;  %v6490_v38 = vpop.permute.xlu0 %498 }
 0x188   : > { %10789 = vst [vmem:[#allocation33_spill] sm:$0xff] %v6490_v38  ;;  %v6509_v38 = vsub.s32 %v638_v11, %v6434_v25  ;;  %v650_v11 = vcombine.low %v6318_v52, %v6390_v12 }
 0x18a   : > { %10794 = vst [vmem:[#allocation38_spill] sm:$0xff] %v6509_v38  ;;  %v6543_v31 = vrot.slane %v1061_v57, %v6509_v38 }
 0x18b   : > { %v6492_v39 = vpop.permute.xlu1 %500  ;;  %v6494_v44 = vpop.permute.xlu0 %502 }
 0x18f   : > { %v6496_v60 = vpop.permute.xlu1 %504  ;;  %v6498_v21 = vpop.permute.xlu0 %506 }
 0x190   : > { %10790 = vst [vmem:[#allocation34_spill] sm:$0xff] %v6496_v60  ;;  %v634_v60 = vcombine.low %v6201_v16, %v6354_v0  ;;  %v1246_v16 = vcombine.low %v6227_v36, %v6366_v4  ;;  %v6532_v0 = vsub.s32 %v702_v43, %v6434_v25  ;;  %v1488_v43 = vcombine.low %v6237_v40, %v6372_v6 }
 0x191   : > { %v6563_v4 = vrot.slane %v1062_v28, %v6509_v38  ;;  %v1674_v40 = vcombine.high %v6252_v48, %v6376_v7  ;;  %v1915_v6 = vcombine.low %v6262_v50, %v6382_v9  ;;  %v836_v28 = vcombine.high %v6322_v53, %v6394_v13 }
 0x192   : > { %10796 = vst [vmem:[#allocation40_spill] sm:$0xff] %v6532_v0 }
 0x193   : > { %v6500_v8 = vpop.permute.xlu1 %508  ;;  %v6502_v34 = vpop.permute.xlu0 %510  ;;  %v850_v30 = vrot.slane %v836_v28, %v6509_v38 }
 0x194   : > { %10791 = vst [vmem:[#allocation35_spill] sm:$0xff] %v6502_v34  ;;  %v819_v34 = vcombine.low %v6211_v27, %v6358_v1  ;;  %v642_v27 = vrot.slane %v634_v60, %v6509_v38  ;;  %v649_v1 = vrot.slane %v635_v22, %v6509_v38  ;;  %v651_v60 = vcombine.high %v6318_v52, %v6390_v12 }
 0x195   : > { %v658_v22 = vrot.slane %v650_v11, %v6509_v38  ;;  %v6566_v52 = vrot.slane %v1246_v16, %v6509_v38  ;;  %v1916_v12 = vcombine.high %v6262_v50, %v6382_v9  ;;  %v2100_v11 = vcombine.low %v6259_v49, %v6384_v10 }
 0x196   : > { %v6537_v2 = vrot.slane %v819_v34, %v6509_v38  ;;  %v1673_v34 = vcombine.low %v6252_v48, %v6376_v7  ;;  %v6581_v16 = vrot.slane %v1247_v35, %v6509_v38  ;;  %v6584_v48 = vrot.slane %v1488_v43, %v6509_v38 }
 0x197   : > { %v6504_v54 = vpop.permute.xlu1 %512  ;;  %v6506_v14 = vpop.permute.xlu0 %514  ;;  %v665_v7 = vrot.slane %v651_v60, %v6509_v38  ;;  %v1077_v50 = vcombine.low %v6328_v55, %v6401_v15  ;;  %v6590_v9 = vrot.slane %v1489_v3, %v6509_v38  ;;  %v6601_v35 = vrot.slane %v1674_v40, %v6509_v38 }
 0x198   : > { %10792 = vst [vmem:[#allocation36_spill] sm:$0xff] %v6504_v54  ;;  %10793 = vst [vmem:[#allocation37_spill] sm:$0xff] %v6506_v14  ;;  %v6593_v25 = vrot.slane %v1673_v34, %v6509_v38  ;;  %v6604_v43 = vrot.slane %v1915_v6, %v6509_v38  ;;  %v699_v60 = vcombine.high %v642_v27, %v658_v22 }
 0x199   : > { %v1078_v3 = vcombine.high %v6328_v55, %v6401_v15  ;;  %v6609_v34 = vrot.slane %v1916_v12, %v6509_v38  ;;  %v6612_v32 = vrot.slane %v2100_v11, %v6509_v38  ;;  %v714_v40 = vcombine.low %v649_v1, %v665_v7 }
 0x19a   : > { %v715_v14 = vcombine.high %v649_v1, %v665_v7  ;;  %v1085_v6 = vrot.slane %v1077_v50, %v6509_v38  ;;  %v6634_v1 = vrot.slane %v699_v60, %v6532_v0  ;;  %v1505_v50 = vcombine.high %v6336_v58, %v6411_v19 }
 0x19b   : > { %v6523_v5 = vpop.permute.xlu1 %516  ;;  %v6525_v18 = vpop.permute.xlu0 %530  ;;  %v1092_v7 = vrot.slane %v1078_v3, %v6509_v38  ;;  %v6647_v60 = vrot.slane %v714_v40, %v6532_v0 }
 0x19c   : > { %10795 = vst [vmem:[#allocation39_spill] sm:$0xff] %v6523_v5  ;;  %v6540_v5 = vrot.slane %v820_v45, %v6509_v38  ;;  %v835_v45 = vcombine.low %v6322_v53, %v6394_v13 }
 0x19d   : > { %10799 = vst [vmem:[#allocation43_spill] sm:$0xff] %v6647_v60 }
 0x19e   : > { %v843_v53 = vrot.slane %v835_v45, %v6509_v38 }
 0x19f   : > { %v6558_v57 = vpop.permute.xlu1 %532  ;;  %v6560_v36 = vpop.permute.xlu0 %534 }
 0x1a0   : > { %10797 = vst [vmem:[#allocation41_spill] sm:$0xff] %v6560_v36  ;;  %v2101_v36 = vcombine.high %v6259_v49, %v6384_v10  ;;  %v698_v49 = vcombine.low %v642_v27, %v658_v22  ;;  %v1262_v27 = vcombine.low %v6330_v56, %v6403_v17  ;;  %v883_v15 = vcombine.low %v6537_v2, %v843_v53 }
 0x1a1   : > { %v1263_v22 = vcombine.high %v6330_v56, %v6403_v17  ;;  %v884_v28 = vcombine.high %v6537_v2, %v843_v53  ;;  %v900_v56 = vcombine.high %v6540_v5, %v850_v30  ;;  %v1689_v17 = vcombine.low %v6340_v59, %v6417_v20 }
 0x1a2   : > { %v6615_v45 = vrot.slane %v2101_v36, %v6509_v38  ;;  %v6622_v55 = vrot.slane %v698_v49, %v6532_v0  ;;  %v1504_v36 = vcombine.low %v6336_v58, %v6411_v19  ;;  %v899_v49 = vcombine.low %v6540_v5, %v850_v30 }
 0x1a3   : > { %v6596_v10 = vpop.permute.xlu1 %536  ;;  %v6598_v13 = vpop.permute.xlu0 %538  ;;  %v1125_v2 = vcombine.low %v6543_v31, %v1085_v6  ;;  %v1126_v53 = vcombine.high %v6543_v31, %v1085_v6  ;;  %v1270_v3 = vrot.slane %v1262_v27, %v6509_v38  ;;  %v6653_v58 = vrot.slane %v715_v14, %v6532_v0 }
 0x1a4   : > { %v6656_v5 = vrot.slane %v883_v15, %v6532_v0  ;;  %v1277_v19 = vrot.slane %v1263_v22, %v6509_v38  ;;  %v1512_v30 = vrot.slane %v1504_v36, %v6509_v38  ;;  %v6665_v40 = vrot.slane %v884_v28, %v6532_v0 }
 0x1a5   : > { %v1141_v31 = vcombine.low %v6563_v4, %v1092_v7  ;;  %v1142_v6 = vcombine.high %v6563_v4, %v1092_v7  ;;  %v1519_v14 = vrot.slane %v1505_v50, %v6509_v38  ;;  %v6671_v27 = vrot.slane %v899_v49, %v6532_v0 }
 0x1a6   : > { %10801 = vst [vmem:[#allocation45_spill] sm:$0xff] %v6665_v40  ;;  %v6674_v15 = vrot.slane %v900_v56, %v6532_v0  ;;  %v1697_v22 = vrot.slane %v1689_v17, %v6509_v38  ;;  %v6682_v28 = vrot.slane %v1126_v53, %v6532_v0  ;;  %v1310_v4 = vcombine.low %v6566_v52, %v1270_v3 }
 0x1a7   : > { %v6629_v12 = vpop.permute.xlu1 %540  ;;  %v6631_v11 = vpop.permute.xlu0 %542  ;;  %v1311_v7 = vcombine.high %v6566_v52, %v1270_v3  ;;  %v1326_v50 = vcombine.low %v6581_v16, %v1277_v19  ;;  %v1327_v49 = vcombine.high %v6581_v16, %v1277_v19  ;;  %v1552_v56 = vcombine.low %v6584_v48, %v1512_v30 }
 0x1a8   : > { %10798 = vst [vmem:[#allocation42_spill] sm:$0xff] %v6629_v12  ;;  %v1690_v12 = vcombine.high %v6340_v59, %v6417_v20  ;;  %10802 = vst [vmem:[#allocation46_spill] sm:$0xff] %v6674_v15  ;;  %v1553_v17 = vcombine.high %v6584_v48, %v1512_v30  ;;  %v6698_v53 = vrot.slane %v1142_v6, %v6532_v0 }
 0x1a9   : > { %v1568_v52 = vcombine.low %v6590_v9, %v1519_v14  ;;  %v1569_v3 = vcombine.high %v6590_v9, %v1519_v14  ;;  %v1737_v16 = vcombine.low %v6593_v25, %v1697_v22  ;;  %v1738_v19 = vcombine.high %v6593_v25, %v1697_v22 }
 0x1aa   : > { %v1704_v36 = vrot.slane %v1690_v12, %v6509_v38  ;;  %10804 = vst [vmem:[#allocation48_spill] sm:$0xff] %v6698_v53  ;;  %v6707_v37 = vrot.slane %v1310_v4, %v6532_v0  ;;  %v666_v6 = vcombine.low %v6438_v29, %v6525_v18  ;;  %v667_v9 = vcombine.high %v6438_v29, %v6525_v18 }
 0x1ab   : > { %v6660_v59 = vpop.permute.xlu1 %544  ;;  %v6662_v20 = vpop.permute.xlu0 %546  ;;  %v6717_v14 = vrot.slane %v1326_v50, %v6532_v0  ;;  %v6720_v25 = vrot.slane %v1327_v49, %v6532_v0  ;;  %v6726_v22 = vrot.slane %v1553_v17, %v6532_v0  ;;  %v6734_v29 = vrot.slane %v1569_v3, %v6532_v0 }
 0x1ac   : > { %10800 = vst [vmem:[#allocation44_spill] sm:$0xff] %v6662_v20  ;;  %v6679_v20 = vrot.slane %v1125_v2, %v6532_v0  ;;  %v6695_v2 = vrot.slane %v1141_v31, %v6532_v0  ;;  %v1753_v48 = vcombine.low %v6601_v35, %v1704_v36  ;;  %v1754_v30 = vcombine.high %v6601_v35, %v1704_v36 }
 0x1ad   : > { %10805 = vst [vmem:[#allocation49_spill] sm:$0xff] %v6707_v37  ;;  %v6710_v31 = vrot.slane %v1311_v7, %v6532_v0  ;;  %10807 = vst [vmem:[#allocation51_spill] sm:$0xff] %v6717_v14  ;;  %v6723_v35 = vrot.slane %v1552_v56, %v6532_v0  ;;  %v6731_v7 = vrot.slane %v1568_v52, %v6532_v0 }
 0x1ae   : > { %10808 = vst [vmem:[#allocation52_spill] sm:$0xff] %v6726_v22  ;;  %10811 = vst [vmem:[#allocation55_spill] sm:$0xff] %v6734_v29  ;;  %v6739_v49 = vrot.slane %v1737_v16, %v6532_v0  ;;  %v6742_v56 = vrot.slane %v1738_v19, %v6532_v0  ;;  %v6745_v17 = vrot.slane %v1753_v48, %v6532_v0 }
 0x1af   : > { %v6690_v54 = vpop.permute.xlu1 %548  ;;  %v6692_v12 = vpop.permute.xlu0 %550  ;;  %10806 = vst [vmem:[#allocation50_spill] sm:$0xff] %v6710_v31  ;;  %10810 = vst [vmem:[#allocation54_spill] sm:$0xff] %v6731_v7  ;;  %v674_v52 = vrot.slane %v666_v6, %v6509_v38  ;;  %v681_v3 = vrot.slane %v667_v9, %v6509_v38  ;;  %v1931_v16 = vcombine.low %v6346_v61, %v6425_v23 }
 0x1b0   : > { %10803 = vst [vmem:[#allocation47_spill] sm:$0xff] %v6692_v12  ;;  %10812 = vst [vmem:[#allocation56_spill] sm:$0xff] %v6739_v49  ;;  %v1932_v19 = vcombine.high %v6346_v61, %v6425_v23  ;;  %v851_v48 = vcombine.low %v6455_v33, %v6558_v57 }
 0x1b1   : > { %10813 = vst [vmem:[#allocation57_spill] sm:$0xff] %v6742_v56  ;;  %10814 = vst [vmem:[#allocation58_spill] sm:$0xff] %v6745_v17  ;;  %v2117_v56 = vcombine.high %v6348_v62, %v6427_v24 }
 0x1b3   : > { %v6728_v36 = vpop.permute.xlu1 %552  ;;  %v567_v4 = vpop.permute.xlu0 %566 }
 0x1b4   : > { %10809 = vst [vmem:[#allocation53_spill] sm:$0xff] %v6728_v36  ;;  %v682_v18 = vcombine.low %v6486_v63, %v567_v4  ;;  %v683_v50 = vcombine.high %v6486_v63, %v567_v4  ;;  %v6748_v36 = vrot.slane %v1754_v30, %v6532_v0  ;;  %v852_v30 = vcombine.high %v6455_v33, %v6558_v57 }
 0x1b6   : > { %10815 = vst [vmem:[#allocation59_spill] sm:$0xff] %v6748_v36  ;;  %v690_v12 = vrot.slane %v682_v18, %v6509_v38  ;;  %v697_v63 = vrot.slane %v683_v50, %v6509_v38  ;;  %v2116_v50 = vcombine.low %v6348_v62, %v6427_v24  ;;  %v6786_v62 = vrot.slane %v1932_v19, %v6509_v38 }
 0x1b7   : > { %v569_v4 = vpop.permute.xlu1 %568  ;;  %v6762_v6 = vpop.permute.xlu0 %570  ;;  %v1093_v19 = vcombine.low %v6468_v41, %v6596_v10 }
 0x1b8   : > { %10816 = vst [vmem:[#allocation60_spill] sm:$0xff] %v6762_v6  ;;  %v730_v9 = vcombine.low %v674_v52, %v690_v12  ;;  %v731_v36 = vcombine.high %v674_v52, %v690_v12  ;;  %v746_v18 = vcombine.low %v681_v3, %v697_v63  ;;  %v747_v17 = vcombine.high %v681_v3, %v697_v63 }
 0x1b9   : > { %v867_v61 = vcombine.low %v6488_v26, %v569_v4  ;;  %v868_v23 = vcombine.high %v6488_v26, %v569_v4  ;;  %v6783_v52 = vrot.slane %v1931_v16, %v6509_v38  ;;  %v866_v63 = vrot.slane %v852_v30, %v6509_v38 }
 0x1ba   : > { %v6771_v49 = vrot.slane %v730_v9, %v6532_v0  ;;  %v6774_v33 = vrot.slane %v731_v36, %v6532_v0  ;;  %v6777_v57 = vrot.slane %v746_v18, %v6532_v0  ;;  %v6780_v12 = vrot.slane %v747_v17, %v6532_v0 }
 0x1bb   : > { %v875_v24 = vrot.slane %v867_v61, %v6509_v38  ;;  %v882_v26 = vrot.slane %v868_v23, %v6509_v38  ;;  %v575_v3 = vpop.permute.xlu0 %574  ;;  %v859_v36 = vrot.slane %v851_v48, %v6509_v38  ;;  %v573_v16 = vpop.permute.xlu1 %572  ;;  %v1094_v9 = vcombine.high %v6468_v41, %v6596_v10 }
 0x1bc   : > { %v6794_v4 = vcombine.high %v6622_v55, %v6771_v49  ;;  %v6798_v17 = vcombine.high %v6634_v1, %v6774_v33  ;;  %v6806_v48 = vcombine.high %v6647_v60, %v6777_v57  ;;  %v6810_v30 = vcombine.high %v6653_v58, %v6780_v12 }
 0x1bd   : > { %v915_v18 = vcombine.low %v859_v36, %v875_v24  ;;  %v916_v61 = vcombine.high %v859_v36, %v875_v24  ;;  %v931_v23 = vcombine.low %v866_v63, %v882_v26  ;;  %v932_v6 = vcombine.high %v866_v63, %v882_v26 }
 0x1be   : > { %10817 = vst [vmem:[#allocation61_spill] sm:$0xff] %v6794_v4  ;;  %10818 = vst [vmem:[#allocation62_spill] sm:$0xff] %v6798_v17  ;;  %v1278_v4 = vcombine.low %v6470_v42, %v6598_v13  ;;  %v1279_v17 = vcombine.high %v6470_v42, %v6598_v13  ;;  %v1109_v41 = vcombine.low %v6492_v39, %v573_v16 }
 0x1bf   : > { %10819 = vst [vmem:[#allocation63_spill] sm:$0xff] %v6806_v48  ;;  %10820 = vst [vmem:[#allocation64_spill] sm:$0xff] %v6810_v30  ;;  %v1110_v10 = vcombine.high %v6492_v39, %v573_v16  ;;  %v6818_v60 = vpop.permute.xlu0 %578  ;;  %v6821_v48 = vrot.slane %v915_v18, %v6532_v0  ;;  %v6824_v30 = vrot.slane %v916_v61, %v6532_v0  ;;  %v6846_v61 = vpop.permute.xlu1 %576 }
 0x1c0   : > { %v6827_v24 = vrot.slane %v931_v23, %v6532_v0  ;;  %v6830_v26 = vrot.slane %v932_v6, %v6532_v0  ;;  %v1117_v42 = vrot.slane %v1109_v41, %v6509_v38  ;;  %v1294_v39 = vcombine.low %v6494_v44, %v575_v3  ;;  %10823 = vst [vmem:[#allocation67_spill] sm:$0xff] %v6846_v61 }
 0x1c1   : > { %v1124_v13 = vrot.slane %v1110_v10, %v6509_v38  ;;  %v1295_v36 = vcombine.high %v6494_v44, %v575_v3  ;;  %v1101_v63 = vrot.slane %v1093_v19, %v6509_v38  ;;  %v1108_v16 = vrot.slane %v1094_v9, %v6509_v38 }
 0x1c2   : > { %v6840_v18 = vcombine.high %v6656_v5, %v6821_v48  ;;  %v6844_v6 = vcombine.high %v6665_v40, %v6824_v30  ;;  %v6849_v23 = vrot.slane %v2116_v50, %v6509_v38  ;;  %v6852_v41 = vrot.slane %v2117_v56, %v6509_v38 }
 0x1c3   : > { %v6856_v44 = vcombine.high %v6671_v27, %v6827_v24  ;;  %v6860_v3 = vcombine.high %v6674_v15, %v6830_v26  ;;  %v1286_v19 = vrot.slane %v1278_v4, %v6509_v38  ;;  %v1157_v9 = vcombine.low %v1101_v63, %v1117_v42  ;;  %v6866_v40 = vpop.permute.xlu0 %582 }
 0x1c4   : > { %10821 = vst [vmem:[#allocation65_spill] sm:$0xff] %v6840_v18  ;;  %10822 = vst [vmem:[#allocation66_spill] sm:$0xff] %v6844_v6  ;;  %v1158_v10 = vcombine.high %v1101_v63, %v1117_v42  ;;  %v1173_v18 = vcombine.low %v1108_v16, %v1124_v13  ;;  %v1293_v61 = vrot.slane %v1279_v17, %v6509_v38 }
 0x1c5   : > { %10824 = vst [vmem:[#allocation68_spill] sm:$0xff] %v6856_v44  ;;  %10825 = vst [vmem:[#allocation69_spill] sm:$0xff] %v6860_v3  ;;  %v1174_v50 = vcombine.high %v1108_v16, %v1124_v13  ;;  %v1302_v6 = vrot.slane %v1294_v39, %v6509_v38  ;;  %v1309_v56 = vrot.slane %v1295_v36, %v6509_v38 }
 0x1c6   : > { %10826 = vst [vmem:[#allocation70_spill] sm:$0xff] %v6866_v40  ;;  %v6869_v44 = vrot.slane %v1157_v9, %v6532_v0  ;;  %v6872_v15 = vrot.slane %v1158_v10, %v6532_v0  ;;  %v6875_v4 = vrot.slane %v1173_v18, %v6532_v0  ;;  %v1536_v42 = vcombine.low %v6498_v21, %v6818_v60  ;;  %v581_v10 = vpop.permute.xlu1 %580 }
 0x1c7   : > { %v6880_v17 = vrot.slane %v1174_v50, %v6532_v0  ;;  %v1342_v13 = vcombine.low %v1286_v19, %v1302_v6  ;;  %v1343_v39 = vcombine.high %v1286_v19, %v1302_v6  ;;  %v1358_v36 = vcombine.low %v1293_v61, %v1309_v56 }
 0x1c8   : > { %v1979_v63 = vcombine.low %v6604_v43, %v6783_v52  ;;  %v1520_v16 = vcombine.low %v6474_v46, %v6631_v11  ;;  %v6888_v9 = vcombine.high %v6679_v20, %v6869_v44  ;;  %v6892_v18 = vcombine.high %v6682_v28, %v6872_v15 }
 0x1c9   : > { %v1521_v6 = vcombine.high %v6474_v46, %v6631_v11  ;;  %v6900_v19 = vcombine.high %v6695_v2, %v6875_v4  ;;  %v6904_v40 = vcombine.high %v6698_v53, %v6880_v17  ;;  %v1359_v3 = vcombine.high %v1293_v61, %v1309_v56  ;;  %v6921_v53 = vpop.permute.xlu0 %586 }
 0x1ca   : > { %10827 = vst [vmem:[#allocation71_spill] sm:$0xff] %v6888_v9  ;;  %10828 = vst [vmem:[#allocation72_spill] sm:$0xff] %v6892_v18  ;;  %v6907_v9 = vrot.slane %v1342_v13, %v6532_v0  ;;  %v6910_v18 = vrot.slane %v1343_v39, %v6532_v0  ;;  %v6913_v50 = vrot.slane %v1358_v36, %v6532_v0 }
 0x1cb   : > { %10829 = vst [vmem:[#allocation73_spill] sm:$0xff] %v6900_v19  ;;  %10830 = vst [vmem:[#allocation74_spill] sm:$0xff] %v6904_v40  ;;  %v1705_v46 = vcombine.low %v6476_v47, %v6660_v59  ;;  %v1537_v11 = vcombine.high %v6498_v21, %v6818_v60  ;;  %v1544_v19 = vrot.slane %v1536_v42, %v6509_v38 }
 0x1cc   : > { %v1721_v40 = vcombine.low %v6500_v8, %v581_v10  ;;  %v1995_v13 = vcombine.low %v6609_v34, %v6786_v62  ;;  %v1528_v61 = vrot.slane %v1520_v16, %v6509_v38  ;;  %v6927_v56 = vrot.slane %v1359_v3, %v6532_v0 }
 0x1cd   : > { %v6931_v39 = vcombine.high %v6707_v37, %v6907_v9  ;;  %v1535_v60 = vrot.slane %v1521_v6, %v6509_v38  ;;  %v6938_v42 = vcombine.high %v6710_v31, %v6910_v18  ;;  %v6942_v36 = vcombine.high %v6717_v14, %v6913_v50 }
 0x1ce   : > { %v1706_v3 = vcombine.high %v6476_v47, %v6660_v59  ;;  %v6948_v16 = vcombine.high %v6720_v25, %v6927_v56  ;;  %v1584_v21 = vcombine.low %v1528_v61, %v1544_v19  ;;  %v1713_v6 = vrot.slane %v1705_v46, %v6509_v38 }
 0x1cf   : > { %10831 = vst [vmem:[#allocation75_spill] sm:$0xff] %v6931_v39  ;;  %10832 = vst [vmem:[#allocation76_spill] sm:$0xff] %v6938_v42  ;;  %v1551_v39 = vrot.slane %v1537_v11, %v6509_v38  ;;  %v1585_v37 = vcombine.high %v1528_v61, %v1544_v19  ;;  %v1722_v31 = vcombine.high %v6500_v8, %v581_v10  ;;  %v6965_v8 = vpop.permute.xlu0 %602 }
 0x1d0   : > { %10833 = vst [vmem:[#allocation77_spill] sm:$0xff] %v6942_v36  ;;  %10834 = vst [vmem:[#allocation78_spill] sm:$0xff] %v6948_v16  ;;  %v1729_v42 = vrot.slane %v1721_v40, %v6509_v38  ;;  %v6957_v14 = vrot.slane %v1584_v21, %v6532_v0  ;;  %v1720_v40 = vrot.slane %v1706_v3, %v6509_v38  ;;  %v585_v3 = vpop.permute.xlu1 %584 }
 0x1d1   : > { %v1600_v47 = vcombine.low %v1535_v60, %v1551_v39  ;;  %v1601_v59 = vcombine.high %v1535_v60, %v1551_v39  ;;  %v6962_v11 = vrot.slane %v1585_v37, %v6532_v0  ;;  %v1736_v19 = vrot.slane %v1722_v31, %v6509_v38  ;;  %10835 = vst [vmem:[#allocation79_spill] sm:$0xff] %v6965_v8 }
 0x1d2   : > { %v1769_v46 = vcombine.low %v1713_v6, %v1729_v42  ;;  %v6976_v39 = vcombine.high %v6723_v35, %v6957_v14  ;;  %v1947_v37 = vcombine.low %v6480_v51, %v6690_v54  ;;  %v1770_v21 = vcombine.high %v1713_v6, %v1729_v42 }
 0x1d3   : > { %v6969_v10 = vrot.slane %v1600_v47, %v6532_v0  ;;  %v6972_v61 = vrot.slane %v1601_v59, %v6532_v0  ;;  %v6982_v31 = vcombine.high %v6726_v22, %v6962_v11  ;;  %v2180_v47 = vcombine.low %v6615_v45, %v6852_v41 }
 0x1d4   : > { %10838 = vst [vmem:[#allocation82_spill] sm:$0xff] %v6976_v39  ;;  %v6985_v60 = vrot.slane %v1769_v46, %v6532_v0  ;;  %v1948_v59 = vcombine.high %v6480_v51, %v6690_v54  ;;  %v7000_v42 = vrot.slane %v1979_v63, %v6532_v0  ;;  %v7003_v6 = vrot.slane %v1770_v21, %v6532_v0  ;;  %v10844_v39 = vld [vmem:[#allocation47_spill] sm:$0xff]  ;;  %v10846_v51 = vld [vmem:[#allocation56_spill] sm:$0xff] }
 0x1d5   : > { %10836 = vst [vmem:[#allocation80_spill] sm:$0xff] %v6969_v10  ;;  %10837 = vst [vmem:[#allocation81_spill] sm:$0xff] %v6972_v61  ;;  %v6993_v16 = vcombine.high %v6731_v7, %v6969_v10  ;;  %v6997_v36 = vcombine.high %v6734_v29, %v6972_v61  ;;  %v1785_v46 = vcombine.low %v1720_v40, %v1736_v19  ;;  %v7024_v61 = vpop.permute.xlu0 %606 }
 0x1d6   : > { %10839 = vst [vmem:[#allocation83_spill] sm:$0xff] %v6982_v31  ;;  %10840 = vst [vmem:[#allocation84_spill] sm:$0xff] %v6985_v60  ;;  %v1786_v8 = vcombine.high %v1720_v40, %v1736_v19  ;;  %v10845_v31 = vld [vmem:[#allocation31_spill] sm:$0xff]  ;;  %v7009_v54 = vcombine.high %v10846_v51, %v6985_v60  ;;  %v10849_v19 = vld [vmem:[#allocation57_spill] sm:$0xff] }
 0x1d7   : > { %10841 = vst [vmem:[#allocation85_spill] sm:$0xff] %v6993_v16  ;;  %10842 = vst [vmem:[#allocation86_spill] sm:$0xff] %v6997_v36  ;;  %v2132_v22 = vcombine.low %v10845_v31, %v10844_v39  ;;  %v10848_v16 = vld [vmem:[#allocation36_spill] sm:$0xff]  ;;  %v1955_v36 = vrot.slane %v1947_v37, %v6509_v38  ;;  %v7015_v63 = vrot.slane %v1785_v46, %v6532_v0  ;;  %v10852_v37 = vld [vmem:[#allocation37_spill] sm:$0xff] }
 0x1d8   : > { %10843 = vst [vmem:[#allocation87_spill] sm:$0xff] %v7003_v6  ;;  %10847 = vst [vmem:[#allocation47_spill] sm:$0xff] %v7009_v54  ;;  %v1963_v7 = vcombine.low %v10848_v16, %v585_v3  ;;  %v1964_v29 = vcombine.high %v10848_v16, %v585_v3  ;;  %v7018_v21 = vrot.slane %v1786_v8, %v6532_v0 }
 0x1d9   : > { %v7022_v40 = vcombine.high %v10849_v19, %v7003_v6  ;;  %10851 = vst [vmem:[#allocation36_spill] sm:$0xff] %v7024_v61  ;;  %v1962_v54 = vrot.slane %v1948_v59, %v6509_v38  ;;  %v2148_v3 = vcombine.low %v10852_v37, %v6921_v53  ;;  %v10853_v8 = vcombine.high %v6604_v43, %v6783_v52  ;;  %v10854_v61 = vld [vmem:[#allocation58_spill] sm:$0xff] }
 0x1da   : > { %v1971_v51 = vrot.slane %v1963_v7, %v6509_v38  ;;  %v1978_v16 = vrot.slane %v1964_v29, %v6509_v38  ;;  %v7038_v19 = vrot.slane %v1995_v13, %v6532_v0  ;;  %v10856_v7 = vld [vmem:[#allocation59_spill] sm:$0xff]  ;;  %v2133_v29 = vcombine.high %v10845_v31, %v10844_v39 }
 0x1db   : > { %10850 = vst [vmem:[#allocation31_spill] sm:$0xff] %v7022_v40  ;;  %v7035_v46 = vrot.slane %v10853_v8, %v6532_v0  ;;  %v7042_v40 = vcombine.high %v10854_v61, %v7015_v63  ;;  %v7046_v59 = vcombine.high %v10856_v7, %v7018_v21  ;;  %v2140_v43 = vrot.slane %v2132_v22, %v6509_v38 }
 0x1dc   : > { %v2011_v6 = vcombine.low %v1955_v36, %v1971_v51  ;;  %v2012_v60 = vcombine.high %v1955_v36, %v1971_v51  ;;  %v2027_v10 = vcombine.low %v1962_v54, %v1978_v16  ;;  %v2028_v52 = vcombine.high %v1962_v54, %v1978_v16  ;;  %v7073_v54 = vpop.permute.xlu0 %610 }
 0x1dd   : > { %10855 = vst [vmem:[#allocation37_spill] sm:$0xff] %v7042_v40  ;;  %10857 = vst [vmem:[#allocation58_spill] sm:$0xff] %v7046_v59  ;;  %v2149_v13 = vcombine.high %v10852_v37, %v6921_v53  ;;  %v2156_v8 = vrot.slane %v2148_v3, %v6509_v38  ;;  %v10858_v40 = vcombine.high %v6609_v34, %v6786_v62 }
 0x1de   : > { %v7061_v59 = vrot.slane %v2011_v6, %v6532_v0  ;;  %v7064_v36 = vrot.slane %v2012_v60, %v6532_v0  ;;  %v7067_v22 = vrot.slane %v2027_v10, %v6532_v0  ;;  %v7070_v39 = vrot.slane %v2028_v52, %v6532_v0  ;;  %10859 = vst [vmem:[#allocation88_spill] sm:$0xff] %v7073_v54  ;;  %v10875_v54 = vld [vmem:[#allocation25_spill] sm:$0xff] }
 0x1df   : > { %v7058_v7 = vrot.slane %v10858_v40, %v6532_v0  ;;  %v2163_v53 = vrot.slane %v2149_v13, %v6509_v38  ;;  %v2196_v31 = vcombine.low %v2140_v43, %v2156_v8  ;;  %v2197_v51 = vcombine.high %v2140_v43, %v2156_v8 }
 0x1e0   : > { %v2181_v34 = vcombine.high %v6615_v45, %v6852_v41  ;;  %v2147_v62 = vrot.slane %v2133_v29, %v6509_v38  ;;  %v7080_v60 = vcombine.high %v7000_v42, %v7061_v59  ;;  %v7084_v10 = vcombine.high %v7035_v46, %v7064_v36 }
 0x1e1   : > { %v10862_v6 = vcombine.low %v6612_v32, %v6849_v23  ;;  %v7094_v16 = vcombine.high %v7038_v19, %v7067_v22  ;;  %v7098_v45 = vcombine.high %v7058_v7, %v7070_v39  ;;  %v7101_v41 = vrot.slane %v2196_v31, %v6532_v0 }
 0x1e2   : > { %10860 = vst [vmem:[#allocation89_spill] sm:$0xff] %v7080_v60  ;;  %10861 = vst [vmem:[#allocation90_spill] sm:$0xff] %v7084_v10  ;;  %v7104_v37 = vrot.slane %v2197_v51, %v6532_v0  ;;  %v2212_v3 = vcombine.low %v2147_v62, %v2163_v53  ;;  %v2213_v29 = vcombine.high %v2147_v62, %v2163_v53 }
 0x1e3   : > { %v7090_v40 = vrot.slane %v10862_v6, %v6532_v0  ;;  %10863 = vst [vmem:[#allocation91_spill] sm:$0xff] %v7094_v16  ;;  %10864 = vst [vmem:[#allocation92_spill] sm:$0xff] %v7098_v45  ;;  %v10865_v43 = vcombine.high %v6612_v32, %v6849_v23  ;;  %v7113_v13 = vrot.slane %v2180_v47, %v6532_v0  ;;  %v7132_v23 = vpop.permute.xlu0 %614 }
 0x1e4   : > { %v7116_v8 = vrot.slane %v2181_v34, %v6532_v0  ;;  %v7119_v31 = vrot.slane %v2212_v3, %v6532_v0  ;;  %v7122_v51 = vrot.slane %v2213_v29, %v6532_v0  ;;  %10868 = vst [vmem:[#allocation95_spill] sm:$0xff] %v7132_v23  ;;  %v7156_v23 = vcombine.low %v6634_v1, %v6774_v33  ;;  %v10880_v33 = vld [vmem:[#allocation45_spill] sm:$0xff] }
 0x1e5   : > { %v7110_v52 = vrot.slane %v10865_v43, %v6532_v0  ;;  %v7126_v53 = vcombine.high %v7090_v40, %v7101_v41  ;;  %v7152_v43 = vcombine.low %v6622_v55, %v6771_v49  ;;  %v7176_v49 = vcombine.low %v6656_v5, %v6821_v48  ;;  %v10885_v48 = vld [vmem:[#allocation27_spill] sm:$0xff] }
 0x1e6   : > { %v7136_v47 = vcombine.high %v7113_v13, %v7119_v31  ;;  %v7140_v34 = vcombine.high %v7116_v8, %v7122_v51  ;;  %10874 = vst [vmem:[#allocation101_spill] sm:$0xff] %v7156_v23 }
 0x1e7   : > { %10866 = vst [vmem:[#allocation93_spill] sm:$0xff] %v7126_v53  ;;  %v7130_v32 = vcombine.high %v7110_v52, %v7104_v37  ;;  %v7142_v62 = vpop.permute.xlu0 %618  ;;  %10879 = vst [vmem:[#allocation103_spill] sm:$0xff] %v7176_v49 }
 0x1e8   : > { %10869 = vst [vmem:[#allocation96_spill] sm:$0xff] %v7136_v47  ;;  %10870 = vst [vmem:[#allocation97_spill] sm:$0xff] %v7140_v34  ;;  %v7168_v47 = vcombine.low %v6653_v58, %v6780_v12  ;;  %v7188_v12 = vcombine.low %v6671_v27, %v6827_v24  ;;  %v7206_v27 = vcombine.low %v6682_v28, %v6872_v15 }
 0x1e9   : > { %10867 = vst [vmem:[#allocation94_spill] sm:$0xff] %v7130_v32  ;;  %10871 = vst [vmem:[#allocation98_spill] sm:$0xff] %v7142_v62 }
 0x1ea   : > { %10878 = vst [vmem:[#allocation102_spill] sm:$0xff] %v7168_v47  ;;  %10882 = vst [vmem:[#allocation104_spill] sm:$0xff] %v7188_v12 }
 0x1eb   : > { %v7144_v6 = vpop.permute.xlu0 %622  ;;  %10887 = vst [vmem:[#allocation106_spill] sm:$0xff] %v7206_v27 }
 0x1ec   : > { %10872 = vst [vmem:[#allocation99_spill] sm:$0xff] %v7144_v6  ;;  %v10876_v6 = vld [vmem:[#allocation43_spill] sm:$0xff] }
 0x1ef   : > { %v7146_v3 = vpop.permute.xlu0 %2350 }
 0x1f0   : > { %10873 = vst [vmem:[#allocation100_spill] sm:$0xff] %v7146_v3  ;;  %v7164_v3 = vcombine.low %v10876_v6, %v6777_v57  ;;  %v7180_v57 = vcombine.low %v10880_v33, %v6824_v30  ;;  %v7214_v33 = vcombine.low %v6695_v2, %v6875_v4 }
 0x1f2   : > { %10877 = vst [vmem:[#allocation43_spill] sm:$0xff] %v7164_v3  ;;  %10881 = vst [vmem:[#allocation45_spill] sm:$0xff] %v7180_v57 }
 0x1f3   : > { %v7148_v29 = vpop.permute.xlu0 %2460  ;;  %10888 = vst [vmem:[#allocation107_spill] sm:$0xff] %v7214_v33 }
 0x1f4   : > { %v2465_v0 = vrot.slane %v7148_v29, %v10875_v54  ;;  %v2469_v30 = vrot.slane %v7148_v29, %v10885_v48 }
 0x1f6   : > { %v2479_v38 = vmul.f32 %v2465_v0, %v7156_v23  ;;  %v2478_v62 = vmul.f32 %v2465_v0, %v7152_v43  ;;  %v2481_v55 = vmul.f32 %v2465_v0, %v7168_v47  ;;  %v2480_v1 = vmul.f32 %v2465_v0, %v7164_v3 }
 0x1f7   : > { %v2482_v58 = vmul.f32 %v2465_v0, %v7176_v49  ;;  %v2487_v24 = vmul.f32 %v2469_v30, %v7206_v27  ;;  %v2488_v28 = vmul.f32 %v2469_v30, %v7214_v33 }
 0x1f8   : > { %2544 = vrot.lane.b32.xlu0 %v2479_v38, %s6050_s28  ;;  %2542 = vrot.lane.b32.xlu1 %v2478_v62, %s6050_s28  ;;  %v2483_v38 = vmul.f32 %v2465_v0, %v7180_v57  ;;  %v10883_v62 = vld [vmem:[#allocation46_spill] sm:$0xff] }
 0x1f9   : > { %v7192_v5 = vcombine.low %v10883_v62, %v6830_v26  ;;  %v10895_v62 = vld [vmem:[#allocation51_spill] sm:$0xff] }
 0x1fb   : > { %10884 = vst [vmem:[#allocation46_spill] sm:$0xff] %v7192_v5  ;;  %v2485_v6 = vmul.f32 %v2465_v0, %v7192_v5 }
 0x1fc   : > { %2548 = vrot.lane.b32.xlu0 %v2481_v55, %s6050_s28  ;;  %2546 = vrot.lane.b32.xlu1 %v2480_v1, %s6050_s28  ;;  %v2484_v55 = vmul.f32 %v2465_v0, %v7188_v12  ;;  %v7202_v1 = vcombine.low %v6679_v20, %v6869_v44  ;;  %v10889_v0 = vld [vmem:[#allocation48_spill] sm:$0xff]  ;;  %v10891_v44 = vld [vmem:[#allocation49_spill] sm:$0xff] }
 0x1fd   : > { %v7218_v20 = vcombine.low %v10889_v0, %v6880_v17 }
 0x1fe   : > { %10886 = vst [vmem:[#allocation105_spill] sm:$0xff] %v7202_v1  ;;  %v2486_v26 = vmul.f32 %v2469_v30, %v7202_v1 }
 0x1ff   : > { %10890 = vst [vmem:[#allocation48_spill] sm:$0xff] %v7218_v20  ;;  %v2489_v15 = vmul.f32 %v2469_v30, %v7218_v20 }
 0x200   : > { %2552 = vrot.lane.b32.xlu0 %v2483_v38, %s6050_s28  ;;  %2550 = vrot.lane.b32.xlu1 %v2482_v58, %s6050_s28  ;;  %v7226_v38 = vcombine.low %v10891_v44, %v6907_v9  ;;  %v10893_v58 = vld [vmem:[#allocation50_spill] sm:$0xff]  ;;  %v7242_v9 = vcombine.low %v6720_v25, %v6927_v56  ;;  %v10901_v25 = vld [vmem:[#allocation52_spill] sm:$0xff] }
 0x201   : > { %v7230_v2 = vcombine.low %v10893_v58, %v6910_v18  ;;  %v7259_v56 = vcombine.low %v10901_v25, %v6962_v11  ;;  %v10903_v44 = vld [vmem:[#allocation80_spill] sm:$0xff]  ;;  %v10904_v58 = vld [vmem:[#allocation54_spill] sm:$0xff]  ;;  %v10912_v25 = vld [vmem:[#allocation87_spill] sm:$0xff] }
 0x202   : > { %10892 = vst [vmem:[#allocation49_spill] sm:$0xff] %v7226_v38  ;;  %v2490_v17 = vmul.f32 %v2469_v30, %v7226_v38  ;;  %10897 = vst [vmem:[#allocation108_spill] sm:$0xff] %v7242_v9 }
 0x203   : > { %10894 = vst [vmem:[#allocation50_spill] sm:$0xff] %v7230_v2  ;;  %v2491_v4 = vmul.f32 %v2469_v30, %v7230_v2  ;;  %10902 = vst [vmem:[#allocation52_spill] sm:$0xff] %v7259_v56 }
 0x204   : > { %2556 = vrot.lane.b32.xlu0 %v2485_v6, %s6050_s28  ;;  %2554 = vrot.lane.b32.xlu1 %v2484_v55, %s6050_s28  ;;  %v7238_v6 = vcombine.low %v10895_v62, %v6913_v50  ;;  %v10898_v55 = vld [vmem:[#allocation23_spill] sm:$0xff]  ;;  %v7255_v50 = vcombine.low %v6723_v35, %v6957_v14  ;;  %v10909_v62 = vld [vmem:[#allocation84_spill] sm:$0xff] }
 0x206   : > { %10896 = vst [vmem:[#allocation51_spill] sm:$0xff] %v7238_v6  ;;  %v2492_v0 = vmul.f32 %v2469_v30, %v7238_v6  ;;  %10900 = vst [vmem:[#allocation110_spill] sm:$0xff] %v7255_v50 }
 0x208   : > { %2560 = vrot.lane.b32.xlu0 %v2487_v24, %s6050_s28  ;;  %2558 = vrot.lane.b32.xlu1 %v2486_v26, %s6050_s28  ;;  %v7245_v24 = vsub.s32 2, %v10898_v55  ;;  %v2493_v26 = vmul.f32 %v2469_v30, %v7242_v9  ;;  %v10906_v30 = vld [vmem:[#allocation81_spill] sm:$0xff] }
 0x20a   : > { %10899 = vst [vmem:[#allocation109_spill] sm:$0xff] %v7245_v24  ;;  %v2473_v18 = vrot.slane %v7148_v29, %v7245_v24 }
 0x20c   : > { %2564 = vrot.lane.b32.xlu0 %v2489_v15, %s6050_s28  ;;  %2562 = vrot.lane.b32.xlu1 %v2488_v28, %s6050_s28  ;;  %v2495_v15 = vmul.f32 %v2473_v18, %v7259_v56  ;;  %v2494_v28 = vmul.f32 %v2473_v18, %v7255_v50  ;;  %v10913_v50 = vld [vmem:[#allocation57_spill] sm:$0xff] }
 0x210   : > { %2568 = vrot.lane.b32.xlu0 %v2491_v4, %s6050_s28  ;;  %2566 = vrot.lane.b32.xlu1 %v2490_v17, %s6050_s28  ;;  %v7267_v4 = vcombine.low %v10904_v58, %v10903_v44  ;;  %v10907_v17 = vld [vmem:[#allocation55_spill] sm:$0xff]  ;;  %v7283_v44 = vcombine.low %v10913_v50, %v10912_v25  ;;  %v7291_v58 = vcombine.low %v10854_v61, %v7015_v63 }
 0x211   : > { %v7271_v14 = vcombine.low %v10907_v17, %v10906_v30  ;;  %v10916_v30 = vld [vmem:[#allocation59_spill] sm:$0xff]  ;;  %v7308_v61 = vcombine.low %v7000_v42, %v7061_v59  ;;  %v7312_v63 = vcombine.low %v7035_v46, %v7064_v36  ;;  %v7324_v42 = vcombine.low %v7058_v7, %v7070_v39 }
 0x212   : > { %10905 = vst [vmem:[#allocation80_spill] sm:$0xff] %v7267_v4  ;;  %v2496_v11 = vmul.f32 %v2473_v18, %v7267_v4  ;;  %10914 = vst [vmem:[#allocation55_spill] sm:$0xff] %v7283_v44  ;;  %v7295_v17 = vcombine.low %v10916_v30, %v7018_v21  ;;  %v7332_v36 = vcombine.low %v7090_v40, %v7101_v41 }
 0x213   : > { %10908 = vst [vmem:[#allocation54_spill] sm:$0xff] %v7271_v14  ;;  %v2497_v35 = vmul.f32 %v2473_v18, %v7271_v14  ;;  %10915 = vst [vmem:[#allocation84_spill] sm:$0xff] %v7291_v58  ;;  %v7344_v39 = vcombine.low %v7113_v13, %v7119_v31  ;;  %v7348_v40 = vcombine.low %v7116_v8, %v7122_v51  ;;  %v10503_v8 = vsub.s32 4, %v10898_v55 }
 0x214   : > { %2572 = vrot.lane.b32.xlu0 %v2493_v26, %s6050_s28  ;;  %2570 = vrot.lane.b32.xlu1 %v2492_v0, %s6050_s28  ;;  %v10910_v26 = vld [vmem:[#allocation56_spill] sm:$0xff]  ;;  %10919 = vst [vmem:[#allocation57_spill] sm:$0xff] %v7308_v61  ;;  %10920 = vst [vmem:[#allocation59_spill] sm:$0xff] %v7312_v63 }
 0x215   : > { %v7279_v0 = vcombine.low %v10910_v26, %v10909_v62  ;;  %10917 = vst [vmem:[#allocation56_spill] sm:$0xff] %v7295_v17  ;;  %v7298_v62 = vsub.s32 3, %v10898_v55  ;;  %v7320_v26 = vcombine.low %v7038_v19, %v7067_v22  ;;  %10922 = vst [vmem:[#allocation112_spill] sm:$0xff] %v7324_v42  ;;  %v7336_v19 = vcombine.low %v7110_v52, %v7104_v37  ;;  %v10927_v52 = vld [vmem:[#allocation26_spill] sm:$0xff] }
 0x216   : > { %10923 = vst [vmem:[#allocation113_spill] sm:$0xff] %v7332_v36  ;;  %10925 = vst [vmem:[#allocation115_spill] sm:$0xff] %v7344_v39  ;;  %v2673_v31 = vrot.slane %v10927_v52, %v7245_v24  ;;  %v3072_v51 = vrot.slane %v10927_v52, %v10503_v8 }
 0x217   : > { %10911 = vst [vmem:[#allocation81_spill] sm:$0xff] %v7279_v0  ;;  %10918 = vst [vmem:[#allocation87_spill] sm:$0xff] %v7298_v62  ;;  %v2477_v50 = vrot.slane %v7148_v29, %v7298_v62  ;;  %v2985_v13 = vrot.slane %v10927_v52, %v7298_v62 }
 0x218   : > { %2576 = vrot.lane.b32.xlu0 %v2495_v15, %s6050_s28  ;;  %2574 = vrot.lane.b32.xlu1 %v2494_v28, %s6050_s28  ;;  %v2499_v15 = vmul.f32 %v2473_v18, %v7283_v44  ;;  %v2498_v28 = vmul.f32 %v2473_v18, %v7279_v0  ;;  %10921 = vst [vmem:[#allocation111_spill] sm:$0xff] %v7320_v26  ;;  %10924 = vst [vmem:[#allocation114_spill] sm:$0xff] %v7336_v19 }
 0x219   : > { %v2503_v21 = vmul.f32 %v2477_v50, %v7312_v63  ;;  %v2502_v29 = vmul.f32 %v2477_v50, %v7308_v61  ;;  %v2505_v46 = vmul.f32 %v2477_v50, %v7324_v42  ;;  %v2504_v59 = vmul.f32 %v2477_v50, %v7320_v26  ;;  %10926 = vst [vmem:[#allocation116_spill] sm:$0xff] %v7348_v40  ;;  %v11018_v26 = vld [vmem:[#allocation15_spill] sm:$0xff]  ;;  %v11022_v61 = vld [vmem:[#allocation30_spill] sm:$0xff] }
 0x21a   : > { %v2507_v7 = vmul.f32 %v2477_v50, %v7336_v19  ;;  %v2506_v22 = vmul.f32 %v2477_v50, %v7332_v36  ;;  %v2509_v41 = vmul.f32 %v2477_v50, %v7348_v40  ;;  %v2508_v37 = vmul.f32 %v2477_v50, %v7344_v39  ;;  %v10959_v40 = vld [vmem:[#allocation73_spill] sm:$0xff]  ;;  %v11016_v19 = vld [vmem:[#allocation14_spill] sm:$0xff] }
 0x21c   : > { %2580 = vrot.lane.b32.xlu0 %v2497_v35, %s6050_s28  ;;  %2578 = vrot.lane.b32.xlu1 %v2496_v11, %s6050_s28  ;;  %v2501_v35 = vmul.f32 %v2473_v18, %v7295_v17  ;;  %v2500_v11 = vmul.f32 %v2473_v18, %v7291_v58  ;;  %v7364_v18 = vpop.permute.xlu1 %588  ;;  %v11031_v58 = vld [vmem:[#allocation40_spill] sm:$0xff] }
 0x220   : > { %2584 = vrot.lane.b32.xlu0 %v2499_v15, %s6050_s28  ;;  %2582 = vrot.lane.b32.xlu1 %v2498_v28, %s6050_s28  ;;  %v7366_v25 = vpop.permute.xlu1 %604 }
 0x224   : > { %2588 = vrot.lane.b32.xlu0 %v2501_v35, %s6050_s28  ;;  %2586 = vrot.lane.b32.xlu1 %v2500_v11, %s6050_s28  ;;  %v7368_v15 = vpop.permute.xlu1 %608 }
 0x228   : > { %2592 = vrot.lane.b32.xlu0 %v2503_v21, %s6050_s28  ;;  %2590 = vrot.lane.b32.xlu1 %v2502_v29, %s6050_s28  ;;  %v7370_v28 = vpop.permute.xlu1 %612 }
 0x229   : > { %10928 = vst [vmem:[#allocation26_spill] sm:$0xff] %v7370_v28 }
 0x22c   : > { %2596 = vrot.lane.b32.xlu0 %v2505_v46, %s6050_s28  ;;  %2594 = vrot.lane.b32.xlu1 %v2504_v59, %s6050_s28  ;;  %v7372_v30 = vpop.permute.xlu1 %616 }
 0x230   : > { %2600 = vrot.lane.b32.xlu0 %v2507_v7, %s6050_s28  ;;  %2598 = vrot.lane.b32.xlu1 %v2506_v22, %s6050_s28  ;;  %v7374_v50 = vpop.permute.xlu1 %620 }
 0x234   : > { %2604 = vrot.lane.b32.xlu0 %v2509_v41, %s6050_s28  ;;  %2602 = vrot.lane.b32.xlu1 %v2508_v37, %s6050_s28  ;;  %v7376_v35 = vpop.permute.xlu1 %624 }
 0x235   : > { %10929 = vst [vmem:[#allocation117_spill] sm:$0xff] %v7376_v35 }
 0x238   : > { %2987 = vbcast.lane.b32.xlu0 %v2985_v13, 256  ;;  %2675 = vbcast.lane.b32.xlu1 %v2673_v31, 256  ;;  %v7378_v11 = vpop.permute.xlu1 %2373 }
 0x23c   : > { %3074 = vbcast.lane.b32.xlu1 %v3072_v51, 256 }
 0x26a   : > { %v7380_v21 = vpop.permute.xlu1 %2542 }
 0x26b   : > { %10930 = vst [vmem:[#allocation118_spill] sm:$0xff] %v7380_v21 }
 0x26e   : > { %v7382_v29 = vpop.permute.xlu1 %2546 }
 0x26f   : > { %10931 = vst [vmem:[#allocation119_spill] sm:$0xff] %v7382_v29 }
 0x272   : > { %v7384_v46 = vpop.permute.xlu1 %2550 }
 0x273   : > { %10932 = vst [vmem:[#allocation120_spill] sm:$0xff] %v7384_v46 }
 0x276   : > { %v7386_v59 = vpop.permute.xlu1 %2554 }
 0x277   : > { %10933 = vst [vmem:[#allocation121_spill] sm:$0xff] %v7386_v59 }
 0x27a   : > { %v7388_v7 = vpop.permute.xlu1 %2558 }
 0x27b   : > { %10934 = vst [vmem:[#allocation122_spill] sm:$0xff] %v7388_v7 }
 0x27e   : > { %v7390_v22 = vpop.permute.xlu1 %2562 }
 0x27f   : > { %10935 = vst [vmem:[#allocation123_spill] sm:$0xff] %v7390_v22 }
 0x282   : > { %v7392_v41 = vpop.permute.xlu1 %2566 }
 0x283   : > { %10936 = vst [vmem:[#allocation124_spill] sm:$0xff] %v7392_v41 }
 0x286   : > { %v7394_v37 = vpop.permute.xlu1 %2570 }
 0x287   : > { %10937 = vst [vmem:[#allocation125_spill] sm:$0xff] %v7394_v37 }
 0x28a   : > { %v7396_v52 = vpop.permute.xlu1 %2574 }
 0x28b   : > { %10938 = vst [vmem:[#allocation126_spill] sm:$0xff] %v7396_v52  ;;  %v10947_v52 = vld [vmem:[#allocation62_spill] sm:$0xff] }
 0x28e   : > { %v7398_v13 = vpop.permute.xlu1 %2578 }
 0x28f   : > { %10939 = vst [vmem:[#allocation127_spill] sm:$0xff] %v7398_v13  ;;  %v10948_v13 = vld [vmem:[#allocation61_spill] sm:$0xff] }
 0x292   : > { %v7400_v31 = vpop.permute.xlu1 %2582 }
 0x293   : > { %10940 = vst [vmem:[#allocation128_spill] sm:$0xff] %v7400_v31 }
 0x296   : > { %v7402_v51 = vpop.permute.xlu1 %2586 }
 0x297   : > { %10941 = vst [vmem:[#allocation129_spill] sm:$0xff] %v7402_v51 }
 0x29a   : > { %v7404_v8 = vpop.permute.xlu1 %2590 }
 0x29b   : > { %10942 = vst [vmem:[#allocation130_spill] sm:$0xff] %v7404_v8  ;;  %v10949_v8 = vld [vmem:[#allocation64_spill] sm:$0xff] }
 0x29e   : > { %v7406_v46 = vpop.permute.xlu1 %2594 }
 0x29f   : > { %10943 = vst [vmem:[#allocation131_spill] sm:$0xff] %v7406_v46  ;;  %v10950_v46 = vld [vmem:[#allocation63_spill] sm:$0xff] }
 0x2a2   : > { %v7408_v59 = vpop.permute.xlu1 %2598 }
 0x2a3   : > { %10944 = vst [vmem:[#allocation132_spill] sm:$0xff] %v7408_v59 }
 0x2a6   : > { %v7410_v7 = vpop.permute.xlu1 %2602 }
 0x2a7   : > { %10945 = vst [vmem:[#allocation133_spill] sm:$0xff] %v7410_v7  ;;  %v10951_v7 = vld [vmem:[#allocation66_spill] sm:$0xff] }
 0x2aa   : > { %v7412_v22 = vpop.permute.xlu1 %2675 }
 0x2ab   : > { %10946 = vst [vmem:[#allocation134_spill] sm:$0xff] %v7412_v22  ;;  %v10952_v22 = vld [vmem:[#allocation65_spill] sm:$0xff] }
 0x2ae   : > { %v3075_v41 = vpop.permute.xlu1 %3074 }
 0x2af   : > { %v3079_v37 = vrot.slane %v3075_v41, %v10875_v54 }
 0x2b1   : > { %v3093_v29 = vmul.f32 %v3079_v37, %v10947_v52  ;;  %v3092_v21 = vmul.f32 %v3079_v37, %v10948_v13  ;;  %v3095_v51 = vmul.f32 %v3079_v37, %v10949_v8  ;;  %v3094_v31 = vmul.f32 %v3079_v37, %v10950_v46  ;;  %v10953_v13 = vld [vmem:[#allocation69_spill] sm:$0xff]  ;;  %v10954_v52 = vld [vmem:[#allocation68_spill] sm:$0xff]  ;;  %v10957_v46 = vld [vmem:[#allocation71_spill] sm:$0xff] }
 0x2b2   : > { %v3097_v59 = vmul.f32 %v3079_v37, %v10951_v7  ;;  %v3096_v39 = vmul.f32 %v3079_v37, %v10952_v22  ;;  %v3098_v8 = vmul.f32 %v3079_v37, %v10954_v52 }
 0x2b3   : > { %3158 = vrot.lane.b32.xlu1 %v3093_v29, %s6050_s28  ;;  %3156 = vrot.lane.b32.xlu0 %v3092_v21, %s6050_s28  ;;  %v3083_v29 = vrot.slane %v3075_v41, %v10885_v48  ;;  %v3099_v21 = vmul.f32 %v3079_v37, %v10953_v13 }
 0x2b5   : > { %v3100_v22 = vmul.f32 %v3083_v29, %v10957_v46  ;;  %v3102_v13 = vmul.f32 %v3083_v29, %v10959_v40  ;;  %v10965_v46 = vld [vmem:[#allocation77_spill] sm:$0xff] }
 0x2b6   : > { %v3106_v52 = vmul.f32 %v3083_v29, %v10965_v46  ;;  %v10975_v46 = vld [vmem:[#allocation37_spill] sm:$0xff] }
 0x2b7   : > { %3162 = vrot.lane.b32.xlu1 %v3095_v51, %s6050_s28  ;;  %3160 = vrot.lane.b32.xlu0 %v3094_v31, %s6050_s28  ;;  %v7432_v51 = vpop.permute.xlu0 %2544  ;;  %v10956_v31 = vld [vmem:[#allocation72_spill] sm:$0xff] }
 0x2b8   : > { %10955 = vst [vmem:[#allocation135_spill] sm:$0xff] %v7432_v51  ;;  %v3101_v7 = vmul.f32 %v3083_v29, %v10956_v31  ;;  %v11015_v51 = vld [vmem:[#allocation22_spill] sm:$0xff] }
 0x2bb   : > { %3166 = vrot.lane.b32.xlu1 %v3097_v59, %s6050_s28  ;;  %3164 = vrot.lane.b32.xlu0 %v3096_v39, %s6050_s28  ;;  %v10958_v39 = vld [vmem:[#allocation74_spill] sm:$0xff]  ;;  %v7440_v36 = vpop.permute.xlu0 %2548 }
 0x2bc   : > { %v3103_v59 = vmul.f32 %v3083_v29, %v10958_v39  ;;  %10960 = vst [vmem:[#allocation136_spill] sm:$0xff] %v7440_v36  ;;  %v10964_v39 = vld [vmem:[#allocation78_spill] sm:$0xff] }
 0x2bd   : > { %v3107_v40 = vmul.f32 %v3083_v29, %v10964_v39 }
 0x2bf   : > { %3170 = vrot.lane.b32.xlu1 %v3099_v21, %s6050_s28  ;;  %3168 = vrot.lane.b32.xlu0 %v3098_v8, %s6050_s28  ;;  %v10961_v8 = vld [vmem:[#allocation76_spill] sm:$0xff]  ;;  %v10962_v21 = vld [vmem:[#allocation75_spill] sm:$0xff] }
 0x2c0   : > { %v3105_v37 = vmul.f32 %v3083_v29, %v10961_v8  ;;  %v3104_v31 = vmul.f32 %v3083_v29, %v10962_v21  ;;  %v10967_v8 = vld [vmem:[#allocation82_spill] sm:$0xff] }
 0x2c3   : > { %3174 = vrot.lane.b32.xlu1 %v3101_v7, %s6050_s28  ;;  %3172 = vrot.lane.b32.xlu0 %v3100_v22, %s6050_s28  ;;  %v7448_v7 = vpop.permute.xlu0 %2552  ;;  %v3087_v22 = vrot.slane %v3075_v41, %v7245_v24 }
 0x2c4   : > { %10963 = vst [vmem:[#allocation137_spill] sm:$0xff] %v7448_v7  ;;  %v10970_v7 = vld [vmem:[#allocation85_spill] sm:$0xff] }
 0x2c5   : > { %v3108_v21 = vmul.f32 %v3087_v22, %v10967_v8  ;;  %v3110_v39 = vmul.f32 %v3087_v22, %v10970_v7  ;;  %v3114_v7 = vmul.f32 %v3087_v22, %v10975_v46 }
 0x2c7   : > { %3178 = vrot.lane.b32.xlu1 %v3103_v59, %s6050_s28  ;;  %3176 = vrot.lane.b32.xlu0 %v3102_v13, %s6050_s28  ;;  %v10966_v13 = vld [vmem:[#allocation83_spill] sm:$0xff]  ;;  %v7457_v36 = vpop.permute.xlu0 %2556 }
 0x2c8   : > { %v3109_v59 = vmul.f32 %v3087_v22, %v10966_v13  ;;  %10968 = vst [vmem:[#allocation138_spill] sm:$0xff] %v7457_v36  ;;  %v10973_v13 = vld [vmem:[#allocation47_spill] sm:$0xff] }
 0x2c9   : > { %v3112_v8 = vmul.f32 %v3087_v22, %v10973_v13 }
 0x2cb   : > { %3182 = vrot.lane.b32.xlu1 %v3105_v37, %s6050_s28  ;;  %3180 = vrot.lane.b32.xlu0 %v3104_v31, %s6050_s28  ;;  %v10969_v31 = vld [vmem:[#allocation86_spill] sm:$0xff] }
 0x2cc   : > { %v3111_v37 = vmul.f32 %v3087_v22, %v10969_v31 }
 0x2cf   : > { %3186 = vrot.lane.b32.xlu1 %v3107_v40, %s6050_s28  ;;  %3184 = vrot.lane.b32.xlu0 %v3106_v52, %s6050_s28  ;;  %v7465_v40 = vpop.permute.xlu0 %2560  ;;  %v10972_v52 = vld [vmem:[#allocation31_spill] sm:$0xff] }
 0x2d0   : > { %10971 = vst [vmem:[#allocation139_spill] sm:$0xff] %v7465_v40  ;;  %v3113_v29 = vmul.f32 %v3087_v22, %v10972_v52  ;;  %v10995_v52 = vld [vmem:[#allocation16_spill] sm:$0xff] }
 0x2d3   : > { %3190 = vrot.lane.b32.xlu1 %v3109_v59, %s6050_s28  ;;  %3188 = vrot.lane.b32.xlu0 %v3108_v21, %s6050_s28  ;;  %v3091_v21 = vrot.slane %v3075_v41, %v7298_v62  ;;  %v10974_v59 = vld [vmem:[#allocation58_spill] sm:$0xff]  ;;  %v7474_v36 = vpop.permute.xlu0 %2564 }
 0x2d4   : > { %v3115_v31 = vmul.f32 %v3087_v22, %v10974_v59  ;;  %10976 = vst [vmem:[#allocation140_spill] sm:$0xff] %v7474_v36 }
 0x2d5   : > { %v3119_v41 = vmul.f32 %v3091_v21, %v7098_v45  ;;  %v3118_v22 = vmul.f32 %v3091_v21, %v7094_v16  ;;  %v3123_v16 = vmul.f32 %v3091_v21, %v7140_v34  ;;  %v10979_v45 = vld [vmem:[#allocation96_spill] sm:$0xff] }
 0x2d7   : > { %3194 = vrot.lane.b32.xlu1 %v3111_v37, %s6050_s28  ;;  %3192 = vrot.lane.b32.xlu0 %v3110_v39, %s6050_s28  ;;  %v3117_v39 = vmul.f32 %v3091_v21, %v7084_v10  ;;  %v3116_v37 = vmul.f32 %v3091_v21, %v7080_v60  ;;  %v10531_v10 = vmov 0  }
 0x2d8   : > { %5931 = vset.pattern.permute.xlu1 %v10531_v10 }
 0x2db   : > { %3198 = vrot.lane.b32.xlu1 %v3113_v29, %s6050_s28  ;;  %3196 = vrot.lane.b32.xlu0 %v3112_v8, %s6050_s28  ;;  %v7482_v8 = vpop.permute.xlu0 %2568 }
 0x2dc   : > { %10977 = vst [vmem:[#allocation141_spill] sm:$0xff] %v7482_v8 }
 0x2df   : > { %3202 = vrot.lane.b32.xlu1 %v3115_v31, %s6050_s28  ;;  %3200 = vrot.lane.b32.xlu0 %v3114_v7, %s6050_s28  ;;  %v3121_v7 = vmul.f32 %v3091_v21, %v7130_v32  ;;  %v3120_v31 = vmul.f32 %v3091_v21, %v7126_v53  ;;  %v7490_v29 = vpop.permute.xlu0 %2572  ;;  %v10525_v53 = vsub.s32 7, %v10898_v55 }
 0x2e0   : > { %10978 = vst [vmem:[#allocation142_spill] sm:$0xff] %v7490_v29  ;;  %v11008_v29 = vld [vmem:[#allocation28_spill] sm:$0xff] }
 0x2e3   : > { %3206 = vrot.lane.b32.xlu1 %v3117_v39, %s6050_s28  ;;  %3204 = vrot.lane.b32.xlu0 %v3116_v37, %s6050_s28  ;;  %v10519_v39 = vsub.s32 6, %v10898_v55  ;;  %v10522_v37 = vsub.s32 5, %v10898_v55  ;;  %v7508_v32 = vpop.permute.xlu0 %2576  ;;  %v10996_v55 = vld [vmem:[#allocation8_spill] sm:$0xff] }
 0x2e4   : > { %10980 = vst [vmem:[#allocation143_spill] sm:$0xff] %v7508_v32 }
 0x2e7   : > { %3210 = vrot.lane.b32.xlu1 %v3119_v41, %s6050_s28  ;;  %3208 = vrot.lane.b32.xlu0 %v3118_v22, %s6050_s28  ;;  %v3122_v41 = vmul.f32 %v3091_v21, %v10979_v45  ;;  %v5941_v22 = vld [vmem:[%s10423_s1] sm:$0xff]  ;;  %v7512_v21 = vpop.permute.xlu0 %2580 }
 0x2e8   : > { %10981 = vst [vmem:[#allocation144_spill] sm:$0xff] %v7512_v21 }
 0x2eb   : > { %3214 = vrot.lane.b32.xlu1 %v3121_v7, %s6050_s28  ;;  %3212 = vrot.lane.b32.xlu0 %v3120_v31, %s6050_s28  ;;  %v3598_v7 = vrot.slane %v5941_v22, %v10519_v39  ;;  %v3287_v31 = vrot.slane %v5941_v22, %v10522_v37 }
 0x2ef   : > { %3218 = vrot.lane.b32.xlu1 %v3123_v16, %s6050_s28  ;;  %3216 = vrot.lane.b32.xlu0 %v3122_v41, %s6050_s28  ;;  %v3685_v16 = vrot.slane %v5941_v22, %v10525_v53  ;;  %v7514_v41 = vpop.permute.xlu0 %2584 }
 0x2f0   : > { %10982 = vst [vmem:[#allocation145_spill] sm:$0xff] %v7514_v41  ;;  %v11004_v41 = vld [vmem:[#allocation21_spill] sm:$0xff] }
 0x2f3   : > { %3600 = vbcast.lane.b32.xlu1 %v3598_v7, 256  ;;  %3289 = vbcast.lane.b32.xlu0 %v3287_v31, 256  ;;  %v7516_v45 = vpop.permute.xlu0 %2588 }
 0x2f4   : > { %10983 = vst [vmem:[#allocation146_spill] sm:$0xff] %v7516_v45  ;;  %v11003_v45 = vld [vmem:[#allocation12_spill] sm:$0xff] }
 0x2f7   : > { %3687 = vbcast.lane.b32.xlu0 %v3685_v16, 256  ;;  %v7518_v39 = vpop.permute.xlu0 %2592  ;;  %v10530_v16 = vmov 1  }
 0x2f8   : > { %10984 = vst [vmem:[#allocation147_spill] sm:$0xff] %v7518_v39  ;;  %5932 = vset.pattern.permute.xlu0 %v10530_v16  ;;  %v11002_v16 = vld [vmem:[#allocation20_spill] sm:$0xff] }
 0x2f9   : > { %v1012_v10 = vcombine.low %v11003_v45, %v11002_v16  ;;  %v1866_v45 = vcombine.low %v11016_v19, %v11015_v51  ;;  %v11017_v16 = vld [vmem:[#allocation24_spill] sm:$0xff]  ;;  %v11026_v19 = vld [vmem:[#allocation11_spill] sm:$0xff] }
 0x2fb   : > { %v7520_v34 = vpop.permute.xlu0 %2596 }
 0x2fc   : > { %10985 = vst [vmem:[#allocation148_spill] sm:$0xff] %v7520_v34 }
 0x2ff   : > { %v7522_v37 = vpop.permute.xlu0 %2600 }
 0x300   : > { %10986 = vst [vmem:[#allocation149_spill] sm:$0xff] %v7522_v37  ;;  %v10999_v37 = vld [vmem:[#allocation60_spill] sm:$0xff] }
 0x303   : > { %v7524_v60 = vpop.permute.xlu0 %2604 }
 0x304   : > { %10987 = vst [vmem:[#allocation150_spill] sm:$0xff] %v7524_v60  ;;  %v10998_v60 = vld [vmem:[#allocation9_spill] sm:$0xff] }
 0x307   : > { %v7526_v7 = vpop.permute.xlu0 %2987 }
 0x308   : > { %10988 = vst [vmem:[#allocation151_spill] sm:$0xff] %v7526_v7  ;;  %v1004_v7 = vcombine.low %v10996_v55, %v10995_v52  ;;  %v11009_v55 = vld [vmem:[#allocation67_spill] sm:$0xff]  ;;  %v11010_v52 = vld [vmem:[#allocation34_spill] sm:$0xff] }
 0x309   : > { %v1455_v36 = vcombine.low %v11010_v52, %v11009_v55 }
 0x325   : > { %v7528_v31 = vpop.permute.xlu0 %3156 }
 0x326   : > { %10989 = vst [vmem:[#allocation152_spill] sm:$0xff] %v7528_v31  ;;  %v10997_v31 = vld [vmem:[#allocation17_spill] sm:$0xff] }
 0x329   : > { %v7530_v22 = vpop.permute.xlu0 %3160 }
 0x32a   : > { %10990 = vst [vmem:[#allocation153_spill] sm:$0xff] %v7530_v22  ;;  %v1431_v22 = vcombine.low %v10998_v60, %v10997_v31  ;;  %v11011_v60 = vld [vmem:[#allocation70_spill] sm:$0xff]  ;;  %v11012_v31 = vld [vmem:[#allocation35_spill] sm:$0xff] }
 0x32b   : > { %v1882_v40 = vcombine.low %v11012_v31, %v11011_v60  ;;  %v11023_v60 = vld [vmem:[#allocation39_spill] sm:$0xff] }
 0x32c   : > { %v2309_v31 = vcombine.low %v11023_v60, %v7364_v18 }
 0x32d   : > { %v7532_v53 = vpop.permute.xlu0 %3164 }
 0x32e   : > { %10991 = vst [vmem:[#allocation154_spill] sm:$0xff] %v7532_v53  ;;  %v11000_v53 = vld [vmem:[#allocation33_spill] sm:$0xff] }
 0x32f   : > { %v1028_v34 = vcombine.low %v11000_v53, %v10999_v37  ;;  %v11013_v53 = vld [vmem:[#allocation18_spill] sm:$0xff] }
 0x330   : > { %v11014_v37 = vld [vmem:[#allocation10_spill] sm:$0xff] }
 0x331   : > { %v7536_v46 = vpop.permute.xlu0 %3168 }
 0x332   : > { %10992 = vst [vmem:[#allocation155_spill] sm:$0xff] %v7536_v46  ;;  %v11005_v46 = vld [vmem:[#allocation13_spill] sm:$0xff] }
 0x333   : > { %v1439_v21 = vcombine.low %v11005_v46, %v11004_v41  ;;  %v2293_v46 = vcombine.low %v11018_v26, %v11017_v16  ;;  %v11019_v41 = vld [vmem:[#allocation42_spill] sm:$0xff] }
 0x335   : > { %v7538_v59 = vpop.permute.xlu0 %3172 }
 0x336   : > { %10993 = vst [vmem:[#allocation156_spill] sm:$0xff] %v7538_v59  ;;  %v11006_v59 = vld [vmem:[#allocation38_spill] sm:$0xff] }
 0x337   : > { %v1011_v32 = vrot.slane %v1004_v7, %v11006_v59  ;;  %v11020_v7 = vld [vmem:[#allocation29_spill] sm:$0xff]  ;;  %v1035_v52 = vrot.slane %v1028_v34, %v11006_v59  ;;  %v1019_v26 = vrot.slane %v1012_v10, %v11006_v59  ;;  %v1446_v16 = vrot.slane %v1439_v21, %v11006_v59 }
 0x338   : > { %v1447_v42 = vcombine.low %v11020_v7, %v11019_v41  ;;  %v11028_v7 = vld [vmem:[#allocation32_spill] sm:$0xff]  ;;  %v1889_v34 = vrot.slane %v1882_v40, %v11006_v59  ;;  %v2300_v60 = vrot.slane %v2293_v46, %v11006_v59 }
 0x339   : > { %v7540_v13 = vpop.permute.xlu0 %3176 }
 0x33a   : > { %10994 = vst [vmem:[#allocation157_spill] sm:$0xff] %v7540_v13  ;;  %v11007_v13 = vld [vmem:[#allocation41_spill] sm:$0xff] }
 0x33b   : > { %v1020_v8 = vcombine.low %v11008_v29, %v11007_v13  ;;  %v1438_v13 = vrot.slane %v1431_v22, %v11006_v59  ;;  %v11021_v29 = vld [vmem:[#allocation44_spill] sm:$0xff]  ;;  %v11027_v22 = vld [vmem:[#allocation53_spill] sm:$0xff] }
 0x33c   : > { %v1874_v55 = vcombine.low %v11022_v61, %v11021_v29  ;;  %v2301_v63 = vcombine.low %v11028_v7, %v11027_v22  ;;  %v1462_v61 = vrot.slane %v1455_v36, %v11006_v59  ;;  %v1873_v29 = vrot.slane %v1866_v45, %v11006_v59  ;;  %v11029_v22 = vld [vmem:[#allocation79_spill] sm:$0xff] }
 0x33d   : > { %v7548_v39 = vpop.permute.xlu0 %3180  ;;  %v1027_v41 = vrot.slane %v1020_v8, %v11006_v59  ;;  %v2316_v8 = vrot.slane %v2309_v31, %v11006_v59  ;;  %v777_v45 = vrot.slane %v11029_v22, %v11006_v59 }
 0x33e   : > { %11001 = vst [vmem:[#allocation16_spill] sm:$0xff] %v7548_v39  ;;  %v1858_v39 = vcombine.low %v11014_v37, %v11013_v53  ;;  %v11025_v37 = vld [vmem:[#allocation19_spill] sm:$0xff]  ;;  %v1881_v10 = vrot.slane %v1874_v55, %v11006_v59 }
 0x33f   : > { %v2285_v51 = vcombine.low %v11026_v19, %v11025_v37  ;;  %v1454_v37 = vrot.slane %v1447_v42, %v11006_v59  ;;  %v1044_v21 = vcombine.low %v1027_v41, %v1035_v52  ;;  %v10574_v19 = vmov 0.0  }
 0x340   : > { %v1865_v18 = vrot.slane %v1858_v39, %v11006_v59  ;;  %v770_v7 = vcombine.high %v11029_v22, %v10574_v19  ;;  %v1036_v39 = vcombine.low %v1011_v32, %v1019_v26  ;;  %v2308_v42 = vrot.slane %v2301_v63, %v11006_v59 }
 0x341   : > { %v7575_v53 = vpop.permute.xlu0 %3184  ;;  %v2292_v40 = vrot.slane %v2285_v51, %v11006_v59  ;;  %v1471_v46 = vcombine.low %v1454_v37, %v1462_v61  ;;  %v1898_v55 = vcombine.low %v1881_v10, %v1889_v34  ;;  %v955_v52 = vcombine.high %v7366_v25, %v10574_v19 }
 0x342   : > { %11024 = vst [vmem:[#allocation8_spill] sm:$0xff] %v7575_v53  ;;  %v1463_v53 = vcombine.low %v1438_v13, %v1446_v16  ;;  %v1890_v31 = vcombine.low %v1865_v18, %v1873_v29  ;;  %v1051_v17 = vrot.slane %v1044_v21, %v11031_v58  ;;  %v2325_v0 = vcombine.low %v2308_v42, %v2316_v8 }
 0x343   : > { %v2317_v41 = vcombine.low %v2292_v40, %v2300_v60  ;;  %v1043_v32 = vrot.slane %v1036_v39, %v11031_v58  ;;  %v785_v13 = vcombine.high %v777_v45, %v10574_v19  ;;  %v962_v63 = vrot.slane %v7366_v25, %v11006_v59 }
 0x344   : > { %v1470_v26 = vrot.slane %v1463_v53, %v11031_v58  ;;  %v1478_v16 = vrot.slane %v1471_v46, %v11031_v58  ;;  %v1905_v61 = vrot.slane %v1898_v55, %v11031_v58  ;;  %v969_v34 = vrot.slane %v955_v52, %v11006_v59 }
 0x345   : > { %v7594_v36 = vpop.permute.xlu0 %3188  ;;  %v1897_v18 = vrot.slane %v1890_v31, %v11031_v58  ;;  %v2324_v29 = vrot.slane %v2317_v41, %v11031_v58  ;;  %v1197_v60 = vcombine.high %v7368_v15, %v10574_v19  ;;  %v1204_v37 = vrot.slane %v7368_v15, %v11006_v59 }
 0x346   : > { %11030 = vst [vmem:[#allocation17_spill] sm:$0xff] %v7594_v36  ;;  %v784_v36 = vrot.slane %v770_v7, %v11006_v59  ;;  %v7620_v10 = vcombine.low %v1043_v32, %v1051_v17  ;;  %v2332_v25 = vrot.slane %v2325_v0, %v11031_v58  ;;  %v7624_v53 = vrot.slane %v777_v45, %v11031_v58  ;;  %v11037_v17 = vld [vmem:[#allocation88_spill] sm:$0xff] }
 0x347   : > { %v7630_v22 = vrot.slane %v785_v13, %v11031_v58  ;;  %v970_v40 = vcombine.high %v962_v63, %v10574_v19  ;;  %v1382_v15 = vcombine.high %v11037_v17, %v10574_v19  ;;  %v7638_v39 = vcombine.low %v1470_v26, %v1478_v16 }
 0x348   : > { %11033 = vst [vmem:[#allocation60_spill] sm:$0xff] %v7620_v10  ;;  %v800_v21 = vcombine.high %v784_v36, %v10574_v19  ;;  %v7633_v7 = vrot.slane %v784_v36, %v11031_v58  ;;  %v7640_v0 = vcombine.low %v1897_v18, %v1905_v61  ;;  %v7643_v45 = vrot.slane %v962_v63, %v11031_v58 }
 0x349   : > { %v7604_v51 = vpop.permute.xlu0 %3192  ;;  %11035 = vst [vmem:[#allocation20_spill] sm:$0xff] %v7630_v22  ;;  %11038 = vst [vmem:[#allocation21_spill] sm:$0xff] %v7638_v39  ;;  %v985_v42 = vcombine.high %v969_v34, %v10574_v19  ;;  %v7647_v46 = vrot.slane %v969_v34, %v11031_v58  ;;  %v1211_v52 = vrot.slane %v1197_v60, %v11006_v59 }
 0x34a   : > { %11032 = vst [vmem:[#allocation9_spill] sm:$0xff] %v7604_v51  ;;  %11036 = vst [vmem:[#allocation12_spill] sm:$0xff] %v7633_v7  ;;  %v1212_v31 = vcombine.high %v1204_v37, %v10574_v19  ;;  %v7653_v41 = vcombine.low %v2324_v29, %v2332_v25  ;;  %v7656_v32 = vrot.slane %v800_v21, %v11031_v58  ;;  %v11053_v21 = vld [vmem:[#allocation95_spill] sm:$0xff] }
 0x34b   : > { %11039 = vst [vmem:[#allocation13_spill] sm:$0xff] %v7640_v0  ;;  %11040 = vst [vmem:[#allocation38_spill] sm:$0xff] %v7643_v45  ;;  %v7660_v13 = vcombine.high %v7624_v53, %v10574_v19  ;;  %v1389_v63 = vrot.slane %v11037_v17, %v11006_v59  ;;  %v7668_v16 = vcombine.high %v7630_v22, %v10574_v19 }
 0x34c   : > { %11041 = vst [vmem:[#allocation41_spill] sm:$0xff] %v7647_v46  ;;  %11043 = vst [vmem:[#allocation28_spill] sm:$0xff] %v7653_v41  ;;  %v7672_v61 = vcombine.high %v7633_v7, %v10574_v19  ;;  %v7675_v34 = vrot.slane %v970_v40, %v11031_v58  ;;  %v1396_v18 = vrot.slane %v1382_v15, %v11006_v59  ;;  %v11115_v7 = vld [vmem:[#allocation112_spill] sm:$0xff] }
 0x34d   : > { %v7627_v8 = vpop.permute.xlu0 %3196  ;;  %11044 = vst [vmem:[#allocation67_spill] sm:$0xff] %v7656_v32  ;;  %11045 = vst [vmem:[#allocation34_spill] sm:$0xff] %v7660_v13  ;;  %v7679_v29 = vrot.slane %v985_v42, %v11031_v58  ;;  %v7683_v60 = vcombine.high %v7643_v45, %v10574_v19  ;;  %v7686_v25 = vrot.slane %v1204_v37, %v11031_v58 }
 0x34e   : > { %11034 = vst [vmem:[#allocation33_spill] sm:$0xff] %v7627_v8  ;;  %11047 = vst [vmem:[#allocation35_spill] sm:$0xff] %v7668_v16  ;;  %v1624_v17 = vcombine.high %v11053_v21, %v10574_v19  ;;  %v7692_v55 = vcombine.high %v7647_v46, %v10574_v19  ;;  %v7695_v40 = vrot.slane %v1212_v31, %v11031_v58 }
 0x34f   : > { %11048 = vst [vmem:[#allocation18_spill] sm:$0xff] %v7672_v61  ;;  %11049 = vst [vmem:[#allocation10_spill] sm:$0xff] %v7675_v34  ;;  %v1227_v15 = vcombine.high %v1211_v52, %v10574_v19  ;;  %v1631_v42 = vrot.slane %v11053_v21, %v11006_v59  ;;  %v7701_v36 = vrot.slane %v1211_v52, %v11031_v58 }
 0x350   : > { %11050 = vst [vmem:[#allocation22_spill] sm:$0xff] %v7679_v29  ;;  %11051 = vst [vmem:[#allocation14_spill] sm:$0xff] %v7683_v60  ;;  %v1397_v37 = vcombine.high %v1389_v63, %v10574_v19  ;;  %v1809_v60 = vcombine.high %v7372_v30, %v10574_v19  ;;  %v1816_v61 = vrot.slane %v7372_v30, %v11006_v59 }
 0x351   : > { %v7664_v26 = vpop.permute.xlu0 %3200  ;;  %11052 = vst [vmem:[#allocation24_spill] sm:$0xff] %v7686_v25  ;;  %11054 = vst [vmem:[#allocation15_spill] sm:$0xff] %v7692_v55  ;;  %v7712_v31 = vcombine.high %v7675_v34, %v10574_v19  ;;  %v2051_v21 = vcombine.high %v7374_v50, %v10574_v19  ;;  %v7721_v8 = vcombine.high %v7686_v25, %v10574_v19 }
 0x352   : > { %11046 = vst [vmem:[#allocation70_spill] sm:$0xff] %v7664_v26  ;;  %11055 = vst [vmem:[#allocation42_spill] sm:$0xff] %v7695_v40  ;;  %v1412_v26 = vcombine.high %v1396_v18, %v10574_v19  ;;  %v7724_v30 = vrot.slane %v1389_v63, %v11031_v58  ;;  %v7731_v51 = vrot.slane %v1227_v15, %v11031_v58 }
 0x353   : > { %11056 = vst [vmem:[#allocation29_spill] sm:$0xff] %v7701_v36  ;;  %11058 = vst [vmem:[#allocation30_spill] sm:$0xff] %v7712_v31  ;;  %v1638_v31 = vrot.slane %v1624_v17, %v11006_v59  ;;  %v7735_v52 = vcombine.high %v7695_v40, %v10574_v19  ;;  %v1639_v28 = vcombine.high %v1631_v42, %v10574_v19 }
 0x354   : > { %11059 = vst [vmem:[#allocation39_spill] sm:$0xff] %v7721_v8  ;;  %11060 = vst [vmem:[#allocation19_spill] sm:$0xff] %v7724_v30  ;;  %v2058_v8 = vrot.slane %v7374_v50, %v11006_v59  ;;  %v7742_v63 = vcombine.high %v7701_v36, %v10574_v19  ;;  %v1823_v17 = vrot.slane %v1809_v60, %v11006_v59  ;;  %v11068_v50 = vld [vmem:[#allocation99_spill] sm:$0xff] }
 0x355   : > { %v7708_v55 = vpop.permute.xlu0 %3204  ;;  %11062 = vst [vmem:[#allocation53_spill] sm:$0xff] %v7731_v51  ;;  %11063 = vst [vmem:[#allocation32_spill] sm:$0xff] %v7735_v52  ;;  %v1824_v15 = vcombine.high %v1816_v61, %v10574_v19  ;;  %v7752_v52 = vrot.slane %v1412_v26, %v11031_v58  ;;  %v2065_v16 = vrot.slane %v2051_v21, %v11006_v59 }
 0x356   : > { %11057 = vst [vmem:[#allocation44_spill] sm:$0xff] %v7708_v55  ;;  %v7727_v55 = vrot.slane %v1396_v18, %v11031_v58  ;;  %11064 = vst [vmem:[#allocation79_spill] sm:$0xff] %v7742_v63  ;;  %v7745_v18 = vrot.slane %v1397_v37, %v11031_v58  ;;  %v2236_v41 = vcombine.high %v11068_v50, %v10574_v19 }
 0x357   : > { %11067 = vst [vmem:[#allocation158_spill] sm:$0xff] %v7752_v52  ;;  %v2243_v63 = vrot.slane %v11068_v50, %v11006_v59  ;;  %v7761_v37 = vcombine.high %v7724_v30, %v10574_v19  ;;  %v1654_v26 = vcombine.high %v1638_v31, %v10574_v19  ;;  %v7772_v21 = vrot.slane %v1639_v28, %v11031_v58 }
 0x358   : > { %11061 = vst [vmem:[#allocation11_spill] sm:$0xff] %v7727_v55  ;;  %11065 = vst [vmem:[#allocation88_spill] sm:$0xff] %v7745_v18  ;;  %v7765_v60 = vcombine.high %v7727_v55, %v10574_v19  ;;  %v7775_v0 = vrot.slane %v1638_v31, %v11031_v58  ;;  %v7778_v50 = vrot.slane %v1816_v61, %v11031_v58 }
 0x359   : > { %v7749_v13 = vpop.permute.xlu0 %3208  ;;  %11069 = vst [vmem:[#allocation99_spill] sm:$0xff] %v7761_v37  ;;  %11072 = vst [vmem:[#allocation161_spill] sm:$0xff] %v7772_v21  ;;  %v2066_v37 = vcombine.high %v2058_v8, %v10574_v19  ;;  %v7783_v55 = vcombine.high %v7745_v18, %v10574_v19  ;;  %v7790_v28 = vrot.slane %v1823_v17, %v11031_v58 }
 0x35a   : > { %11066 = vst [vmem:[#allocation95_spill] sm:$0xff] %v7749_v13  ;;  %11070 = vst [vmem:[#allocation159_spill] sm:$0xff] %v7765_v60  ;;  %v7768_v13 = vrot.slane %v1631_v42, %v11031_v58  ;;  %v7786_v42 = vrot.slane %v1824_v15, %v11031_v58  ;;  %v1839_v60 = vcombine.high %v1823_v17, %v10574_v19 }
 0x35b   : > { %11073 = vst [vmem:[#allocation162_spill] sm:$0xff] %v7775_v0  ;;  %11074 = vst [vmem:[#allocation163_spill] sm:$0xff] %v7778_v50  ;;  %v2081_v36 = vcombine.high %v2065_v16, %v10574_v19  ;;  %v2250_v25 = vrot.slane %v2236_v41, %v11006_v59  ;;  %v2251_v18 = vcombine.high %v2243_v63, %v10574_v19 }
 0x35c   : > { %11071 = vst [vmem:[#allocation160_spill] sm:$0xff] %v7768_v13  ;;  %11075 = vst [vmem:[#allocation164_spill] sm:$0xff] %v7783_v55  ;;  %v7800_v55 = vrot.slane %v1654_v26, %v11031_v58  ;;  %v7804_v15 = vcombine.high %v7768_v13, %v10574_v19  ;;  %v7807_v17 = vrot.slane %v2058_v8, %v11031_v58 }
 0x35d   : > { %11076 = vst [vmem:[#allocation165_spill] sm:$0xff] %v7786_v42  ;;  %11077 = vst [vmem:[#allocation166_spill] sm:$0xff] %v7790_v28  ;;  %v7792_v30 = vpop.permute.xlu0 %3212  ;;  %v7814_v61 = vcombine.high %v7772_v21, %v10574_v19  ;;  %v7818_v59 = vcombine.high %v7775_v0, %v10574_v19  ;;  %v7822_v41 = vcombine.high %v7778_v50, %v10574_v19  ;;  %v11109_v21 = vld [vmem:[#allocation110_spill] sm:$0xff] }
 0x35e   : > { %11078 = vst [vmem:[#allocation167_spill] sm:$0xff] %v7792_v30  ;;  %11080 = vst [vmem:[#allocation168_spill] sm:$0xff] %v7800_v55  ;;  %v7810_v30 = vrot.slane %v2065_v16, %v11031_v58  ;;  %v7825_v26 = vrot.slane %v2066_v37, %v11031_v58  ;;  %v7828_v8 = vrot.slane %v1839_v60, %v11031_v58 }
 0x35f   : > { %11081 = vst [vmem:[#allocation169_spill] sm:$0xff] %v7804_v15  ;;  %11082 = vst [vmem:[#allocation170_spill] sm:$0xff] %v7807_v17  ;;  %v7832_v16 = vcombine.high %v7786_v42, %v10574_v19  ;;  %v7836_v31 = vcombine.high %v7790_v28, %v10574_v19  ;;  %v7847_v37 = vrot.slane %v2251_v18, %v11031_v58 }
 0x360   : > { %11083 = vst [vmem:[#allocation171_spill] sm:$0xff] %v7810_v30  ;;  %11084 = vst [vmem:[#allocation172_spill] sm:$0xff] %v7814_v61  ;;  %v2266_v60 = vcombine.high %v2250_v25, %v10574_v19  ;;  %v7851_v61 = vrot.slane %v2250_v25, %v11031_v58  ;;  %v2378_v18 = vrot.slane %v7378_v11, %v10875_v54  ;;  %v11099_v25 = vld [vmem:[#allocation100_spill] sm:$0xff] }
 0x361   : > { %11085 = vst [vmem:[#allocation173_spill] sm:$0xff] %v7818_v59  ;;  %11086 = vst [vmem:[#allocation174_spill] sm:$0xff] %v7822_v41  ;;  %v7839_v59 = vrot.slane %v2243_v63, %v11031_v58  ;;  %v7841_v15 = vpop.permute.xlu0 %3216  ;;  %v7844_v41 = vrot.slane %v2081_v36, %v11031_v58  ;;  %v7859_v63 = vcombine.high %v7810_v30, %v10574_v19 }
 0x362   : > { %11087 = vst [vmem:[#allocation175_spill] sm:$0xff] %v7825_v26  ;;  %11088 = vst [vmem:[#allocation176_spill] sm:$0xff] %v7828_v8  ;;  %v7887_v35 = vrot.slane %v11099_v25, %v7298_v62 }
 0x363   : > { %11089 = vst [vmem:[#allocation177_spill] sm:$0xff] %v7832_v16  ;;  %11090 = vst [vmem:[#allocation178_spill] sm:$0xff] %v7836_v31  ;;  %v7855_v16 = vcombine.high %v7807_v17, %v10574_v19  ;;  %v7867_v31 = vcombine.high %v7825_v26, %v10574_v19  ;;  %v7883_v36 = vcombine.high %v7839_v59, %v10574_v19 }
 0x364   : > { %11091 = vst [vmem:[#allocation179_spill] sm:$0xff] %v7839_v59  ;;  %11092 = vst [vmem:[#allocation180_spill] sm:$0xff] %v7841_v15  ;;  %v7871_v15 = vrot.slane %v11099_v25, %v10875_v54  ;;  %v2391_v59 = vmul.f32 %v2378_v18, %v7152_v43 }
 0x365   : > { %11093 = vst [vmem:[#allocation181_spill] sm:$0xff] %v7844_v41  ;;  %11094 = vst [vmem:[#allocation182_spill] sm:$0xff] %v7847_v37  ;;  %v7893_v30 = vpop.permute.xlu0 %3289 }
 0x366   : > { %11095 = vst [vmem:[#allocation183_spill] sm:$0xff] %v7851_v61  ;;  %11096 = vst [vmem:[#allocation184_spill] sm:$0xff] %v7855_v16  ;;  %v7875_v16 = vrot.slane %v11099_v25, %v10885_v48 }
 0x367   : > { %11097 = vst [vmem:[#allocation185_spill] sm:$0xff] %v7859_v63  ;;  %11098 = vst [vmem:[#allocation186_spill] sm:$0xff] %v7867_v31  ;;  %v7879_v63 = vrot.slane %v11099_v25, %v7245_v24  ;;  %v2382_v31 = vrot.slane %v7378_v11, %v10885_v48  ;;  %v2390_v25 = vrot.slane %v7378_v11, %v7298_v62 }
 0x368   : > { %11100 = vst [vmem:[#allocation100_spill] sm:$0xff] %v7871_v15  ;;  %11101 = vst [vmem:[#allocation187_spill] sm:$0xff] %v7875_v16  ;;  %v2386_v15 = vrot.slane %v7378_v11, %v7245_v24  ;;  %v7896_v16 = vrot.slane %v2266_v60, %v11031_v58  ;;  %v2393_v60 = vmul.f32 %v2378_v18, %v7164_v3  ;;  %v11111_v24 = vld [vmem:[#allocation56_spill] sm:$0xff] }
 0x369   : > { %11102 = vst [vmem:[#allocation188_spill] sm:$0xff] %v7879_v63  ;;  %11103 = vst [vmem:[#allocation189_spill] sm:$0xff] %v7883_v36  ;;  %v7900_v63 = vcombine.high %v7847_v37, %v10574_v19  ;;  %v7904_v36 = vcombine.high %v7851_v61, %v10574_v19  ;;  %v2396_v58 = vmul.f32 %v2378_v18, %v7180_v57  ;;  %v7920_v26 = vpop.permute.xlu0 %3687 }
 0x36a   : > { %11104 = vst [vmem:[#allocation190_spill] sm:$0xff] %v7887_v35  ;;  %11105 = vst [vmem:[#allocation191_spill] sm:$0xff] %v7893_v30  ;;  %v2392_v35 = vmul.f32 %v2378_v18, %v7156_v23  ;;  %v2394_v30 = vmul.f32 %v2378_v18, %v7168_v47  ;;  %v2395_v37 = vmul.f32 %v2378_v18, %v7176_v49 }
 0x36b   : > { %11106 = vst [vmem:[#allocation192_spill] sm:$0xff] %v7896_v16  ;;  %11107 = vst [vmem:[#allocation193_spill] sm:$0xff] %v7900_v63  ;;  %v2398_v63 = vmul.f32 %v2378_v18, %v7192_v5  ;;  %v2397_v19 = vmul.f32 %v2378_v18, %v7188_v12  ;;  %v2399_v11 = vmul.f32 %v2382_v31, %v7202_v1 }
 0x36c   : > { %11108 = vst [vmem:[#allocation194_spill] sm:$0xff] %v7904_v36  ;;  %v2400_v36 = vmul.f32 %v2382_v31, %v7206_v27  ;;  %v2402_v61 = vmul.f32 %v2382_v31, %v7218_v20  ;;  %v2401_v17 = vmul.f32 %v2382_v31, %v7214_v33  ;;  %v2404_v28 = vmul.f32 %v2382_v31, %v7230_v2  ;;  %v11112_v20 = vld [vmem:[#allocation84_spill] sm:$0xff]  ;;  %v11116_v27 = vld [vmem:[#allocation111_spill] sm:$0xff] }
 0x36d   : > { %v2403_v50 = vmul.f32 %v2382_v31, %v7226_v38  ;;  %v2406_v42 = vmul.f32 %v2382_v31, %v7242_v9  ;;  %v3692_v0 = vrot.slane %v7920_v26, %v10875_v54  ;;  %v2405_v18 = vmul.f32 %v2382_v31, %v7238_v6  ;;  %v11110_v9 = vld [vmem:[#allocation81_spill] sm:$0xff]  ;;  %v11113_v6 = vld [vmem:[#allocation59_spill] sm:$0xff] }
 0x36e   : > { %v2408_v13 = vmul.f32 %v2386_v15, %v7259_v56  ;;  %v2407_v1 = vmul.f32 %v2386_v15, %v11109_v21  ;;  %v2410_v40 = vmul.f32 %v2386_v15, %v7271_v14  ;;  %v2409_v46 = vmul.f32 %v2386_v15, %v7267_v4  ;;  %v11114_v38 = vld [vmem:[#allocation57_spill] sm:$0xff] }
 0x36f   : > { %v2412_v39 = vmul.f32 %v2386_v15, %v7283_v44  ;;  %v3706_v45 = vmul.f32 %v3692_v0, %v7164_v3  ;;  %v3705_v2 = vmul.f32 %v3692_v0, %v7156_v23  ;;  %v2411_v62 = vmul.f32 %v2386_v15, %v11110_v9  ;;  %v11117_v44 = vld [vmem:[#allocation114_spill] sm:$0xff]  ;;  %v11118_v9 = vld [vmem:[#allocation113_spill] sm:$0xff] }
 0x370   : > { %v2414_v34 = vmul.f32 %v2386_v15, %v11111_v24  ;;  %v2413_v31 = vmul.f32 %v2386_v15, %v11112_v20  ;;  %v2416_v56 = vmul.f32 %v2390_v25, %v11113_v6  ;;  %v2415_v21 = vmul.f32 %v2390_v25, %v11114_v38  ;;  %v11119_v24 = vld [vmem:[#allocation116_spill] sm:$0xff]  ;;  %v11120_v6 = vld [vmem:[#allocation115_spill] sm:$0xff] }
 0x371   : > { %v2418_v14 = vmul.f32 %v2390_v25, %v11115_v7  ;;  %v7942_v4 = vmul.f32 %v2390_v25, %v11116_v27  ;;  %3771 = vrot.lane.b32.xlu0 %v3706_v45, %s6050_s28  ;;  %3769 = vrot.lane.b32.xlu1 %v3705_v2, %s6050_s28  ;;  %v2420_v3 = vmul.f32 %v2390_v25, %v11117_v44  ;;  %v11121_v27 = vmov 0.0  }
 0x372   : > { %v7948_v33 = vmul.f32 %v2390_v25, %v11118_v9  ;;  %v7951_v15 = vmul.f32 %v2390_v25, %v11119_v24  ;;  %v7954_v20 = vmul.f32 %v2390_v25, %v11120_v6  ;;  %v3708_v38 = vmul.f32 %v3692_v0, %v7176_v49 }
 0x373   : > { %v3707_v7 = vmul.f32 %v3692_v0, %v7168_v47  ;;  %v7960_v45 = vcombine.high %v7656_v32, %v11121_v27  ;;  %v7964_v2 = vcombine.high %v7679_v29, %v11121_v27  ;;  %v7968_v44 = vcombine.high %v7731_v51, %v11121_v27 }
 0x374   : > { %v7972_v25 = vcombine.high %v7752_v52, %v11121_v27  ;;  %v7976_v24 = vcombine.high %v7800_v55, %v11121_v27  ;;  %v7980_v6 = vcombine.high %v7828_v8, %v11121_v27  ;;  %v11132_v8 = vld [vmem:[#allocation136_spill] sm:$0xff] }
 0x375   : > { %11122 = vst [vmem:[#allocation195_spill] sm:$0xff] %v7960_v45  ;;  %11123 = vst [vmem:[#allocation196_spill] sm:$0xff] %v7964_v2  ;;  %v11128_v45 = vld [vmem:[#allocation135_spill] sm:$0xff]  ;;  %3775 = vrot.lane.b32.xlu0 %v3708_v38, %s6050_s28  ;;  %3773 = vrot.lane.b32.xlu1 %v3707_v7, %s6050_s28  ;;  %v11134_v38 = vld [vmem:[#allocation137_spill] sm:$0xff] }
 0x376   : > { %11124 = vst [vmem:[#allocation197_spill] sm:$0xff] %v7968_v44  ;;  %11125 = vst [vmem:[#allocation198_spill] sm:$0xff] %v7972_v25  ;;  %v7983_v9 = vadd.f32 %v11128_v45, %v2392_v35  ;;  %v7989_v44 = vcombine.high %v7844_v41, %v11121_v27  ;;  %v7993_v25 = vcombine.high %v7896_v16, %v11121_v27  ;;  %v11133_v35 = vld [vmem:[#allocation119_spill] sm:$0xff]  ;;  %v11135_v7 = vld [vmem:[#allocation120_spill] sm:$0xff] }
 0x377   : > { %11126 = vst [vmem:[#allocation199_spill] sm:$0xff] %v7976_v24  ;;  %11127 = vst [vmem:[#allocation200_spill] sm:$0xff] %v7980_v6  ;;  %v11131_v24 = vld [vmem:[#allocation118_spill] sm:$0xff]  ;;  %v7999_v6 = vadd.f32 %v11132_v8, %v2394_v30  ;;  %v8002_v45 = vadd.f32 %v11133_v35, %v2393_v60  ;;  %v8005_v55 = vadd.f32 %v11134_v38, %v2396_v58  ;;  %v11139_v30 = vld [vmem:[#allocation139_spill] sm:$0xff] }
 0x378   : > { %11129 = vst [vmem:[#allocation135_spill] sm:$0xff] %v7989_v44  ;;  %11130 = vst [vmem:[#allocation201_spill] sm:$0xff] %v7993_v25  ;;  %v7996_v2 = vadd.f32 %v11131_v24, %v2391_v59  ;;  %v8008_v52 = vadd.f32 %v11135_v7, %v2395_v37  ;;  %v11136_v44 = vld [vmem:[#allocation138_spill] sm:$0xff]  ;;  %v3710_v27 = vmul.f32 %v3692_v0, %v7188_v12  ;;  %v11138_v59 = vld [vmem:[#allocation121_spill] sm:$0xff] }
 0x379   : > { %v8011_v41 = vadd.f32 %v11136_v44, %v2398_v63  ;;  %v3709_v24 = vmul.f32 %v3692_v0, %v7180_v57  ;;  %v8016_v25 = vadd.f32 %v11138_v59, %v2397_v19  ;;  %v8019_v8 = vadd.f32 %v11139_v30, %v2400_v36  ;;  %v11140_v60 = vld [vmem:[#allocation122_spill] sm:$0xff]  ;;  %v11141_v58 = vld [vmem:[#allocation140_spill] sm:$0xff]  ;;  %v11142_v37 = vld [vmem:[#allocation123_spill] sm:$0xff] }
 0x37a   : > { %v8022_v35 = vadd.f32 %v11140_v60, %v2399_v11  ;;  %v8025_v38 = vadd.f32 %v11141_v58, %v2402_v61  ;;  %v8028_v7 = vadd.f32 %v11142_v37, %v2401_v17  ;;  %v11143_v44 = vld [vmem:[#allocation141_spill] sm:$0xff]  ;;  %v11144_v16 = vld [vmem:[#allocation134_spill] sm:$0xff]  ;;  %3779 = vrot.lane.b32.xlu0 %v3710_v27, %s6050_s28  ;;  %v11145_v19 = vld [vmem:[#allocation124_spill] sm:$0xff]  ;;  %v8051_v60 = vpop.permute.xlu1 %3158  ;;  %v8058_v27 = vrot.slane %v7920_v26, %v10885_v48 }
 0x37b   : > { %11137 = vst [vmem:[#allocation118_spill] sm:$0xff] %v8011_v41  ;;  %v8031_v63 = vadd.f32 %v11143_v44, %v2404_v28  ;;  %v8035_v41 = vrot.slane %v11144_v16, %v10875_v54  ;;  %3777 = vrot.lane.b32.xlu1 %v3709_v24, %s6050_s28  ;;  %v8040_v36 = vadd.f32 %v11145_v19, %v2403_v50  ;;  %v11146_v11 = vld [vmem:[#allocation142_spill] sm:$0xff]  ;;  %v11147_v59 = vld [vmem:[#allocation125_spill] sm:$0xff]  ;;  %v11148_v30 = vld [vmem:[#allocation143_spill] sm:$0xff] }
 0x37c   : > { %v8043_v61 = vadd.f32 %v11146_v11, %v2406_v42  ;;  %v8046_v17 = vadd.f32 %v11147_v59, %v2405_v18  ;;  %v8049_v28 = vadd.f32 %v11148_v30, %v2408_v13  ;;  %11149 = vst [vmem:[#allocation136_spill] sm:$0xff] %v8051_v60  ;;  %v11150_v58 = vld [vmem:[#allocation126_spill] sm:$0xff]  ;;  %v3712_v50 = vmul.f32 %v3692_v0, %v7620_v10  ;;  %v11151_v24 = vld [vmem:[#allocation144_spill] sm:$0xff]  ;;  %v11152_v18 = vld [vmem:[#allocation127_spill] sm:$0xff] }
 0x37d   : > { %v8054_v37 = vadd.f32 %v11150_v58, %v2407_v1  ;;  %v3711_v42 = vmul.f32 %v3692_v0, %v7192_v5  ;;  %v8063_v44 = vadd.f32 %v11151_v24, %v2410_v40  ;;  %v8066_v19 = vadd.f32 %v11152_v18, %v2409_v46  ;;  %v11153_v13 = vld [vmem:[#allocation145_spill] sm:$0xff]  ;;  %v11155_v59 = vld [vmem:[#allocation128_spill] sm:$0xff]  ;;  %v11157_v30 = vld [vmem:[#allocation146_spill] sm:$0xff] }
 0x37e   : > { %v8069_v11 = vadd.f32 %v11153_v13, %v2412_v39  ;;  %v8072_v1 = vadd.f32 %v11155_v59, %v2411_v62  ;;  %v8075_v58 = vadd.f32 %v11157_v30, %v2414_v34  ;;  %v2695_v10 = vmul.f32 %v8035_v41, %v7156_v23  ;;  %3783 = vrot.lane.b32.xlu0 %v3712_v50, %s6050_s28  ;;  %v11159_v46 = vld [vmem:[#allocation129_spill] sm:$0xff]  ;;  %v11161_v40 = vld [vmem:[#allocation147_spill] sm:$0xff]  ;;  %v11163_v24 = vld [vmem:[#allocation130_spill] sm:$0xff] }
 0x37f   : > { %v2696_v0 = vmul.f32 %v8035_v41, %v7630_v22  ;;  %3781 = vrot.lane.b32.xlu1 %v3711_v42, %s6050_s28  ;;  %v8084_v39 = vadd.f32 %v11159_v46, %v2413_v31  ;;  %v8087_v62 = vadd.f32 %v11161_v40, %v2416_v56  ;;  %v8090_v34 = vadd.f32 %v11163_v24, %v2415_v21  ;;  %v11165_v18 = vld [vmem:[#allocation148_spill] sm:$0xff]  ;;  %v11167_v30 = vld [vmem:[#allocation107_spill] sm:$0xff]  ;;  %v11168_v31 = vld [vmem:[#allocation106_spill] sm:$0xff] }
 0x380   : > { %11154 = vst [vmem:[#allocation119_spill] sm:$0xff] %v8069_v11  ;;  %11156 = vst [vmem:[#allocation137_spill] sm:$0xff] %v8072_v1  ;;  %v8093_v13 = vadd.f32 %v11165_v18, %v2418_v14  ;;  %v2693_v59 = vmul.f32 %v8035_v41, %v7152_v43  ;;  %v2694_v50 = vmul.f32 %v8035_v41, %v7624_v53  ;;  %v11169_v56 = vld [vmem:[#allocation131_spill] sm:$0xff]  ;;  %v11171_v21 = vld [vmem:[#allocation149_spill] sm:$0xff]  ;;  %v8114_v53 = vpop.permute.xlu1 %3162  ;;  %v2825_v18 = vrot.slane %v2695_v10, 1 }
 0x381   : > { %11158 = vst [vmem:[#allocation120_spill] sm:$0xff] %v8075_v58  ;;  %11160 = vst [vmem:[#allocation138_spill] sm:$0xff] %v8084_v39  ;;  %v3714_v42 = vmul.f32 %v8058_v27, %v11167_v30  ;;  %v3713_v46 = vmul.f32 %v8058_v27, %v11168_v31  ;;  %v8105_v40 = vadd.f32 %v11169_v56, %v7942_v4  ;;  %v2826_v22 = vrot.slane %v2696_v0, 1  ;;  %v11174_v23 = vld [vmem:[#allocation43_spill] sm:$0xff]  ;;  %v11180_v10 = vld [vmem:[#allocation133_spill] sm:$0xff] }
 0x382   : > { %11162 = vst [vmem:[#allocation121_spill] sm:$0xff] %v8087_v62  ;;  %11164 = vst [vmem:[#allocation139_spill] sm:$0xff] %v8090_v34  ;;  %v8108_v24 = vadd.f32 %v11171_v21, %v2420_v3  ;;  %v2699_v14 = vmul.f32 %v8035_v41, %v7168_v47  ;;  %v2700_v43 = vmul.f32 %v8035_v41, %v7656_v32  ;;  %v11176_v3 = vld [vmem:[#allocation132_spill] sm:$0xff]  ;;  %v11178_v21 = vld [vmem:[#allocation150_spill] sm:$0xff] }
 0x383   : > { %11166 = vst [vmem:[#allocation122_spill] sm:$0xff] %v8093_v13  ;;  %11170 = vst [vmem:[#allocation140_spill] sm:$0xff] %v8105_v40  ;;  %v2697_v60 = vmul.f32 %v8035_v41, %v11174_v23  ;;  %v11175_v13 = vld [vmem:[#allocation12_spill] sm:$0xff]  ;;  %3787 = vrot.lane.b32.xlu0 %v3714_v42, %s6050_s28  ;;  %3785 = vrot.lane.b32.xlu1 %v3713_v46, %s6050_s28  ;;  %v8124_v56 = vadd.f32 %v11176_v3, %v7948_v33  ;;  %v11182_v47 = vld [vmem:[#allocation151_spill] sm:$0xff]  ;;  %v2823_v42 = vrot.slane %v2694_v50, 1 }
 0x384   : > { %11172 = vst [vmem:[#allocation123_spill] sm:$0xff] %v8108_v24  ;;  %11173 = vst [vmem:[#allocation141_spill] sm:$0xff] %v8114_v53  ;;  %v2698_v4 = vmul.f32 %v8035_v41, %v11175_v13  ;;  %v8128_v32 = vadd.f32 %v11178_v21, %v7951_v15  ;;  %v8132_v0 = vadd.f32 %v11180_v10, %v7954_v20  ;;  %v2822_v13 = vrot.slane %v2693_v59, 1  ;;  %v11183_v53 = vld [vmem:[#allocation49_spill] sm:$0xff]  ;;  %v11184_v24 = vld [vmem:[#allocation48_spill] sm:$0xff] }
 0x385   : > { %11177 = vst [vmem:[#allocation134_spill] sm:$0xff] %v8124_v56  ;;  %v8136_v23 = vrot.slane %v11182_v47, %v10875_v54  ;;  %v3716_v46 = vmul.f32 %v8058_v27, %v11183_v53  ;;  %v3715_v33 = vmul.f32 %v8058_v27, %v11184_v24  ;;  %v8144_v15 = vrot.slane %v11182_v47, %v10885_v48  ;;  %v11185_v50 = vld [vmem:[#allocation10_spill] sm:$0xff]  ;;  %v11186_v56 = vld [vmem:[#allocation109_spill] sm:$0xff]  ;;  %v11198_v58 = vld [vmem:[#allocation63_spill] sm:$0xff] }
 0x386   : > { %11179 = vst [vmem:[#allocation124_spill] sm:$0xff] %v8128_v32  ;;  %11181 = vst [vmem:[#allocation142_spill] sm:$0xff] %v8132_v0  ;;  %v2831_v3 = vrot.slane %v2699_v14, 1  ;;  %v2832_v21 = vrot.slane %v2700_v43, 1  ;;  %v2703_v20 = vmul.f32 %v8035_v41, %v7180_v57  ;;  %v2827_v10 = vsel %vm2821_vm3, %v2825_v18, %v2826_v22  ;;  %v11187_v14 = vld [vmem:[#allocation87_spill] sm:$0xff]  ;;  %v8169_v18 = vpop.permute.xlu1 %3166  ;;  %v11192_v39 = vld [vmem:[#allocation38_spill] sm:$0xff] }
 0x387   : > { %v2828_v0 = vrot.slane %v2697_v60, 1  ;;  %v2829_v59 = vrot.slane %v2698_v4, 1  ;;  %v2704_v32 = vmul.f32 %v8035_v41, %v11185_v50  ;;  %3791 = vrot.lane.b32.xlu0 %v3716_v46, %s6050_s28  ;;  %3789 = vrot.lane.b32.xlu1 %v3715_v33, %s6050_s28  ;;  %v8155_v40 = vrot.slane %v11182_v47, %v11186_v56  ;;  %11189 = vst [vmem:[#allocation143_spill] sm:$0xff] %v8169_v18  ;;  %v11190_v33 = vld [vmem:[#allocation51_spill] sm:$0xff]  ;;  %v11191_v50 = vld [vmem:[#allocation50_spill] sm:$0xff] }
 0x388   : > { %v8159_v43 = vrot.slane %v11182_v47, %v11187_v14  ;;  %v8163_v22 = vrot.slane %v11144_v16, %v10885_v48  ;;  %v8167_v60 = vrot.slane %v11144_v16, %v11186_v56  ;;  %v8173_v4 = vrot.slane %v11144_v16, %v11187_v14 }
 0x389   : > { %v2824_v46 = vsel %vm2821_vm3, %v2822_v13, %v2823_v42  ;;  %v3718_v47 = vmul.f32 %v8058_v27, %v11190_v33  ;;  %v3717_v57 = vmul.f32 %v8058_v27, %v11191_v50  ;;  %v2951_v48 = vadd.f32 %v2827_v10, %v7983_v9  ;;  %v11193_v9 = vld [vmem:[#allocation62_spill] sm:$0xff]  ;;  %v11195_v10 = vld [vmem:[#allocation64_spill] sm:$0xff] }
 0x38a   : > { %11188 = vst [vmem:[#allocation125_spill] sm:$0xff] %v8159_v43  ;;  %v2833_v34 = vsel %vm2821_vm3, %v2831_v3, %v2832_v21  ;;  %v2837_v43 = vrot.slane %v2703_v20, 1  ;;  %v2701_v18 = vmul.f32 %v8035_v41, %v7176_v49  ;;  %v2830_v62 = vsel %vm2821_vm3, %v2828_v0, %v2829_v59  ;;  %v11194_v21 = vld [vmem:[#allocation61_spill] sm:$0xff] }
 0x38b   : > { %v2838_v16 = vrot.slane %v2704_v32, 1  ;;  %v2702_v13 = vmul.f32 %v8035_v41, %v11192_v39  ;;  %v2707_v42 = vmul.f32 %v8035_v41, %v7192_v5  ;;  %3795 = vrot.lane.b32.xlu0 %v3718_v47, %s6050_s28  ;;  %3793 = vrot.lane.b32.xlu1 %v3717_v57, %s6050_s28  ;;  %v3006_v3 = vmul.f32 %v8136_v23, %v11193_v9  ;;  %v11196_v47 = vld [vmem:[#allocation21_spill] sm:$0xff]  ;;  %v11197_v5 = vld [vmem:[#allocation108_spill] sm:$0xff] }
 0x38c   : > { %v3005_v20 = vmul.f32 %v8136_v23, %v11194_v21  ;;  %v3008_v0 = vmul.f32 %v8136_v23, %v11195_v10  ;;  %v2708_v32 = vmul.f32 %v8035_v41, %v7679_v29  ;;  %v2950_v59 = vadd.f32 %v2824_v46, %v7996_v2  ;;  %v8214_v2 = vpop.permute.xlu1 %3170 }
 0x38d   : > { %v8202_v39 = vrot.slane %v7920_v26, %v11186_v56  ;;  %v3720_v57 = vmul.f32 %v8058_v27, %v11196_v47  ;;  %v3719_v49 = vmul.f32 %v8058_v27, %v11197_v5  ;;  %v8208_v9 = vadd.f32 %v3006_v3, %v2951_v48  ;;  %11199 = vst [vmem:[#allocation126_spill] sm:$0xff] %v8214_v2  ;;  %v11200_v27 = vld [vmem:[#allocation41_spill] sm:$0xff] }
 0x38e   : > { %v2953_v21 = vadd.f32 %v2833_v34, %v7999_v6  ;;  %v2952_v10 = vadd.f32 %v2830_v62, %v8002_v45  ;;  %v3007_v29 = vmul.f32 %v8136_v23, %v11198_v58  ;;  %v2839_v46 = vsel %vm2821_vm3, %v2837_v43, %v2838_v16  ;;  %v11201_v43 = vld [vmem:[#allocation42_spill] sm:$0xff]  ;;  %v11202_v16 = vld [vmem:[#allocation80_spill] sm:$0xff]  ;;  %v11206_v47 = vld [vmem:[#allocation69_spill] sm:$0xff] }
 0x38f   : > { %v2834_v56 = vrot.slane %v2701_v18, 1  ;;  %v2835_v1 = vrot.slane %v2702_v13, 1  ;;  %v2843_v11 = vrot.slane %v2707_v42, 1  ;;  %3799 = vrot.lane.b32.xlu0 %v3720_v57, %s6050_s28  ;;  %3797 = vrot.lane.b32.xlu1 %v3719_v49, %s6050_s28  ;;  %v2844_v48 = vrot.slane %v2708_v32, 1  ;;  %v11203_v42 = vld [vmem:[#allocation52_spill] sm:$0xff]  ;;  %v11204_v32 = vld [vmem:[#allocation66_spill] sm:$0xff] }
 0x390   : > { %v2705_v6 = vmul.f32 %v8035_v41, %v7188_v12  ;;  %v2706_v45 = vmul.f32 %v8035_v41, %v11200_v27  ;;  %v2711_v62 = vmul.f32 %v8163_v22, %v11168_v31  ;;  %v8225_v34 = vadd.f32 %v3005_v20, %v2950_v59  ;;  %v11205_v41 = vld [vmem:[#allocation65_spill] sm:$0xff]  ;;  %v8248_v58 = vpop.permute.xlu1 %3174 }
 0x391   : > { %v2712_v18 = vmul.f32 %v8163_v22, %v11201_v43  ;;  %v3722_v13 = vmul.f32 %v8202_v39, %v11202_v16  ;;  %v3721_v49 = vmul.f32 %v8202_v39, %v11203_v42  ;;  %v8233_v3 = vadd.f32 %v3008_v0, %v2953_v21  ;;  %11207 = vst [vmem:[#allocation144_spill] sm:$0xff] %v8248_v58  ;;  %v11208_v2 = vld [vmem:[#allocation105_spill] sm:$0xff] }
 0x392   : > { %v3010_v57 = vmul.f32 %v8136_v23, %v11204_v32  ;;  %v3009_v27 = vmul.f32 %v8136_v23, %v11205_v41  ;;  %v3012_v20 = vmul.f32 %v8136_v23, %v11206_v47  ;;  %v8241_v59 = vadd.f32 %v3007_v29, %v2952_v10  ;;  %v11209_v10 = vld [vmem:[#allocation81_spill] sm:$0xff]  ;;  %v11215_v47 = vld [vmem:[#allocation68_spill] sm:$0xff] }
 0x393   : > { %v2955_v43 = vadd.f32 %v2839_v46, %v8005_v55  ;;  %v2836_v31 = vsel %vm2821_vm3, %v2834_v56, %v2835_v1  ;;  %3803 = vrot.lane.b32.xlu0 %v3722_v13, %s6050_s28  ;;  %3801 = vrot.lane.b32.xlu1 %v3721_v49, %s6050_s28  ;;  %v2845_v21 = vsel %vm2821_vm3, %v2843_v11, %v2844_v48  ;;  %v2840_v0 = vrot.slane %v2705_v6, 1  ;;  %v11210_v46 = vld [vmem:[#allocation54_spill] sm:$0xff]  ;;  %v11211_v56 = vld [vmem:[#allocation24_spill] sm:$0xff] }
 0x394   : > { %v2841_v12 = vrot.slane %v2706_v45, 1  ;;  %v2849_v32 = vrot.slane %v2711_v62, 1  ;;  %v2850_v41 = vrot.slane %v2712_v18, 1  ;;  %v2709_v29 = vmul.f32 %v8163_v22, %v11208_v2  ;;  %v11213_v62 = vld [vmem:[#allocation29_spill] sm:$0xff]  ;;  %v11214_v49 = vld [vmem:[#allocation118_spill] sm:$0xff] }
 0x395   : > { %v3724_v55 = vmul.f32 %v8202_v39, %v11209_v10  ;;  %v3723_v1 = vmul.f32 %v8202_v39, %v11210_v46  ;;  %v2710_v13 = vmul.f32 %v8163_v22, %v11211_v56  ;;  %v2715_v11 = vmul.f32 %v8163_v22, %v11184_v24 }
 0x396   : > { %v2716_v48 = vmul.f32 %v8163_v22, %v7731_v51  ;;  %v2713_v6 = vmul.f32 %v8163_v22, %v11167_v30  ;;  %v8264_v45 = vadd.f32 %v3010_v57, %v2955_v43  ;;  %v2954_v2 = vadd.f32 %v2836_v31, %v8008_v52  ;;  %v11216_v57 = vld [vmem:[#allocation84_spill] sm:$0xff]  ;;  %v11217_v31 = vld [vmem:[#allocation55_spill] sm:$0xff] }
 0x397   : > { %v2714_v18 = vmul.f32 %v8163_v22, %v11213_v62  ;;  %3807 = vrot.lane.b32.xlu0 %v3724_v55, %s6050_s28  ;;  %3805 = vrot.lane.b32.xlu1 %v3723_v1, %s6050_s28  ;;  %v2957_v56 = vadd.f32 %v2845_v21, %v11214_v49  ;;  %v2842_v24 = vsel %vm2821_vm3, %v2840_v0, %v2841_v12  ;;  %v2846_v43 = vrot.slane %v2709_v29, 1  ;;  %v8280_v1 = vpop.permute.xlu1 %3178 }
 0x398   : > { %11212 = vst [vmem:[#allocation127_spill] sm:$0xff] %v8264_v45  ;;  %v3011_v51 = vmul.f32 %v8136_v23, %v11215_v47  ;;  %v2851_v30 = vsel %vm2821_vm3, %v2849_v32, %v2850_v41  ;;  %v3726_v52 = vmul.f32 %v8202_v39, %v11216_v57  ;;  %v3725_v62 = vmul.f32 %v8202_v39, %v11217_v31  ;;  %v11218_v23 = vld [vmem:[#allocation88_spill] sm:$0xff] }
 0x399   : > { %v2847_v58 = vrot.slane %v2710_v13, 1  ;;  %v2855_v55 = vrot.slane %v2715_v11, 1  ;;  %v2856_v45 = vrot.slane %v2716_v48, 1  ;;  %v2852_v21 = vrot.slane %v2713_v6, 1  ;;  %v11219_v48 = vld [vmem:[#allocation72_spill] sm:$0xff] }
 0x39a   : > { %v2853_v49 = vrot.slane %v2714_v18, 1  ;;  %v2719_v12 = vmul.f32 %v8163_v22, %v11191_v50  ;;  %v2720_v32 = vmul.f32 %v8163_v22, %v11218_v23  ;;  %v6054_v41 = vmov 1966171168   ;;  %v11221_v50 = vld [vmem:[#allocation56_spill] sm:$0xff] }
 0x39b   : > { %3811 = vrot.lane.b32.xlu0 %v3726_v52, %s6050_s28  ;;  %3809 = vrot.lane.b32.xlu1 %v3725_v62, %s6050_s28  ;;  %v4316_v0 = vunpack.c.l.s4 %v6054_v41  ;;  %v8288_v29 = vadd.f32 %v3009_v27, %v2954_v2  ;;  %v8290_v13 = vadd.f32 %v3012_v20, %v2957_v56  ;;  %v2956_v11 = vadd.f32 %v2842_v24, %v8016_v25  ;;  %v11220_v52 = vld [vmem:[#allocation13_spill] sm:$0xff]  ;;  %v11222_v24 = vld [vmem:[#allocation19_spill] sm:$0xff]  ;;  %v11231_v47 = vld [vmem:[#allocation76_spill] sm:$0xff] }
 0x39c   : > { %v3014_v6 = vmul.f32 %v8144_v15, %v11219_v48  ;;  %v2959_v18 = vadd.f32 %v2851_v30, %v8019_v8  ;;  %v8298_v23 = vrot.slane %v7920_v26, %v11187_v14  ;;  %v3728_v62 = vmul.f32 %v8202_v39, %v11220_v52 }
 0x39d   : > { %v3727_v27 = vmul.f32 %v8202_v39, %v11221_v50  ;;  %v2848_v20 = vsel %vm2821_vm3, %v2846_v43, %v2847_v58  ;;  %v2857_v2 = vsel %vm2821_vm3, %v2855_v55, %v2856_v45  ;;  %v2717_v25 = vmul.f32 %v8163_v22, %v11183_v53  ;;  %v11223_v58 = vld [vmem:[#allocation71_spill] sm:$0xff]  ;;  %v8317_v43 = vpop.permute.xlu1 %3182 }
 0x39e   : > { %v2718_v8 = vmul.f32 %v8163_v22, %v11222_v24  ;;  %v2854_v30 = vsel %vm2821_vm3, %v2852_v21, %v2853_v49  ;;  %v2861_v26 = vrot.slane %v2719_v12, 1  ;;  %v2862_v56 = vrot.slane %v2720_v32, 1  ;;  %11224 = vst [vmem:[#allocation145_spill] sm:$0xff] %v8317_v43  ;;  %v11225_v24 = vld [vmem:[#allocation158_spill] sm:$0xff] }
 0x39f   : > { %3815 = vrot.lane.b32.xlu0 %v3728_v62, %s6050_s28  ;;  %3813 = vrot.lane.b32.xlu1 %v3727_v27, %s6050_s28  ;;  %v4317_v41 = vunpack.c.0.s8 %v4316_v0  ;;  %v8313_v39 = vadd.f32 %v3011_v51, %v2956_v11  ;;  %v3013_v45 = vmul.f32 %v8144_v15, %v11223_v58  ;;  %v2723_v55 = vmul.f32 %v8163_v22, %v11197_v5  ;;  %v11226_v12 = vld [vmem:[#allocation74_spill] sm:$0xff]  ;;  %v11227_v62 = vld [vmem:[#allocation111_spill] sm:$0xff] }
 0x3a0   : > { %v2724_v21 = vmul.f32 %v8163_v22, %v11225_v24  ;;  %v2958_v49 = vadd.f32 %v2848_v20, %v8022_v35  ;;  %v3016_v32 = vmul.f32 %v8144_v15, %v11226_v12  ;;  %v3730_v51 = vmul.f32 %v8298_v23, %v11227_v62  ;;  %v11228_v0 = vld [vmem:[#allocation59_spill] sm:$0xff]  ;;  %v11230_v12 = vld [vmem:[#allocation73_spill] sm:$0xff] }
 0x3a1   : > { %v3729_v11 = vmul.f32 %v8298_v23, %v11228_v0  ;;  %v2961_v27 = vadd.f32 %v2857_v2, %v8025_v38  ;;  %v2960_v52 = vadd.f32 %v2854_v30, %v8028_v7  ;;  %v2858_v53 = vrot.slane %v2717_v25, 1  ;;  %v11229_v35 = vld [vmem:[#allocation23_spill] sm:$0xff]  ;;  %v11233_v30 = vld [vmem:[#allocation113_spill] sm:$0xff] }
 0x3a2   : > { %v2859_v5 = vrot.slane %v2718_v8, 1  ;;  %v8332_v58 = vadd.f32 %v3014_v6, %v2959_v18  ;;  %v2863_v24 = vsel %vm2821_vm3, %v2861_v26, %v2862_v56  ;;  %v8338_v20 = vsub.s32 %v4317_v41, %v11229_v35  ;;  %v4272_v6 = vld [vmem:[%s10425_s3] sm:$0xff]  ;;  %v11232_v25 = vld [vmem:[#allocation75_spill] sm:$0xff]  ;;  %v8361_v35 = vpop.permute.xlu1 %3186 }
 0x3a3   : > { %3819 = vrot.lane.b32.xlu0 %v3730_v51, %s6050_s28  ;;  %3817 = vrot.lane.b32.xlu1 %v3729_v11, %s6050_s28  ;;  %v3015_v48 = vmul.f32 %v8144_v15, %v11230_v12  ;;  %v3018_v38 = vmul.f32 %v8144_v15, %v11231_v47  ;;  %v2867_v7 = vrot.slane %v2723_v55, 1  ;;  %v2868_v2 = vrot.slane %v2724_v21, 1  ;;  %v11234_v56 = vld [vmem:[#allocation112_spill] sm:$0xff]  ;;  %11236 = vst [vmem:[#allocation146_spill] sm:$0xff] %v8361_v35  ;;  %v11243_v47 = vld [vmem:[#allocation114_spill] sm:$0xff] }
 0x3a4   : > { %v8347_v18 = vadd.f32 %v3013_v45, %v2958_v49  ;;  %v3017_v8 = vmul.f32 %v8144_v15, %v11232_v25  ;;  %v3732_v26 = vmul.f32 %v8298_v23, %v11233_v30  ;;  %v3731_v41 = vmul.f32 %v8298_v23, %v11234_v56  ;;  %v11237_v49 = vld [vmem:[#allocation11_spill] sm:$0xff] }
 0x3a5   : > { %v8355_v51 = vadd.f32 %v3016_v32, %v2961_v27  ;;  %v8357_v11 = vadd.f32 %v3015_v48, %v2960_v52  ;;  %v2963_v55 = vadd.f32 %v2863_v24, %v8031_v63  ;;  %v2860_v21 = vsel %vm2821_vm3, %v2858_v53, %v2859_v5  ;;  %v11238_v52 = vld [vmem:[#allocation78_spill] sm:$0xff]  ;;  %v11239_v53 = vld [vmem:[#allocation161_spill] sm:$0xff] }
 0x3a6   : > { %v2721_v45 = vmul.f32 %v8163_v22, %v11190_v33  ;;  %v2722_v25 = vmul.f32 %v8163_v22, %v11237_v49  ;;  %v4321_v32 = vrot.slane %v4272_v6, %v8338_v20  ;;  %v2869_v48 = vsel %vm2821_vm3, %v2867_v7, %v2868_v2  ;;  %v11240_v27 = vld [vmem:[#allocation110_spill] sm:$0xff]  ;;  %v11241_v49 = vld [vmem:[#allocation160_spill] sm:$0xff] }
 0x3a7   : > { %11235 = vst [vmem:[#allocation128_spill] sm:$0xff] %v8357_v11  ;;  %3823 = vrot.lane.b32.xlu0 %v3732_v26, %s6050_s28  ;;  %3821 = vrot.lane.b32.xlu1 %v3731_v41, %s6050_s28  ;;  %v3020_v63 = vmul.f32 %v8144_v15, %v11238_v52  ;;  %v2727_v5 = vmul.f32 %v8167_v60, %v11203_v42  ;;  %v11242_v41 = vld [vmem:[#allocation115_spill] sm:$0xff]  ;;  %v11244_v42 = vld [vmem:[#allocation77_spill] sm:$0xff] }
 0x3a8   : > { %v2728_v24 = vmul.f32 %v8167_v60, %v11239_v53  ;;  %v2725_v22 = vmul.f32 %v8167_v60, %v11240_v27  ;;  %v2726_v26 = vmul.f32 %v8167_v60, %v11241_v49  ;;  %v3734_v33 = vmul.f32 %v8298_v23, %v11242_v41 }
 0x3a9   : > { %v3733_v7 = vmul.f32 %v8298_v23, %v11243_v47  ;;  %v8385_v2 = vadd.f32 %v3018_v38, %v2963_v55  ;;  %v2962_v52 = vadd.f32 %v2860_v21, %v8040_v36  ;;  %v8390_v12 = vmul.f32 %v8144_v15, %v11244_v42  ;;  %v8395_v38 = vpop.permute.xlu1 %3190  ;;  %v11246_v55 = vld [vmem:[#allocation168_spill] sm:$0xff] }
 0x3aa   : > { %v4314_v53 = vcombine.high %v4272_v6, %v4272_v6  ;;  %v2965_v27 = vadd.f32 %v2869_v48, %v8043_v61  ;;  %v2864_v14 = vrot.slane %v2721_v45, 1  ;;  %v2865_v35 = vrot.slane %v2722_v25, 1  ;;  %11245 = vst [vmem:[#allocation129_spill] sm:$0xff] %v8395_v38  ;;  %v11247_v61 = vld [vmem:[#allocation28_spill] sm:$0xff] }
 0x3ab   : > { %3827 = vrot.lane.b32.xlu0 %v3734_v33, %s6050_s28  ;;  %3825 = vrot.lane.b32.xlu1 %v3733_v7, %s6050_s28  ;;  %v4329_v49 = vcombine.high %v4321_v32, %v4321_v32  ;;  %v2873_v43 = vrot.slane %v2727_v5, 1  ;;  %v2874_v11 = vrot.slane %v2728_v24, 1  ;;  %v2731_v36 = vmul.f32 %v8167_v60, %v11210_v46  ;;  %v11248_v45 = vld [vmem:[#allocation116_spill] sm:$0xff]  ;;  %v11249_v24 = vld [vmem:[#allocation162_spill] sm:$0xff] }
 0x3ac   : > { %v2732_v15 = vmul.f32 %v8167_v60, %v11246_v55  ;;  %v2870_v6 = vrot.slane %v2725_v22, 1  ;;  %v2871_v21 = vrot.slane %v2726_v26, 1  ;;  %v3736_v25 = vmul.f32 %v8298_v23, %v11247_v61  ;;  %v11250_v55 = vld [vmem:[#allocation83_spill] sm:$0xff] }
 0x3ad   : > { %v3735_v33 = vmul.f32 %v8298_v23, %v11248_v45  ;;  %v8405_v48 = vadd.f32 %v3017_v8, %v2962_v52  ;;  %v2729_v5 = vmul.f32 %v8167_v60, %v11202_v16  ;;  %v2730_v7 = vmul.f32 %v8167_v60, %v11249_v24 }
 0x3ae   : > { %v8412_v46 = vrot.slane %v4314_v53, %v8338_v20  ;;  %v3022_v22 = vmul.f32 %v8155_v40, %v11250_v55  ;;  %v4337_v23 = vrot.slane %v4321_v32, %v8338_v20  ;;  %v8420_v8 = vrot.slane %v4329_v49, %v8338_v20  ;;  %v11251_v53 = vld [vmem:[#allocation82_spill] sm:$0xff]  ;;  %v5854_v32 = vld [vmem:[%s10423_s1 + $0x8] ss:$0 sm:$0xff] }
 0x3af   : > { %3831 = vrot.lane.b32.xlu0 %v3736_v25, %s6050_s28  ;;  %3829 = vrot.lane.b32.xlu1 %v3735_v33, %s6050_s28  ;;  %v8422_v52 = vadd.f32 %v3020_v63, %v2965_v27  ;;  %v2866_v26 = vsel %vm2821_vm3, %v2864_v14, %v2865_v35  ;;  %v2875_v24 = vsel %vm2821_vm3, %v2873_v43, %v2874_v11  ;;  %v5855_v25 = vld [vmem:[%s10426_s4] ss:$0 sm:$0xff]  ;;  %v2879_v33 = vrot.slane %v2731_v36, 1  ;;  %v8437_v35 = vpop.permute.xlu1 %3194  ;;  %v11253_v27 = vld [vmem:[#allocation165_spill] sm:$0xff]  ;;  %s5970_s28 = scalar_lea.vmem %s10375_s11, 1024 }
 0x3b0   : > { %v3021_v61 = vmul.f32 %v8155_v40, %v11251_v53  ;;  %v2872_v49 = vsel %vm2821_vm3, %v2870_v6, %v2871_v21  ;;  %v2880_v63 = vrot.slane %v2732_v15, 1  ;;  %v2735_v14 = vmul.f32 %v8167_v60, %v11217_v31  ;;  %11252 = vst [vmem:[#allocation147_spill] sm:$0xff] %v8437_v35  ;;  %v11255_v31 = vld [vmem:[#allocation86_spill] sm:$0xff]  ;;  %p5971_p11 = scmp.ne.s32.totalorder %s10375_s11, %s5970_s28  ;;  %p5978_p7 = scmp.lt.s32.totalorder %s5976_s14, %s5970_s28 }
 0x3b1   : > { %v2876_v43 = vrot.slane %v2729_v5, 1  ;;  %v2877_v11 = vrot.slane %v2730_v7, 1  ;;  %v2736_v16 = vmul.f32 %v8167_v60, %v11253_v27  ;;  %v4330_v53 = vcombine.high %v8412_v46, %v8412_v46  ;;  %v11254_v7 = vld [vmem:[#allocation163_spill] sm:$0xff] }
 0x3b2   : > { %v8444_v55 = vrot.slane %v4337_v23, %v10875_v54  ;;  %v4361_v36 = vcombine.high %v8420_v8, %v8420_v8  ;;  %v4359_v15 = vcombine.high %v4337_v23, %v4337_v23  ;;  %v2964_v6 = vadd.f32 %v2866_v26, %v8046_v17  ;;  %p5972_p13 = pnand %p5971_p11, %p11672_p12  ;;  %p5979_p8 = por %p5978_p7, %p5977_p5 }
 0x3b3   : > { %4279 = vbcast.lane.b32.xlu0 %v5855_v25, 256  ;;  %3902 = vbcast.lane.b32.xlu1 %v5854_v32, 256  ;;  %v2967_v21 = vadd.f32 %v2875_v24, %v8049_v28  ;;  %v2733_v5 = vmul.f32 %v8167_v60, %v11209_v10  ;;  %v2734_v27 = vmul.f32 %v8167_v60, %v11254_v7  ;;  %v2885_v35 = vrot.slane %v2735_v14, 1  ;;  %v11256_v28 = vld [vmem:[#allocation176_spill] sm:$0xff] }
 0x3b4   : > { %v2966_v25 = vadd.f32 %v2872_v49, %v8054_v37  ;;  %v2881_v32 = vsel %vm2821_vm3, %v2879_v33, %v2880_v63  ;;  %v3024_v42 = vmul.f32 %v8155_v40, %v11255_v31  ;;  %v2878_v23 = vsel %vm2821_vm3, %v2876_v43, %v2877_v11  ;;  %v8472_v33 = vpop.permute.xlu1 %3198  ;;  %v11259_v43 = vld [vmem:[#allocation166_spill] sm:$0xff]  ;;  %p5973_p4 = pneg %p5972_p13 }
 0x3b5   : > { %v2886_v38 = vrot.slane %v2736_v16, 1  ;;  %v2739_v17 = vmul.f32 %v8167_v60, %v11221_v50  ;;  %v2740_v24 = vmul.f32 %v8167_v60, %v11256_v28  ;;  %v8466_v37 = vrot.slane %v4361_v36, %v10875_v54  ;;  %11258 = vst [vmem:[#allocation148_spill] sm:$0xff] %v8472_v33  ;;  %v11260_v28 = vld [vmem:[#allocation175_spill] sm:$0xff] }
 0x3b6   : > { %v8469_v26 = vrot.slane %v4359_v15, %v10875_v54  ;;  %v4358_v49 = vrot.slane %v4330_v53, %v8338_v20  ;;  %v2882_v16 = vrot.slane %v2733_v5, 1  ;;  %v2883_v63 = vrot.slane %v2734_v27, 1  ;;  %v11261_v5 = vld [vmem:[#allocation85_spill] sm:$0xff]  ;;  %p5980_p10 = pnand %p5979_p8, %p5973_p4 }
 0x3b7   : > { %4556 = vperm.xlu0 %5932, %v8444_v55   ;;  %4396 = vperm.xlu1 %5931, %v8444_v55   ;;  %11257 = vst [vmem:[#allocation130_spill] sm:$0xff] %v8466_v37  ;;  %v2737_v14 = vmul.f32 %v8167_v60, %v11216_v57  ;;  %v2738_v11 = vmul.f32 %v8167_v60, %v11259_v43  ;;  %v2891_v43 = vrot.slane %v2739_v17, 1 }
 0x3b8   : > { %v8479_v7 = vadd.f32 %v8390_v12, %v2964_v6  ;;  %v2969_v36 = vadd.f32 %v2881_v32, %v8063_v44  ;;  %v2743_v15 = vmul.f32 %v8173_v4, %v11228_v0  ;;  %v2744_v53 = vmul.f32 %v8173_v4, %v11260_v28  ;;  %v11263_v28 = vld [vmem:[#allocation31_spill] sm:$0xff] }
 0x3b9   : > { %v8486_v50 = vadd.f32 %v3022_v22, %v2967_v21  ;;  %v2968_v27 = vadd.f32 %v2878_v23, %v8066_v19  ;;  %v3023_v57 = vmul.f32 %v8155_v40, %v11261_v5  ;;  %v2887_v60 = vsel %vm2821_vm3, %v2885_v35, %v2886_v38  ;;  %v11265_v0 = vld [vmem:[#allocation119_spill] sm:$0xff] }
 0x3ba   : > { %v2892_v12 = vrot.slane %v2740_v24, 1  ;;  %v8495_v44 = vrot.slane %v4358_v49, %v10875_v54  ;;  %v4362_v6 = vcombine.high %v4358_v49, %v4358_v49  ;;  %v8497_v32 = vadd.f32 %v3021_v61, %v2966_v25  ;;  %v11266_v5 = vld [vmem:[#allocation47_spill] sm:$0xff]  ;;  %v11267_v61 = vld [vmem:[#allocation58_spill] sm:$0xff] }
 0x3bb   : > { %4568 = vperm.xlu0 %5932, %v8466_v37   ;;  %4404 = vperm.xlu1 %5931, %v8469_v26   ;;  %v2884_v22 = vsel %vm2821_vm3, %v2882_v16, %v2883_v63  ;;  %v2888_v19 = vrot.slane %v2737_v14, 1  ;;  %v2889_v21 = vrot.slane %v2738_v11, 1  ;;  %v8500_v23 = vadd.f32 %v3024_v42, %v2969_v36  ;;  %v8513_v16 = vpop.permute.xlu1 %3202  ;;  %v11269_v42 = vld [vmem:[#allocation137_spill] sm:$0xff] }
 0x3bc   : > { %11262 = vst [vmem:[#allocation131_spill] sm:$0xff] %v8495_v44  ;;  %v3026_v38 = vmul.f32 %v8155_v40, %v11263_v28  ;;  %v2897_v35 = vrot.slane %v2743_v15, 1  ;;  %v2898_v17 = vrot.slane %v2744_v53, 1  ;;  %v8504_v24 = vadd.f32 %v3023_v57, %v2968_v27  ;;  %11268 = vst [vmem:[#allocation132_spill] sm:$0xff] %v8513_v16  ;;  %v11270_v11 = vld [vmem:[#allocation57_spill] sm:$0xff]  ;;  %v11271_v15 = vld [vmem:[#allocation170_spill] sm:$0xff] }
 0x3bd   : > { %v2971_v10 = vadd.f32 %v2887_v60, %v11265_v0  ;;  %v3025_v49 = vmul.f32 %v8155_v40, %v11266_v5  ;;  %v8511_v25 = vmul.f32 %v8155_v40, %v11267_v61  ;;  %v2970_v63 = vadd.f32 %v2884_v22, %v11269_v42  ;;  %v11272_v60 = vld [vmem:[#allocation181_spill] sm:$0xff]  ;;  %v11273_v22 = vld [vmem:[#allocation171_spill] sm:$0xff]  ;;  %v11274_v42 = vld [vmem:[#allocation182_spill] sm:$0xff] }
 0x3be   : > { %11264 = vst [vmem:[#allocation149_spill] sm:$0xff] %v8504_v24  ;;  %v2893_v14 = vsel %vm2821_vm3, %v2891_v43, %v2892_v12  ;;  %v8520_v57 = vrot.slane %v4362_v6, %v10875_v54  ;;  %v2890_v0 = vsel %vm2821_vm3, %v2888_v19, %v2889_v21  ;;  %v2741_v36 = vmul.f32 %v8173_v4, %v11270_v11 }
 0x3bf   : > { %4576 = vperm.xlu0 %5932, %v8495_v44   ;;  %4408 = vperm.xlu1 %5931, %v8466_v37   ;;  %v2742_v53 = vmul.f32 %v8173_v4, %v11271_v15  ;;  %v2747_v27 = vmul.f32 %v8173_v4, %v11234_v56  ;;  %v2899_v43 = vsel %vm2821_vm3, %v2897_v35, %v2898_v17  ;;  %v11275_v56 = vld [vmem:[#allocation179_spill] sm:$0xff] }
 0x3c0   : > { %v2748_v12 = vmul.f32 %v8173_v4, %v11272_v60  ;;  %v2745_v6 = vmul.f32 %v8173_v4, %v11227_v62  ;;  %v2746_v19 = vmul.f32 %v8173_v4, %v11273_v22  ;;  %v2751_v21 = vmul.f32 %v8173_v4, %v11243_v47  ;;  %v11276_v60 = vld [vmem:[#allocation192_spill] sm:$0xff]  ;;  %v11278_v47 = vld [vmem:[#allocation183_spill] sm:$0xff] }
 0x3c1   : > { %v2752_v11 = vmul.f32 %v8173_v4, %v11274_v42  ;;  %v2749_v15 = vmul.f32 %v8173_v4, %v11233_v30  ;;  %v2750_v35 = vmul.f32 %v8173_v4, %v11275_v56  ;;  %v2755_v17 = vmul.f32 %v8173_v4, %v11248_v45  ;;  %v8552_v42 = vpop.permute.xlu1 %3206 }
 0x3c2   : > { %v2756_v62 = vmul.f32 %v8173_v4, %v11276_v60  ;;  %v2753_v22 = vmul.f32 %v8173_v4, %v11242_v41  ;;  %11277 = vst [vmem:[#allocation150_spill] sm:$0xff] %v8552_v42  ;;  %v2754_v30 = vmul.f32 %v8173_v4, %v11278_v47  ;;  %v8558_v56 = vrot.slane %v8420_v8, %v10875_v54 }
 0x3c3   : > { %4584 = vperm.xlu0 %5932, %v8520_v57   ;;  %4416 = vperm.xlu1 %5931, %v8495_v44   ;;  %v4344_v45 = vrot.slane %v8412_v46, %v8338_v20  ;;  %v2894_v60 = vrot.slane %v2741_v36, 1  ;;  %v2895_v61 = vrot.slane %v2742_v53, 1  ;;  %v2903_v5 = vrot.slane %v2747_v27, 1  ;;  %v11279_v27 = vld [vmem:[#allocation120_spill] sm:$0xff] }
 0x3c4   : > { %v2904_v41 = vrot.slane %v2748_v12, 1  ;;  %v2900_v28 = vrot.slane %v2745_v6, 1  ;;  %v2901_v31 = vrot.slane %v2746_v19, 1  ;;  %v2909_v16 = vrot.slane %v2751_v21, 1  ;;  %v11281_v19 = vld [vmem:[#allocation138_spill] sm:$0xff] }
 0x3c5   : > { %v2910_v44 = vrot.slane %v2752_v11, 1  ;;  %v2906_v33 = vrot.slane %v2749_v15, 1  ;;  %v2907_v42 = vrot.slane %v2750_v35, 1  ;;  %v2915_v37 = vrot.slane %v2755_v17, 1  ;;  %v11282_v11 = vld [vmem:[#allocation121_spill] sm:$0xff] }
 0x3c6   : > { %v2916_v24 = vrot.slane %v2756_v62, 1  ;;  %v10689_v4 = vmov 2   ;;  %v2912_v8 = vrot.slane %v2753_v22, 1  ;;  %v2913_v47 = vrot.slane %v2754_v30, 1  ;;  %v11280_v62 = vld [vmem:[#allocation37_spill] sm:$0xff]  ;;  %v11283_v30 = vld [vmem:[#allocation90_spill] sm:$0xff] }
 0x3c7   : > { %5935 = vset.pattern.permute.xlu0 %v10689_v4  ;;  %4424 = vperm.xlu1 %5931, %v8520_v57   ;;  %v8566_v46 = vrot.slane %v4344_v45, %v10875_v54  ;;  %v4360_v20 = vcombine.high %v4344_v45, %v4344_v45  ;;  %v8568_v36 = vadd.f32 %v3026_v38, %v2971_v10  ;;  %v11284_v15 = vld [vmem:[#allocation125_spill] sm:$0xff]  ;;  %v8580_v4 = vpop.permute.xlu1 %3210 }
 0x3c8   : > { %4720 = vperm.xlu0 %5935, %v8558_v56   ;;  %v8570_v53 = vadd.f32 %v3025_v49, %v2970_v63  ;;  %v2973_v12 = vadd.f32 %v2893_v14, %v11279_v27  ;;  %v3027_v6 = vmul.f32 %v8155_v40, %v11280_v62  ;;  %v2972_v21 = vadd.f32 %v2890_v0, %v11281_v19  ;;  %v11293_v19 = vld [vmem:[#allocation124_spill] sm:$0xff] }
 0x3c9   : > { %v2975_v22 = vadd.f32 %v2899_v43, %v11282_v11  ;;  %v3030_v35 = vmul.f32 %v11284_v15, %v11283_v30  ;;  %v2896_v17 = vsel %vm2821_vm3, %v2894_v60, %v2895_v61  ;;  %v2905_v10 = vsel %vm2821_vm3, %v2903_v5, %v2904_v41  ;;  %v11287_v5 = vld [vmem:[#allocation89_spill] sm:$0xff]  ;;  %v11291_v43 = vld [vmem:[#allocation123_spill] sm:$0xff] }
 0x3ca   : > { %v2902_v45 = vsel %vm2821_vm3, %v2900_v28, %v2901_v31  ;;  %v2911_v38 = vsel %vm2821_vm3, %v2909_v16, %v2910_v44  ;;  %v2908_v49 = vsel %vm2821_vm3, %v2906_v33, %v2907_v42  ;;  %v11285_v40 = vmov 1   ;;  %v11286_v31 = vld [vmem:[#allocation139_spill] sm:$0xff]  ;;  %v11288_v44 = vld [vmem:[#allocation92_spill] sm:$0xff]  ;;  %v11292_v42 = vld [vmem:[#allocation134_spill] sm:$0xff] }
 0x3cb   : > { %5933 = vset.pattern.permute.xlu1 %v11285_v40  ;;  %v2917_v63 = vsel %vm2821_vm3, %v2915_v37, %v2916_v24  ;;  %v2914_v14 = vsel %vm2821_vm3, %v2912_v8, %v2913_v47  ;;  %v8592_v61 = vrot.slane %v4360_v20, %v10875_v54  ;;  %v3060_v41 = vadd.f32 %v8511_v25, %v2973_v12  ;;  %v11289_v37 = vld [vmem:[#allocation122_spill] sm:$0xff]  ;;  %v11290_v47 = vld [vmem:[#allocation140_spill] sm:$0xff] }
 0x3cc   : > { %4732 = vperm.xlu0 %5935, %v8566_v46   ;;  %4560 = vperm.xlu1 %5933, %v8558_v56   ;;  %v2974_v28 = vadd.f32 %v2896_v17, %v11286_v31  ;;  %v3029_v33 = vmul.f32 %v11284_v15, %v11287_v5  ;;  %v3032_v16 = vmul.f32 %v11284_v15, %v11288_v44  ;;  %v11294_v12 = vld [vmem:[#allocation142_spill] sm:$0xff]  ;;  %v11295_v17 = vld [vmem:[#allocation91_spill] sm:$0xff]  ;;  %v8610_v5 = vpop.permute.xlu1 %3214 }
 0x3cd   : > { %v2977_v24 = vadd.f32 %v2905_v10, %v11289_v37  ;;  %v2976_v0 = vadd.f32 %v2902_v45, %v11290_v47  ;;  %v2979_v60 = vadd.f32 %v2911_v38, %v11291_v43  ;;  %v2978_v8 = vadd.f32 %v2908_v49, %v11292_v42  ;;  %v11296_v31 = vld [vmem:[#allocation94_spill] sm:$0xff]  ;;  %v11297_v10 = vld [vmem:[#allocation93_spill] sm:$0xff]  ;;  %v11300_v47 = vld [vmem:[#allocation136_spill] sm:$0xff] }
 0x3ce   : > { %v3059_v20 = vadd.f32 %v3027_v6, %v2972_v21  ;;  %v3062_v27 = vadd.f32 %v3030_v35, %v2975_v22  ;;  %v2981_v25 = vadd.f32 %v2917_v63, %v11293_v19  ;;  %v2980_v11 = vadd.f32 %v2914_v14, %v11294_v12  ;;  %v11298_v21 = vld [vmem:[#allocation97_spill] sm:$0xff]  ;;  %v11299_v35 = vld [vmem:[#allocation96_spill] sm:$0xff]  ;;  %v11301_v12 = vld [vmem:[#allocation191_spill] sm:$0xff] }
 0x3cf   : > { %v3031_v40 = vmul.f32 %v11284_v15, %v11295_v17  ;;  %v3034_v44 = vmul.f32 %v11284_v15, %v11296_v31  ;;  %v3033_v45 = vmul.f32 %v11284_v15, %v11297_v10  ;;  %v3061_v6 = vadd.f32 %v3029_v33, %v2974_v28  ;;  %v11302_v28 = vld [vmem:[#allocation152_spill] sm:$0xff] }
 0x3d0   : > { %4740 = vperm.xlu0 %5935, %v8592_v61   ;;  %4564 = vperm.xlu1 %5933, %v8469_v26   ;;  %v3036_v22 = vmul.f32 %v11284_v15, %v11298_v21  ;;  %v3035_v38 = vmul.f32 %v11284_v15, %v11299_v35  ;;  %v3064_v49 = vadd.f32 %v3032_v16, %v2977_v24  ;;  %v11303_v15 = vld [vmem:[#allocation141_spill] sm:$0xff]  ;;  %v11334_v21 = vld [vmem:[#allocation70_spill] sm:$0xff] }
 0x3d1   : > { %v3063_v63 = vadd.f32 %v3031_v40, %v2976_v0  ;;  %v3066_v14 = vadd.f32 %v3034_v44, %v2979_v60  ;;  %v3065_v37 = vadd.f32 %v3033_v45, %v2978_v8  ;;  %v8622_v43 = vadd.f32 %v11300_v47, %v8208_v9  ;;  %v11304_v44 = vld [vmem:[#allocation153_spill] sm:$0xff]  ;;  %v11305_v0 = vld [vmem:[#allocation127_spill] sm:$0xff]  ;;  %v11310_v45 = vld [vmem:[#allocation144_spill] sm:$0xff] }
 0x3d2   : > { %v3068_v42 = vadd.f32 %v3036_v22, %v2981_v25  ;;  %v3067_v19 = vadd.f32 %v3035_v38, %v2980_v11  ;;  %v8626_v10 = vrot.slane %v11301_v12, %v10875_v54  ;;  %v8630_v33 = vadd.f32 %v11302_v28, %v8225_v34  ;;  %v11306_v60 = vld [vmem:[#allocation143_spill] sm:$0xff]  ;;  %v11307_v34 = vld [vmem:[#allocation154_spill] sm:$0xff]  ;;  %v11311_v38 = vld [vmem:[#allocation156_spill] sm:$0xff] }
 0x3d3   : > { %v8634_v16 = vadd.f32 %v11303_v15, %v8233_v3  ;;  %v8638_v24 = vadd.f32 %v11304_v44, %v8241_v59  ;;  %v10690_v9 = vmov 3   ;;  %v8644_v8 = vadd.f32 %v11306_v60, %v11305_v0  ;;  %v11308_v3 = vld [vmem:[#allocation126_spill] sm:$0xff]  ;;  %v11309_v59 = vld [vmem:[#allocation155_spill] sm:$0xff]  ;;  %v11313_v28 = vld [vmem:[#allocation157_spill] sm:$0xff] }
 0x3d4   : > { %5936 = vset.pattern.permute.xlu0 %v10690_v9  ;;  %4572 = vperm.xlu1 %5933, %v8566_v46   ;;  %v8648_v25 = vadd.f32 %v11307_v34, %v8288_v29  ;;  %v8652_v11 = vadd.f32 %v11308_v3, %v8290_v13  ;;  %v8656_v40 = vadd.f32 %v11309_v59, %v8313_v39  ;;  %v11312_v13 = vld [vmem:[#allocation128_spill] sm:$0xff]  ;;  %v3219_v39 = vpop.permute.xlu1 %3218  ;;  %v11314_v44 = vld [vmem:[#allocation145_spill] sm:$0xff]  ;;  %v11317_v3 = vld [vmem:[#allocation62_spill] sm:$0xff] }
 0x3d5   : > { %4876 = vperm.xlu0 %5936, %v8444_v55   ;;  %v8661_v22 = vadd.f32 %v11310_v45, %v8332_v58  ;;  %v8665_v47 = vadd.f32 %v11311_v38, %v8347_v18  ;;  %v8669_v29 = vadd.f32 %v8280_v1, %v8355_v51  ;;  %v8673_v15 = vadd.f32 %v11313_v28, %v11312_v13  ;;  %v11315_v58 = vld [vmem:[#allocation16_spill] sm:$0xff]  ;;  %v11316_v18 = vld [vmem:[#allocation146_spill] sm:$0xff]  ;;  %v11319_v45 = vld [vmem:[#allocation35_spill] sm:$0xff] }
 0x3d6   : > { %v8677_v0 = vadd.f32 %v11314_v44, %v8385_v2  ;;  %v8681_v60 = vadd.f32 %v11315_v58, %v8405_v48  ;;  %v8685_v34 = vadd.f32 %v11316_v18, %v8422_v52  ;;  %v3309_v1 = vmul.f32 %v8626_v10, %v11317_v3  ;;  %v11318_v51 = vld [vmem:[#allocation8_spill] sm:$0xff]  ;;  %v11320_v38 = vld [vmem:[#allocation61_spill] sm:$0xff]  ;;  %v11321_v13 = vld [vmem:[#allocation34_spill] sm:$0xff] }
 0x3d7   : > { %v8691_v59 = vadd.f32 %v11318_v51, %v8479_v7  ;;  %v3310_v2 = vmul.f32 %v8626_v10, %v11319_v45  ;;  %v3307_v48 = vmul.f32 %v8626_v10, %v11320_v38  ;;  %v3308_v28 = vmul.f32 %v8626_v10, %v11321_v13  ;;  %v11322_v52 = vld [vmem:[#allocation129_spill] sm:$0xff]  ;;  %v11324_v7 = vld [vmem:[#allocation147_spill] sm:$0xff]  ;;  %v11327_v38 = vld [vmem:[#allocation130_spill] sm:$0xff] }
 0x3d8   : > { %4580 = vperm.xlu1 %5933, %v8592_v61   ;;  %v8702_v44 = vadd.f32 %v11322_v52, %v8486_v50  ;;  %v11323_v58 = vld [vmem:[#allocation17_spill] sm:$0xff]  ;;  %v8710_v3 = vadd.f32 %v11324_v7, %v8500_v23  ;;  %v11328_v13 = vld [vmem:[#allocation148_spill] sm:$0xff]  ;;  %v8729_v23 = vadd.f32 %v11334_v21, %v3059_v20  ;;  %v11336_v7 = vld [vmem:[#allocation150_spill] sm:$0xff]  ;;  %v8738_v17 = vadd.f32 %v8580_v4, %v3064_v49 }
 0x3d9   : > { %v8706_v18 = vadd.f32 %v11323_v58, %v8497_v32  ;;  %v11325_v51 = vld [vmem:[#allocation149_spill] sm:$0xff]  ;;  %4888 = vperm.xlu0 %5936, %v11327_v38   ;;  %v8719_v35 = vadd.f32 %v11328_v13, %v8568_v36  ;;  %v11332_v32 = vld [vmem:[#allocation132_spill] sm:$0xff]  ;;  %v8732_v31 = vadd.f32 %v11336_v7, %v3062_v27  ;;  %v3438_v36 = vrot.slane %v3309_v1, 1  ;;  %v3601_v13 = vpop.permute.xlu1 %3600  ;;  %v11343_v21 = vld [vmem:[#allocation131_spill] sm:$0xff] }
 0x3da   : > { %v11326_v45 = vld [vmem:[#allocation9_spill] sm:$0xff]  ;;  %v8726_v58 = vadd.f32 %v11332_v32, %v3060_v41  ;;  %11335 = vst [vmem:[#allocation24_spill] sm:$0xff] %v8729_v23  ;;  %11340 = vst [vmem:[#allocation160_spill] sm:$0xff] %v8738_v17  ;;  %v3436_v41 = vrot.slane %v3308_v28, 1  ;;  %v11342_v32 = vld [vmem:[#allocation64_spill] sm:$0xff] }
 0x3db   : > { %v8714_v9 = vadd.f32 %v11326_v45, %v11325_v51  ;;  %11329 = vst [vmem:[#allocation133_spill] sm:$0xff] %v8719_v35  ;;  %v11330_v50 = vld [vmem:[#allocation33_spill] sm:$0xff]  ;;  %11337 = vst [vmem:[#allocation118_spill] sm:$0xff] %v8732_v31  ;;  %v11338_v51 = vld [vmem:[#allocation44_spill] sm:$0xff]  ;;  %v11341_v35 = vmov 2   ;;  %v3313_v20 = vmul.f32 %v8626_v10, %v11342_v32  ;;  %v8760_v32 = vadd.f32 %v3219_v39, %v3068_v42 }
 0x3dc   : > { %v8723_v52 = vadd.f32 %v11330_v50, %v8570_v53  ;;  %11333 = vst [vmem:[#allocation105_spill] sm:$0xff] %v8726_v58  ;;  %v8735_v45 = vadd.f32 %v11338_v51, %v3061_v6  ;;  %5934 = vset.pattern.permute.xlu1 %v11341_v35  ;;  %v3439_v53 = vrot.slane %v3310_v2, 1  ;;  %v3435_v50 = vrot.slane %v3307_v48, 1  ;;  %v11344_v27 = vld [vmem:[#allocation195_spill] sm:$0xff]  ;;  %v11346_v49 = vld [vmem:[#allocation18_spill] sm:$0xff]  ;;  %v11368_v31 = vld [vmem:[#allocation101_spill] sm:$0xff] }
 0x3dd   : > { %4896 = vperm.xlu0 %5936, %v11343_v21   ;;  %4716 = vperm.xlu1 %5934, %v8444_v55   ;;  %v3314_v6 = vmul.f32 %v8626_v10, %v11344_v27  ;;  %v11345_v7 = vld [vmem:[#allocation63_spill] sm:$0xff]  ;;  %v3312_v1 = vmul.f32 %v8626_v10, %v11346_v49  ;;  %v8755_v48 = vadd.f32 %v8610_v5, %v3066_v14  ;;  %v11353_v55 = vld [vmem:[#allocation180_spill] sm:$0xff]  ;;  %v11356_v49 = vld [vmem:[#allocation109_spill] sm:$0xff] }
 0x3de   : > { %11331 = vst [vmem:[#allocation151_spill] sm:$0xff] %v8723_v52  ;;  %11339 = vst [vmem:[#allocation110_spill] sm:$0xff] %v8735_v45  ;;  %v3311_v4 = vmul.f32 %v8626_v10, %v11345_v7  ;;  %v11347_v35 = vld [vmem:[#allocation95_spill] sm:$0xff]  ;;  %v8763_v17 = vadd.f32 %v11353_v55, %v3067_v19  ;;  %v8766_v27 = vrot.slane %v3601_v13, %v10875_v54  ;;  %v11358_v55 = vld [vmem:[#allocation30_spill] sm:$0xff] }
 0x3df   : > { %v8752_v2 = vadd.f32 %v11347_v35, %v3063_v63  ;;  %11349 = vst [vmem:[#allocation137_spill] sm:$0xff] %v8755_v48  ;;  %v11350_v28 = vld [vmem:[#allocation167_spill] sm:$0xff]  ;;  %11352 = vst [vmem:[#allocation170_spill] sm:$0xff] %v8760_v32  ;;  %v8772_v63 = vrot.slane %v3601_v13, %v11356_v49  ;;  %v3440_v5 = vsel %vm2821_vm3, %v3438_v36, %v3439_v53  ;;  %v11357_v35 = vld [vmem:[#allocation66_spill] sm:$0xff]  ;;  %v3445_v19 = vrot.slane %v3314_v6, 1 }
 0x3e0   : > { %v8758_v51 = vadd.f32 %v11350_v28, %v3065_v37  ;;  %11354 = vst [vmem:[#allocation120_spill] sm:$0xff] %v8763_v17  ;;  %v11355_v7 = vld [vmem:[#allocation27_spill] sm:$0xff]  ;;  %v3437_v14 = vsel %vm2821_vm3, %v3435_v50, %v3436_v41  ;;  %v3444_v37 = vrot.slane %v3313_v20, 1  ;;  %v3317_v42 = vmul.f32 %v8626_v10, %v11357_v35  ;;  %v11359_v17 = vld [vmem:[#allocation65_spill] sm:$0xff]  ;;  %v11360_v36 = vld [vmem:[#allocation14_spill] sm:$0xff] }
 0x3e1   : > { %11348 = vst [vmem:[#allocation119_spill] sm:$0xff] %v8752_v2  ;;  %v8769_v45 = vrot.slane %v3601_v13, %v11355_v7  ;;  %4904 = vperm.xlu0 %5936, %v8520_v57   ;;  %4724 = vperm.xlu1 %5934, %v8469_v26   ;;  %v3441_v39 = vrot.slane %v3311_v4, 1  ;;  %v3442_v28 = vrot.slane %v3312_v1, 1  ;;  %v3318_v54 = vmul.f32 %v8626_v10, %v11358_v55  ;;  %v11361_v50 = vld [vmem:[#allocation69_spill] sm:$0xff]  ;;  %v11362_v20 = vld [vmem:[#allocation196_spill] sm:$0xff]  ;;  %v11367_v2 = vld [vmem:[#allocation43_spill] sm:$0xff] }
 0x3e2   : > { %11351 = vst [vmem:[#allocation57_spill] sm:$0xff] %v8758_v51  ;;  %v3315_v32 = vmul.f32 %v8626_v10, %v11359_v17  ;;  %v3316_v53 = vmul.f32 %v8626_v10, %v11360_v36  ;;  %v3321_v41 = vmul.f32 %v8626_v10, %v11361_v50  ;;  %v3322_v35 = vmul.f32 %v8626_v10, %v11362_v20  ;;  %v11363_v51 = vld [vmem:[#allocation87_spill] sm:$0xff]  ;;  %v11365_v4 = vld [vmem:[#allocation68_spill] sm:$0xff] }
 0x3e3   : > { %v8791_v48 = vrot.slane %v3601_v13, %v11363_v51  ;;  %v8795_v6 = vrot.slane %v11301_v12, %v11355_v7  ;;  %v3319_v1 = vmul.f32 %v8626_v10, %v11365_v4  ;;  %v11366_v17 = vld [vmem:[#allocation15_spill] sm:$0xff]  ;;  %v3564_v36 = vadd.f32 %v3440_v5, %v8622_v43  ;;  %v8808_v7 = vpop.permute.xlu0 %3771  ;;  %v8811_v4 = vpop.permute.xlu1 %3769  ;;  %v11372_v52 = vld [vmem:[#allocation72_spill] sm:$0xff] }
 0x3e4   : > { %v3320_v55 = vmul.f32 %v8626_v10, %v11366_v17  ;;  %v3619_v50 = vmul.f32 %v8766_v27, %v11367_v2  ;;  %v3563_v20 = vadd.f32 %v3437_v14, %v8630_v33  ;;  %v3618_v13 = vmul.f32 %v8766_v27, %v11368_v31  ;;  %11370 = vst [vmem:[#allocation138_spill] sm:$0xff] %v8808_v7 }
 0x3e5   : > { %11364 = vst [vmem:[#allocation37_spill] sm:$0xff] %v8791_v48  ;;  %v11369_v48 = vmov 0   ;;  %4728 = vperm.xlu1 %5934, %v11327_v38   ;;  %11371 = vst [vmem:[#allocation121_spill] sm:$0xff] %v8811_v4  ;;  %v3446_v10 = vsel %vm2821_vm3, %v3444_v37, %v3445_v19  ;;  %v3443_v43 = vsel %vm2821_vm3, %v3441_v39, %v3442_v28  ;;  %v3450_v5 = vrot.slane %v3317_v42, 1  ;;  %v11373_v38 = vld [vmem:[#allocation32_spill] sm:$0xff]  ;;  %v11375_v19 = vld [vmem:[#allocation102_spill] sm:$0xff] }
 0x3e6   : > { %5938 = vset.pattern.permute.xlu0 %v11369_v48  ;;  %v3451_v17 = vrot.slane %v3318_v54, 1  ;;  %v3447_v33 = vrot.slane %v3315_v32, 1  ;;  %v3448_v14 = vrot.slane %v3316_v53, 1  ;;  %v3456_v2 = vrot.slane %v3321_v41, 1  ;;  %v11374_v32 = vld [vmem:[#allocation103_spill] sm:$0xff] }
 0x3e7   : > { %4400 = vperm.xlu0 %5938, %v8558_v56   ;;  %v3457_v31 = vrot.slane %v3322_v35, 1  ;;  %v3453_v23 = vrot.slane %v3319_v1, 1  ;;  %v3454_v58 = vrot.slane %v3320_v55, 1  ;;  %v3325_v7 = vmul.f32 %v8795_v6, %v11372_v52  ;;  %v8837_v41 = vpop.permute.xlu0 %3775  ;;  %v8840_v35 = vpop.permute.xlu1 %3773 }
 0x3e8   : > { %v3326_v4 = vmul.f32 %v8795_v6, %v11373_v38  ;;  %v8822_v37 = vrot.slane %v11301_v12, %v11356_v49  ;;  %v8826_v54 = vrot.slane %v11301_v12, %v11363_v51  ;;  %v3621_v42 = vmul.f32 %v8766_v27, %v11374_v32  ;;  %11376 = vst [vmem:[#allocation90_spill] sm:$0xff] %v8840_v35  ;;  %v11377_v12 = vld [vmem:[#allocation104_spill] sm:$0xff]  ;;  %v11379_v32 = vld [vmem:[#allocation71_spill] sm:$0xff] }
 0x3e9   : > { %v3620_v39 = vmul.f32 %v8766_v27, %v11375_v19  ;;  %v8832_v28 = vadd.f32 %v3619_v50, %v3564_v36  ;;  %v8834_v52 = vadd.f32 %v3618_v13, %v3563_v20  ;;  %v3566_v53 = vadd.f32 %v3446_v10, %v8634_v16  ;;  %4736 = vperm.xlu1 %5934, %v11343_v21   ;;  %v11378_v20 = vld [vmem:[#allocation45_spill] sm:$0xff]  ;;  %v11380_v19 = vld [vmem:[#allocation39_spill] sm:$0xff] }
 0x3ea   : > { %v3623_v1 = vmul.f32 %v8766_v27, %v11377_v12  ;;  %v3565_v55 = vadd.f32 %v3443_v43, %v8638_v24  ;;  %v3452_v36 = vsel %vm2821_vm3, %v3450_v5, %v3451_v17  ;;  %v3449_v50 = vsel %vm2821_vm3, %v3447_v33, %v3448_v14  ;;  %v11381_v43 = vld [vmem:[#allocation74_spill] sm:$0xff]  ;;  %v11382_v17 = vld [vmem:[#allocation197_spill] sm:$0xff]  ;;  %v11391_v35 = vld [vmem:[#allocation75_spill] sm:$0xff] }
 0x3eb   : > { %4412 = vperm.xlu0 %5938, %v8566_v46   ;;  %v3622_v16 = vmul.f32 %v8766_v27, %v11378_v20  ;;  %v3458_v13 = vsel %vm2821_vm3, %v3456_v2, %v3457_v31  ;;  %v3455_v21 = vsel %vm2821_vm3, %v3453_v23, %v3454_v58  ;;  %v3462_v10 = vrot.slane %v3325_v7, 1  ;;  %v11385_v58 = vld [vmem:[#allocation60_spill] sm:$0xff]  ;;  %v11386_v2 = vld [vmem:[#allocation73_spill] sm:$0xff] }
 0x3ec   : > { %v3463_v38 = vrot.slane %v3326_v4, 1  ;;  %v3323_v12 = vmul.f32 %v8795_v6, %v11379_v32  ;;  %v3324_v24 = vmul.f32 %v8795_v6, %v11380_v19  ;;  %v3329_v5 = vmul.f32 %v8795_v6, %v11381_v43  ;;  %v8862_v20 = vpop.permute.xlu0 %3779  ;;  %v11387_v4 = vld [vmem:[#allocation79_spill] sm:$0xff]  ;;  %v11389_v43 = vld [vmem:[#allocation164_spill] sm:$0xff] }
 0x3ed   : > { %v3330_v33 = vmul.f32 %v8795_v6, %v11382_v17  ;;  %v8860_v14 = vadd.f32 %v3621_v42, %v3566_v53  ;;  %11383 = vst [vmem:[#allocation125_spill] sm:$0xff] %v8862_v20  ;;  %4744 = vperm.xlu1 %5934, %v8520_v57   ;;  %v8865_v31 = vpop.permute.xlu1 %3777  ;;  %v3625_v23 = vmul.f32 %v8766_v27, %v11385_v58  ;;  %v11388_v53 = vld [vmem:[#allocation76_spill] sm:$0xff] }
 0x3ee   : > { %11384 = vst [vmem:[#allocation139_spill] sm:$0xff] %v8865_v31  ;;  %v3327_v7 = vmul.f32 %v8795_v6, %v11386_v2  ;;  %v3328_v32 = vmul.f32 %v8795_v6, %v11387_v4  ;;  %v8873_v19 = vadd.f32 %v3620_v39, %v3565_v55  ;;  %v3568_v42 = vadd.f32 %v3452_v36, %v8644_v8 }
 0x3ef   : > { %4420 = vperm.xlu0 %5938, %v8592_v61   ;;  %v3333_v57 = vmul.f32 %v8795_v6, %v11388_v53  ;;  %v3334_v17 = vmul.f32 %v8795_v6, %v11389_v43  ;;  %v3567_v58 = vadd.f32 %v3449_v50, %v8648_v25  ;;  %v3570_v51 = vadd.f32 %v3458_v13, %v8652_v11  ;;  %v11392_v11 = vld [vmem:[#allocation99_spill] sm:$0xff] }
 0x3f0   : > { %v3569_v2 = vadd.f32 %v3455_v21, %v8656_v40  ;;  %v3464_v4 = vsel %vm2821_vm3, %v3462_v10, %v3463_v38  ;;  %v3459_v39 = vrot.slane %v3323_v12, 1  ;;  %v3460_v55 = vrot.slane %v3324_v24, 1  ;;  %v8885_v36 = vpop.permute.xlu0 %3783  ;;  %v11393_v12 = vld [vmem:[#allocation46_spill] sm:$0xff] }
 0x3f1   : > { %v3468_v49 = vrot.slane %v3329_v5, 1  ;;  %v3469_v8 = vrot.slane %v3330_v33, 1  ;;  %v11390_v31 = vmov 3   ;;  %v8888_v53 = vpop.permute.xlu1 %3781  ;;  %v3465_v20 = vrot.slane %v3327_v7, 1  ;;  %v11394_v5 = vld [vmem:[#allocation107_spill] sm:$0xff] }
 0x3f2   : > { %5937 = vset.pattern.permute.xlu1 %v11390_v31  ;;  %v3466_v43 = vrot.slane %v3328_v32, 1  ;;  %v3331_v25 = vmul.f32 %v8795_v6, %v11391_v35  ;;  %v3332_v40 = vmul.f32 %v8795_v6, %v11392_v11  ;;  %v8894_v50 = vadd.f32 %v3623_v1, %v3568_v42  ;;  %v11395_v35 = vld [vmem:[#allocation106_spill] sm:$0xff]  ;;  %v11396_v32 = vld [vmem:[#allocation49_spill] sm:$0xff] }
 0x3f3   : > { %v3624_v13 = vmul.f32 %v8766_v27, %v11393_v12  ;;  %4880 = vperm.xlu1 %5937, %v8558_v56   ;;  %v3474_v21 = vrot.slane %v3333_v57, 1  ;;  %v3475_v10 = vrot.slane %v3334_v17, 1  ;;  %v8899_v38 = vadd.f32 %v3622_v16, %v3567_v58  ;;  %v11410_v12 = vld [vmem:[#allocation48_spill] sm:$0xff] }
 0x3f4   : > { %v8901_v24 = vadd.f32 %v3625_v23, %v3570_v51  ;;  %v3627_v33 = vmul.f32 %v8769_v45, %v11394_v5  ;;  %v3626_v31 = vmul.f32 %v8769_v45, %v11395_v35  ;;  %v3572_v1 = vadd.f32 %v3464_v4, %v8661_v22  ;;  %v11399_v22 = vld [vmem:[#allocation78_spill] sm:$0xff] }
 0x3f5   : > { %v8907_v7 = vadd.f32 %v3624_v13, %v3569_v2  ;;  %v3461_v27 = vsel %vm2821_vm3, %v3459_v39, %v3460_v55  ;;  %v3629_v56 = vmul.f32 %v8769_v45, %v11396_v32  ;;  %v8913_v42 = vpop.permute.xlu0 %3787  ;;  %v8915_v16 = vpop.permute.xlu1 %3785  ;;  %v3470_v51 = vsel %vm2821_vm3, %v3468_v49, %v3469_v8  ;;  %v11400_v4 = vld [vmem:[#allocation198_spill] sm:$0xff]  ;;  %v11401_v55 = vld [vmem:[#allocation77_spill] sm:$0xff]  ;;  %v11402_v13 = vld [vmem:[#allocation159_spill] sm:$0xff] }
 0x3f6   : > { %11397 = vst [vmem:[#allocation122_spill] sm:$0xff] %v8913_v42  ;;  %11398 = vst [vmem:[#allocation140_spill] sm:$0xff] %v8915_v16  ;;  %v3467_v58 = vsel %vm2821_vm3, %v3465_v20, %v3466_v43  ;;  %v3471_v23 = vrot.slane %v3331_v25, 1  ;;  %v3472_v57 = vrot.slane %v3332_v40, 1  ;;  %v3476_v17 = vsel %vm2821_vm3, %v3474_v21, %v3475_v10  ;;  %v11403_v8 = vld [vmem:[#allocation83_spill] sm:$0xff]  ;;  %v11404_v43 = vld [vmem:[#allocation172_spill] sm:$0xff] }
 0x3f7   : > { %4884 = vperm.xlu1 %5937, %v8469_v26   ;;  %v3337_v2 = vmul.f32 %v8795_v6, %v11399_v22  ;;  %v3338_v39 = vmul.f32 %v8795_v6, %v11400_v4  ;;  %v3335_v11 = vmul.f32 %v8795_v6, %v11401_v55  ;;  %v3336_v49 = vmul.f32 %v8795_v6, %v11402_v13  ;;  %v11405_v25 = vld [vmem:[#allocation82_spill] sm:$0xff]  ;;  %v11406_v10 = vld [vmem:[#allocation169_spill] sm:$0xff]  ;;  %v11408_v32 = vld [vmem:[#allocation199_spill] sm:$0xff] }
 0x3f8   : > { %v3341_v20 = vmul.f32 %v8822_v37, %v11403_v8  ;;  %v3342_v26 = vmul.f32 %v8822_v37, %v11404_v43  ;;  %v3339_v40 = vmul.f32 %v8822_v37, %v11405_v25  ;;  %v3571_v21 = vadd.f32 %v3461_v27, %v8665_v47  ;;  %v11407_v4 = vld [vmem:[#allocation86_spill] sm:$0xff]  ;;  %v11412_v42 = vld [vmem:[#allocation85_spill] sm:$0xff] }
 0x3f9   : > { %v3340_v22 = vmul.f32 %v8822_v37, %v11406_v10  ;;  %v3345_v55 = vmul.f32 %v8822_v37, %v11407_v4  ;;  %v3346_v6 = vmul.f32 %v8822_v37, %v11408_v32  ;;  %v3574_v13 = vadd.f32 %v3470_v51, %v8669_v29  ;;  %v8943_v8 = vpop.permute.xlu0 %3791  ;;  %v8948_v35 = vpop.permute.xlu1 %3789 }
 0x3fa   : > { %11409 = vst [vmem:[#allocation123_spill] sm:$0xff] %v8943_v8  ;;  %v3573_v43 = vadd.f32 %v3467_v58, %v8673_v15  ;;  %v3628_v25 = vmul.f32 %v8769_v45, %v11410_v12  ;;  %11411 = vst [vmem:[#allocation134_spill] sm:$0xff] %v8948_v35  ;;  %v3576_v47 = vadd.f32 %v3476_v17, %v8677_v0  ;;  %v3480_v10 = vrot.slane %v3337_v2, 1  ;;  %v11414_v2 = vld [vmem:[#allocation173_spill] sm:$0xff] }
 0x3fb   : > { %4892 = vperm.xlu1 %5937, %v8566_v46   ;;  %v3473_v27 = vsel %vm2821_vm3, %v3471_v23, %v3472_v57  ;;  %v3481_v4 = vrot.slane %v3338_v39, 1  ;;  %v3477_v32 = vrot.slane %v3335_v11, 1  ;;  %v3478_v5 = vrot.slane %v3336_v49, 1  ;;  %v11413_v46 = vld [vmem:[#allocation51_spill] sm:$0xff] }
 0x3fc   : > { %v3486_v29 = vrot.slane %v3341_v20, 1  ;;  %v3487_v51 = vrot.slane %v3342_v26, 1  ;;  %v3483_v8 = vrot.slane %v3339_v40, 1  ;;  %v3484_v16 = vrot.slane %v3340_v22, 1  ;;  %v11415_v20 = vld [vmem:[#allocation50_spill] sm:$0xff] }
 0x3fd   : > { %v3492_v15 = vrot.slane %v3345_v55, 1  ;;  %v3493_v58 = vrot.slane %v3346_v6, 1  ;;  %v3343_v12 = vmul.f32 %v8822_v37, %v11412_v42  ;;  %v8955_v35 = vadd.f32 %v3627_v33, %v3572_v1  ;;  %v8961_v57 = vpop.permute.xlu0 %3795  ;;  %v8963_v17 = vpop.permute.xlu1 %3793 }
 0x3fe   : > { %v8957_v0 = vadd.f32 %v3626_v31, %v3571_v21  ;;  %v3631_v23 = vmul.f32 %v8769_v45, %v11413_v46  ;;  %v3344_v39 = vmul.f32 %v8822_v37, %v11414_v2  ;;  %v8967_v11 = vadd.f32 %v3629_v56, %v3574_v13  ;;  %v11416_v31 = vld [vmem:[#allocation21_spill] sm:$0xff]  ;;  %v11425_v2 = vld [vmem:[#allocation80_spill] sm:$0xff] }
 0x3ff   : > { %v8969_v49 = vadd.f32 %v3628_v25, %v3573_v43  ;;  %v3630_v33 = vmul.f32 %v8769_v45, %v11415_v20  ;;  %4900 = vperm.xlu1 %5937, %v8592_v61   ;;  %v3633_v1 = vmul.f32 %v8769_v45, %v11416_v31  ;;  %v3575_v26 = vadd.f32 %v3473_v27, %v8681_v60  ;;  %v11418_v25 = vld [vmem:[#allocation31_spill] sm:$0xff]  ;;  %v11419_v60 = vld [vmem:[#allocation177_spill] sm:$0xff] }
 0x400   : > { %v8976_v42 = vadd.f32 %v3631_v23, %v3576_v47  ;;  %v3482_v40 = vsel %vm2821_vm3, %v3480_v10, %v3481_v4  ;;  %v3479_v21 = vsel %vm2821_vm3, %v3477_v32, %v3478_v5  ;;  %v3488_v56 = vsel %vm2821_vm3, %v3486_v29, %v3487_v51  ;;  %v11420_v10 = vld [vmem:[#allocation47_spill] sm:$0xff]  ;;  %v11421_v4 = vld [vmem:[#allocation108_spill] sm:$0xff]  ;;  %v11423_v32 = vld [vmem:[#allocation58_spill] sm:$0xff] }
 0x401   : > { %v3485_v22 = vsel %vm2821_vm3, %v3483_v8, %v3484_v16  ;;  %v3494_v55 = vsel %vm2821_vm3, %v3492_v15, %v3493_v58  ;;  %v3489_v6 = vrot.slane %v3343_v12, 1  ;;  %v8984_v13 = vpop.permute.xlu0 %3799  ;;  %v8986_v61 = vpop.permute.xlu1 %3797  ;;  %v3490_v43 = vrot.slane %v3344_v39, 1  ;;  %v11422_v8 = vld [vmem:[#allocation174_spill] sm:$0xff]  ;;  %v11424_v51 = vld [vmem:[#allocation200_spill] sm:$0xff] }
 0x402   : > { %11417 = vst [vmem:[#allocation124_spill] sm:$0xff] %v8986_v61  ;;  %v3349_v47 = vmul.f32 %v8822_v37, %v11418_v25  ;;  %v3350_v27 = vmul.f32 %v8822_v37, %v11419_v60  ;;  %v3347_v5 = vmul.f32 %v8822_v37, %v11420_v10  ;;  %v3632_v16 = vmul.f32 %v8769_v45, %v11421_v4  ;;  %v11426_v25 = vld [vmem:[#allocation52_spill] sm:$0xff] }
 0x403   : > { %v3348_v12 = vmul.f32 %v8822_v37, %v11422_v8  ;;  %v3353_v29 = vmul.f32 %v8822_v37, %v11423_v32  ;;  %v3354_v15 = vmul.f32 %v8822_v37, %v11424_v51  ;;  %5939 = vset.pattern.permute.xlu1 %v11369_v48  ;;  %v9003_v58 = vadd.f32 %v3630_v33, %v3575_v26 }
 0x404   : > { %v3578_v23 = vadd.f32 %v3482_v40, %v8685_v34  ;;  %v3635_v39 = vmul.f32 %v8772_v63, %v11425_v2  ;;  %v3634_v45 = vmul.f32 %v8772_v63, %v11426_v25  ;;  %v3577_v60 = vadd.f32 %v3479_v21, %v8691_v59  ;;  %v11430_v21 = vld [vmem:[#allocation178_spill] sm:$0xff]  ;;  %v11454_v25 = vld [vmem:[#allocation96_spill] sm:$0xff] }
 0x405   : > { %v3580_v10 = vadd.f32 %v3488_v56, %v8702_v44  ;;  %v3579_v8 = vadd.f32 %v3485_v22, %v8706_v18  ;;  %v3582_v32 = vadd.f32 %v3494_v55, %v8710_v3  ;;  %v9014_v51 = vpop.permute.xlu0 %3803  ;;  %v9016_v48 = vpop.permute.xlu1 %3801  ;;  %v3491_v34 = vsel %vm2821_vm3, %v3489_v6, %v3490_v43  ;;  %v11429_v18 = vld [vmem:[#allocation81_spill] sm:$0xff] }
 0x406   : > { %11427 = vst [vmem:[#allocation142_spill] sm:$0xff] %v9014_v51  ;;  %11428 = vst [vmem:[#allocation136_spill] sm:$0xff] %v9016_v48  ;;  %v3498_v33 = vrot.slane %v3349_v47, 1  ;;  %v3499_v26 = vrot.slane %v3350_v27, 1  ;;  %v3495_v40 = vrot.slane %v3347_v5, 1  ;;  %v3496_v31 = vrot.slane %v3348_v12, 1 }
 0x407   : > { %v3504_v46 = vrot.slane %v3353_v29, 1  ;;  %v3505_v4 = vrot.slane %v3354_v15, 1  ;;  %v3351_v59 = vmul.f32 %v8822_v37, %v11280_v62  ;;  %v9021_v44 = vadd.f32 %v3633_v1, %v3578_v23  ;;  %v11434_v47 = vld [vmem:[#allocation54_spill] sm:$0xff] }
 0x408   : > { %v3637_v3 = vmul.f32 %v8772_v63, %v11429_v18  ;;  %v3352_v56 = vmul.f32 %v8822_v37, %v11430_v21  ;;  %v3357_v22 = vmul.f32 %v8826_v54, %v11283_v30  ;;  %v9029_v55 = vadd.f32 %v3632_v16, %v3577_v60  ;;  %v11438_v30 = vld [vmem:[#allocation84_spill] sm:$0xff] }
 0x409   : > { %v9031_v6 = vadd.f32 %v3635_v39, %v3580_v10  ;;  %v9033_v43 = vadd.f32 %v3634_v45, %v3579_v8  ;;  %v3636_v62 = vmul.f32 %v8772_v63, %v11434_v47  ;;  %v9039_v27 = vpop.permute.xlu0 %3807  ;;  %v3581_v5 = vadd.f32 %v3491_v34, %v8714_v9  ;;  %v9042_v12 = vpop.permute.xlu1 %3805  ;;  %v11439_v39 = vld [vmem:[#allocation186_spill] sm:$0xff]  ;;  %v11440_v8 = vld [vmem:[#allocation89_spill] sm:$0xff] }
 0x40a   : > { %11431 = vst [vmem:[#allocation191_spill] sm:$0xff] %v9029_v55  ;;  %v9037_v1 = vadd.f32 %v3637_v3, %v3582_v32  ;;  %11436 = vst [vmem:[#allocation127_spill] sm:$0xff] %v9039_v27  ;;  %v3500_v37 = vsel %vm2821_vm3, %v3498_v33, %v3499_v26  ;;  %v3639_v16 = vmul.f32 %v8772_v63, %v11438_v30  ;;  %v3501_v23 = vrot.slane %v3351_v59, 1  ;;  %v11441_v32 = vld [vmem:[#allocation184_spill] sm:$0xff]  ;;  %v11443_v3 = vld [vmem:[#allocation135_spill] sm:$0xff] }
 0x40b   : > { %11432 = vst [vmem:[#allocation152_spill] sm:$0xff] %v9031_v6  ;;  %11433 = vst [vmem:[#allocation141_spill] sm:$0xff] %v9033_v43  ;;  %v3497_v29 = vsel %vm2821_vm3, %v3495_v40, %v3496_v31  ;;  %v3506_v15 = vsel %vm2821_vm3, %v3504_v46, %v3505_v4  ;;  %v3358_v45 = vmul.f32 %v8826_v54, %v11439_v39  ;;  %v3502_v60 = vrot.slane %v3352_v56, 1  ;;  %v11442_v33 = vld [vmem:[#allocation92_spill] sm:$0xff]  ;;  %v11444_v40 = vld [vmem:[#allocation91_spill] sm:$0xff] }
 0x40c   : > { %11435 = vst [vmem:[#allocation153_spill] sm:$0xff] %v9037_v1  ;;  %11437 = vst [vmem:[#allocation143_spill] sm:$0xff] %v9042_v12  ;;  %v3510_v10 = vrot.slane %v3357_v22, 1  ;;  %v3355_v9 = vmul.f32 %v8826_v54, %v11440_v8  ;;  %v3356_v34 = vmul.f32 %v8826_v54, %v11441_v32  ;;  %v3361_v26 = vmul.f32 %v8826_v54, %v11442_v33  ;;  %v11445_v4 = vld [vmem:[#allocation185_spill] sm:$0xff]  ;;  %v11448_v22 = vld [vmem:[#allocation94_spill] sm:$0xff] }
 0x40d   : > { %v3362_v31 = vmul.f32 %v8826_v54, %v11443_v3  ;;  %v3359_v46 = vmul.f32 %v8826_v54, %v11444_v40  ;;  %v3360_v59 = vmul.f32 %v8826_v54, %v11445_v4  ;;  %v9063_v21 = vpop.permute.xlu0 %3811  ;;  %v9065_v56 = vpop.permute.xlu1 %3809  ;;  %v3365_v39 = vmul.f32 %v8826_v54, %v11448_v22  ;;  %v11449_v8 = vld [vmem:[#allocation193_spill] sm:$0xff] }
 0x40e   : > { %11446 = vst [vmem:[#allocation154_spill] sm:$0xff] %v9063_v21  ;;  %11447 = vst [vmem:[#allocation126_spill] sm:$0xff] %v9065_v56  ;;  %v3366_v32 = vmul.f32 %v8826_v54, %v11449_v8  ;;  %v11450_v33 = vld [vmem:[#allocation93_spill] sm:$0xff]  ;;  %v3367_v2 = vmul.f32 %v8826_v54, %v11454_v25  ;;  %v11455_v56 = vld [vmem:[#allocation194_spill] sm:$0xff]  ;;  %v3503_v8 = vsel %vm2821_vm3, %v3501_v23, %v3502_v60  ;;  %v3511_v21 = vrot.slane %v3358_v45, 1 }
 0x40f   : > { %v3363_v30 = vmul.f32 %v8826_v54, %v11450_v33  ;;  %v11451_v3 = vld [vmem:[#allocation189_spill] sm:$0xff]  ;;  %v3368_v22 = vmul.f32 %v8826_v54, %v11455_v56  ;;  %v3507_v12 = vrot.slane %v3355_v9, 1  ;;  %v3508_v33 = vrot.slane %v3356_v34, 1  ;;  %v11458_v60 = vld [vmem:[#allocation151_spill] sm:$0xff] }
 0x410   : > { %v3364_v18 = vmul.f32 %v8826_v54, %v11451_v3  ;;  %v11452_v40 = vld [vmem:[#allocation97_spill] sm:$0xff]  ;;  %v3516_v27 = vrot.slane %v3361_v26, 1  ;;  %v3517_v1 = vrot.slane %v3362_v31, 1  ;;  %v3513_v3 = vrot.slane %v3359_v46, 1  ;;  %v11459_v34 = vld [vmem:[#allocation55_spill] sm:$0xff] }
 0x411   : > { %v3369_v47 = vmul.f32 %v8826_v54, %v11452_v40  ;;  %v11453_v4 = vld [vmem:[#allocation201_spill] sm:$0xff]  ;;  %v3514_v48 = vrot.slane %v3360_v59, 1  ;;  %v9084_v43 = vpop.permute.xlu0 %3815  ;;  %v9086_v40 = vpop.permute.xlu1 %3813  ;;  %v3523_v51 = vrot.slane %v3366_v32, 1  ;;  %v3519_v6 = vrot.slane %v3363_v30, 1  ;;  %v11462_v30 = vld [vmem:[#allocation24_spill] sm:$0xff] }
 0x412   : > { %v3370_v20 = vmul.f32 %v8826_v54, %v11453_v4  ;;  %11456 = vst [vmem:[#allocation155_spill] sm:$0xff] %v9086_v40  ;;  %v3522_v4 = vrot.slane %v3365_v39, 1  ;;  %v3520_v25 = vrot.slane %v3364_v18, 1  ;;  %v3525_v54 = vrot.slane %v3367_v2, 1  ;;  %v11457_v23 = vld [vmem:[#allocation133_spill] sm:$0xff] }
 0x413   : > { %v3528_v61 = vrot.slane %v3369_v47, 1  ;;  %v3526_v56 = vrot.slane %v3368_v22, 1  ;;  %v3584_v45 = vadd.f32 %v3500_v37, %v11457_v23  ;;  %v3583_v9 = vadd.f32 %v3497_v29, %v11458_v60  ;;  %v11460_v31 = vld [vmem:[#allocation105_spill] sm:$0xff]  ;;  %v11463_v47 = vld [vmem:[#allocation56_spill] sm:$0xff]  ;;  %v11464_v60 = vld [vmem:[#allocation111_spill] sm:$0xff] }
 0x414   : > { %v3529_v55 = vrot.slane %v3370_v20, 1  ;;  %v3638_v26 = vmul.f32 %v8772_v63, %v11459_v34  ;;  %v3586_v46 = vadd.f32 %v3506_v15, %v11460_v31  ;;  %v9093_v59 = vadd.f32 %v3636_v62, %v3581_v5  ;;  %v11461_v40 = vld [vmem:[#allocation13_spill] sm:$0xff] }
 0x415   : > { %v3641_v39 = vmul.f32 %v8772_v63, %v11461_v40  ;;  %v3585_v18 = vadd.f32 %v3503_v8, %v11462_v30  ;;  %v3640_v20 = vmul.f32 %v8772_v63, %v11463_v47  ;;  %v3512_v2 = vsel %vm2821_vm3, %v3510_v10, %v3511_v21  ;;  %v9101_v37 = vpop.permute.xlu0 %3819  ;;  %v9104_v32 = vpop.permute.xlu1 %3817  ;;  %v11465_v31 = vld [vmem:[#allocation37_spill] sm:$0xff]  ;;  %v11467_v40 = vld [vmem:[#allocation110_spill] sm:$0xff] }
 0x416   : > { %v3509_v29 = vsel %vm2821_vm3, %v3507_v12, %v3508_v33  ;;  %v3518_v15 = vsel %vm2821_vm3, %v3516_v27, %v3517_v1  ;;  %v3515_v62 = vsel %vm2821_vm3, %v3513_v3, %v3514_v48  ;;  %v3524_v5 = vsel %vm2821_vm3, %v3522_v4, %v3523_v51  ;;  %v11466_v33 = vld [vmem:[#allocation118_spill] sm:$0xff]  ;;  %v11468_v27 = vld [vmem:[#allocation160_spill] sm:$0xff]  ;;  %v11469_v3 = vld [vmem:[#allocation119_spill] sm:$0xff] }
 0x417   : > { %v3521_v22 = vsel %vm2821_vm3, %v3519_v6, %v3520_v25  ;;  %v3530_v8 = vsel %vm2821_vm3, %v3528_v61, %v3529_v55  ;;  %v3527_v63 = vsel %vm2821_vm3, %v3525_v54, %v3526_v56  ;;  %v3671_v23 = vadd.f32 %v3639_v16, %v3584_v45  ;;  %v11470_v25 = vld [vmem:[#allocation137_spill] sm:$0xff]  ;;  %v11472_v16 = vld [vmem:[#allocation170_spill] sm:$0xff]  ;;  %v11473_v45 = vld [vmem:[#allocation120_spill] sm:$0xff] }
 0x418   : > { %v3670_v10 = vadd.f32 %v3638_v26, %v3583_v9  ;;  %v3673_v21 = vadd.f32 %v3641_v39, %v3586_v46  ;;  %v3643_v12 = vmul.f32 %v11465_v31, %v11464_v60  ;;  %v3588_v30 = vadd.f32 %v3512_v2, %v11466_v33  ;;  %v11471_v55 = vld [vmem:[#allocation57_spill] sm:$0xff]  ;;  %v11474_v46 = vld [vmem:[#allocation59_spill] sm:$0xff] }
 0x419   : > { %v3587_v1 = vadd.f32 %v3509_v29, %v11467_v40  ;;  %v3590_v48 = vadd.f32 %v3518_v15, %v11468_v27  ;;  %v3589_v51 = vadd.f32 %v3515_v62, %v11469_v3  ;;  %v3824_v4 = vpop.permute.xlu0 %3823  ;;  %v3822_v6 = vpop.permute.xlu1 %3821  ;;  %v3592_v61 = vadd.f32 %v3524_v5, %v11470_v25  ;;  %v11475_v2 = vld [vmem:[#allocation113_spill] sm:$0xff]  ;;  %v11476_v29 = vld [vmem:[#allocation112_spill] sm:$0xff]  ;;  %v11477_v62 = vld [vmem:[#allocation115_spill] sm:$0xff] }
 0x41a   : > { %v3591_v54 = vadd.f32 %v3521_v22, %v11471_v55  ;;  %v3594_v56 = vadd.f32 %v3530_v8, %v11472_v16  ;;  %v3593_v9 = vadd.f32 %v3527_v63, %v11473_v45  ;;  %v3672_v26 = vadd.f32 %v3640_v20, %v3585_v18  ;;  %v11478_v5 = vld [vmem:[#allocation114_spill] sm:$0xff]  ;;  %v11479_v27 = vld [vmem:[#allocation28_spill] sm:$0xff] }
 0x41b   : > { %v3642_v39 = vmul.f32 %v11465_v31, %v11474_v46  ;;  %v3645_v40 = vmul.f32 %v11465_v31, %v11475_v2  ;;  %v3644_v15 = vmul.f32 %v11465_v31, %v11476_v29  ;;  %v3647_v33 = vmul.f32 %v11465_v31, %v11477_v62  ;;  %v11480_v63 = vld [vmem:[#allocation116_spill] sm:$0xff]  ;;  %v11481_v62 = vld [vmem:[#allocation138_spill] sm:$0xff] }
 0x41c   : > { %v3646_v22 = vmul.f32 %v11465_v31, %v11478_v5  ;;  %v3649_v8 = vmul.f32 %v11465_v31, %v11479_v27  ;;  %v3648_v18 = vmul.f32 %v11465_v31, %v11480_v63  ;;  %v3675_v20 = vadd.f32 %v3643_v12, %v3588_v30  ;;  %v11482_v5 = vld [vmem:[#allocation121_spill] sm:$0xff]  ;;  %v11483_v12 = vld [vmem:[#allocation90_spill] sm:$0xff] }
 0x41d   : > { %v3674_v3 = vadd.f32 %v3642_v39, %v3587_v1  ;;  %v3677_v25 = vadd.f32 %v3645_v40, %v3590_v48  ;;  %v3676_v55 = vadd.f32 %v3644_v15, %v3589_v51  ;;  %v3679_v16 = vadd.f32 %v3647_v33, %v3592_v61  ;;  %v3828_v45 = vpop.permute.xlu0 %3827  ;;  %v3826_v47 = vpop.permute.xlu1 %3825  ;;  %v11484_v1 = vld [vmem:[#allocation125_spill] sm:$0xff]  ;;  %v11485_v51 = vld [vmem:[#allocation139_spill] sm:$0xff]  ;;  %v11487_v61 = vld [vmem:[#allocation140_spill] sm:$0xff] }
 0x41e   : > { %v3678_v2 = vadd.f32 %v3646_v22, %v3591_v54  ;;  %v3681_v29 = vadd.f32 %v3649_v8, %v3594_v56  ;;  %v3680_v34 = vadd.f32 %v3648_v18, %v3593_v9  ;;  %v9138_v46 = vadd.f32 %v11481_v62, %v8832_v28  ;;  %v11488_v54 = vld [vmem:[#allocation123_spill] sm:$0xff]  ;;  %v11489_v56 = vld [vmem:[#allocation134_spill] sm:$0xff]  ;;  %v11494_v62 = vld [vmem:[#allocation141_spill] sm:$0xff] }
 0x41f   : > { %v9142_v27 = vadd.f32 %v11482_v5, %v8834_v52  ;;  %v9146_v31 = vadd.f32 %v8837_v41, %v8860_v14  ;;  %v9150_v30 = vadd.f32 %v11483_v12, %v8873_v19  ;;  %v9154_v48 = vadd.f32 %v11484_v1, %v8894_v50  ;;  %v11486_v14 = vld [vmem:[#allocation122_spill] sm:$0xff]  ;;  %v11496_v33 = vld [vmem:[#allocation153_spill] sm:$0xff]  ;;  %v11502_v1 = vld [vmem:[#allocation155_spill] sm:$0xff] }
 0x420   : > { %v9158_v28 = vadd.f32 %v11485_v51, %v8899_v38  ;;  %v9162_v52 = vadd.f32 %v8885_v36, %v8901_v24  ;;  %v9166_v41 = vadd.f32 %v8888_v53, %v8907_v7  ;;  %v9170_v19 = vadd.f32 %v11486_v14, %v8955_v35  ;;  %v11490_v7 = vld [vmem:[#allocation191_spill] sm:$0xff]  ;;  %v11493_v40 = vld [vmem:[#allocation142_spill] sm:$0xff] }
 0x421   : > { %v9174_v50 = vadd.f32 %v11487_v61, %v8957_v0  ;;  %v9178_v38 = vadd.f32 %v11488_v54, %v8967_v11  ;;  %v9182_v36 = vadd.f32 %v11489_v56, %v8969_v49  ;;  %v9186_v53 = vadd.f32 %v8961_v57, %v8976_v42  ;;  %v11491_v0 = vld [vmem:[#allocation124_spill] sm:$0xff]  ;;  %v3832_v9 = vpop.permute.xlu0 %3831  ;;  %v3830_v39 = vpop.permute.xlu1 %3829  ;;  %v11499_v5 = vld [vmem:[#allocation154_spill] sm:$0xff] }
 0x422   : > { %v9190_v24 = vadd.f32 %v8963_v17, %v9003_v58  ;;  %v9194_v35 = vadd.f32 %v8984_v13, %v9021_v44  ;;  %v9198_v11 = vadd.f32 %v11491_v0, %v11490_v7  ;;  %v11492_v49 = vld [vmem:[#allocation152_spill] sm:$0xff]  ;;  %v11497_v17 = vld [vmem:[#allocation127_spill] sm:$0xff]  ;;  %v9215_v22 = vadd.f32 %v11499_v5, %v3671_v23  ;;  %v11500_v8 = vld [vmem:[#allocation126_spill] sm:$0xff] }
 0x423   : > { %v3882_v15 = vadd.f32 %v11493_v40, %v11492_v49  ;;  %v11495_v57 = vld [vmem:[#allocation136_spill] sm:$0xff]  ;;  %v9208_v58 = vadd.f32 %v11497_v17, %v11496_v33  ;;  %v11498_v13 = vld [vmem:[#allocation143_spill] sm:$0xff]  ;;  %v9218_v18 = vadd.f32 %v11500_v8, %v3670_v10  ;;  %v9221_v12 = vadd.f32 %v9084_v43, %v3673_v21  ;;  %v11504_v7 = vld [vmem:[#allocation25_spill] sm:$0xff] }
 0x424   : > { %v9204_v42 = vadd.f32 %v11495_v57, %v11494_v62  ;;  %v9212_v44 = vadd.f32 %v11498_v13, %v9093_v59  ;;  %v9224_v51 = vadd.f32 %v11502_v1, %v3672_v26  ;;  %v3890_v14 = vadd.f32 %v9101_v37, %v3675_v20  ;;  %v11505_v37 = vld [vmem:[#allocation27_spill] sm:$0xff]  ;;  %v11521_v17 = vld [vmem:[#allocation12_spill] sm:$0xff]  ;;  %v11523_v1 = vld [vmem:[#allocation29_spill] sm:$0xff] }
 0x425   : > { %11501 = vst [vmem:[#allocation144_spill] sm:$0xff] %v9221_v12  ;;  %v9228_v61 = vadd.f32 %v9104_v32, %v3674_v3  ;;  %v9230_v54 = vadd.f32 %v3824_v4, %v3677_v25  ;;  %v9232_v59 = vadd.f32 %v3822_v6, %v3676_v55  ;;  %v9234_v23 = vadd.f32 %v3828_v45, %v3679_v16  ;;  %v3903_v21 = vpop.permute.xlu1 %3902  ;;  %v4280_v26 = vpop.permute.xlu0 %4279  ;;  %v11506_v4 = vld [vmem:[#allocation109_spill] sm:$0xff]  ;;  %v11507_v6 = vld [vmem:[#allocation87_spill] sm:$0xff]  ;;  %v11558_v12 = vld [vmem:[#allocation102_spill] sm:$0xff] }
 0x426   : > { %v9236_v56 = vadd.f32 %v3826_v47, %v3678_v2  ;;  %v9238_v10 = vadd.f32 %v3832_v9, %v3681_v29  ;;  %v9240_v43 = vadd.f32 %v3830_v39, %v3680_v34  ;;  %v9243_v0 = vrot.slane %v3903_v21, %v11504_v7  ;;  %v11511_v25 = vld [vmem:[#allocation23_spill] sm:$0xff] }
 0x427   : > { %v9246_v32 = vrot.slane %v3903_v21, %v11505_v37  ;;  %v9249_v20 = vrot.slane %v3903_v21, %v11506_v4  ;;  %v9252_v3 = vrot.slane %v3903_v21, %v11507_v6  ;;  %v9255_v47 = vrot.slane %v4280_v26, %v11504_v7  ;;  %v11520_v57 = vld [vmem:[#allocation43_spill] sm:$0xff]  ;;  %v11524_v7 = vld [vmem:[#allocation80_spill] sm:$0xff] }
 0x428   : > { %11503 = vst [vmem:[#allocation156_spill] sm:$0xff] %v9238_v10  ;;  %v9258_v34 = vrot.slane %v4280_v26, %v11505_v37  ;;  %v9261_v2 = vrot.slane %v4280_v26, %v11506_v4  ;;  %v9264_v29 = vrot.slane %v4280_v26, %v11507_v6  ;;  %v11512_v55 = vsub.s32 4, %v11511_v25  ;;  %v11522_v5 = vld [vmem:[#allocation107_spill] sm:$0xff]  ;;  %v11525_v4 = vld [vmem:[#allocation162_spill] sm:$0xff]  ;;  %v11545_v10 = vld [vmem:[#allocation45_spill] sm:$0xff] }
 0x429   : > { %v11514_v45 = vsub.s32 5, %v11511_v25  ;;  %v11516_v39 = vsub.s32 6, %v11511_v25  ;;  %v11518_v40 = vsub.s32 7, %v11511_v25  ;;  %v3922_v33 = vmul.f32 %v9243_v0, %v11520_v57 }
 0x42a   : > { %11508 = vst [vmem:[#allocation128_spill] sm:$0xff] %v9258_v34  ;;  %11509 = vst [vmem:[#allocation157_spill] sm:$0xff] %v9261_v2  ;;  %v9268_v16 = vrot.slane %v4280_v26, %v11512_v55  ;;  %v3923_v13 = vmul.f32 %v9243_v0, %v11521_v17  ;;  %v3938_v8 = vmul.f32 %v9246_v32, %v11522_v5  ;;  %v11526_v55 = vld [vmem:[#allocation171_spill] sm:$0xff] }
 0x42b   : > { %11510 = vst [vmem:[#allocation145_spill] sm:$0xff] %v9264_v29  ;;  %v9272_v9 = vrot.slane %v4280_v26, %v11514_v45  ;;  %v9276_v49 = vrot.slane %v4280_v26, %v11516_v39  ;;  %v9280_v62 = vrot.slane %v4280_v26, %v11518_v40  ;;  %v3939_v21 = vmul.f32 %v9246_v32, %v11523_v1 }
 0x42c   : > { %11513 = vst [vmem:[#allocation16_spill] sm:$0xff] %v9268_v16  ;;  %v3954_v37 = vmul.f32 %v9249_v20, %v11524_v7  ;;  %v3955_v6 = vmul.f32 %v9249_v20, %v11525_v4  ;;  %v3970_v26 = vmul.f32 %v9252_v3, %v11464_v60  ;;  %v3971_v45 = vmul.f32 %v9252_v3, %v11526_v55  ;;  %v11528_v16 = vld [vmem:[#allocation20_spill] sm:$0xff] }
 0x42d   : > { %11515 = vst [vmem:[#allocation146_spill] sm:$0xff] %v9272_v9  ;;  %11517 = vst [vmem:[#allocation62_spill] sm:$0xff] %v9276_v49  ;;  %v4051_v39 = vrot.slane %v3922_v33, 1  ;;  %v4052_v40 = vrot.slane %v3923_v13, 1  ;;  %v4075_v57 = vrot.slane %v3938_v8, 1  ;;  %v4076_v17 = vrot.slane %v3939_v21, 1 }
 0x42e   : > { %11519 = vst [vmem:[#allocation8_spill] sm:$0xff] %v9280_v62  ;;  %v4099_v5 = vrot.slane %v3954_v37, 1  ;;  %v4100_v25 = vrot.slane %v3955_v6, 1  ;;  %v4123_v62 = vrot.slane %v3970_v26, 1  ;;  %v4124_v1 = vrot.slane %v3971_v45, 1  ;;  %v11527_v9 = vld [vmem:[#allocation101_spill] sm:$0xff] }
 0x42f   : > { %v4053_v49 = vsel %vm2821_vm3, %v4051_v39, %v4052_v40  ;;  %v4077_v7 = vsel %vm2821_vm3, %v4075_v57, %v4076_v17  ;;  %v3920_v4 = vmul.f32 %v9243_v0, %v11527_v9  ;;  %v3921_v60 = vmul.f32 %v9243_v0, %v11528_v16  ;;  %v11529_v6 = vld [vmem:[#allocation106_spill] sm:$0xff]  ;;  %v11531_v9 = vld [vmem:[#allocation100_spill] sm:$0xff]  ;;  %v11532_v57 = vld [vmem:[#allocation187_spill] sm:$0xff] }
 0x430   : > { %v4101_v55 = vsel %vm2821_vm3, %v4099_v5, %v4100_v25  ;;  %v4125_v33 = vsel %vm2821_vm3, %v4123_v62, %v4124_v1  ;;  %v4177_v13 = vadd.f32 %v4053_v49, %v9138_v46  ;;  %v4185_v8 = vadd.f32 %v4077_v7, %v9170_v19  ;;  %v11530_v45 = vld [vmem:[#allocation42_spill] sm:$0xff]  ;;  %v11533_v17 = vld [vmem:[#allocation52_spill] sm:$0xff]  ;;  %v11534_v62 = vld [vmem:[#allocation161_spill] sm:$0xff] }
 0x431   : > { %v4193_v21 = vadd.f32 %v4101_v55, %v3882_v15  ;;  %v4201_v37 = vadd.f32 %v4125_v33, %v3890_v14  ;;  %v3936_v26 = vmul.f32 %v9246_v32, %v11529_v6  ;;  %v3937_v39 = vmul.f32 %v9246_v32, %v11530_v45  ;;  %v11535_v49 = vld [vmem:[#allocation188_spill] sm:$0xff]  ;;  %v11536_v15 = vld [vmem:[#allocation190_spill] sm:$0xff]  ;;  %v11537_v5 = vld [vmem:[#allocation59_spill] sm:$0xff] }
 0x432   : > { %v4209_v40 = vadd.f32 %v4177_v13, %v11531_v9  ;;  %v4217_v16 = vadd.f32 %v4185_v8, %v11532_v57  ;;  %v3952_v25 = vmul.f32 %v9249_v20, %v11533_v17  ;;  %v3953_v46 = vmul.f32 %v9249_v20, %v11534_v62  ;;  %v11538_v7 = vld [vmem:[#allocation175_spill] sm:$0xff]  ;;  %v9324_v33 = vpop.permute.xlu0 %4556  ;;  %v9326_v13 = vpop.permute.xlu1 %4396 }
 0x433   : > { %v4225_v19 = vadd.f32 %v4193_v21, %v11535_v49  ;;  %v4233_v14 = vadd.f32 %v4201_v37, %v11536_v15  ;;  %v3968_v1 = vmul.f32 %v9252_v3, %v11537_v5  ;;  %v3969_v55 = vmul.f32 %v9252_v3, %v11538_v7 }
 0x434   : > { %v9328_v8 = vmax.f32 %v4209_v40, 0.0  ;;  %v9330_v6 = vmax.f32 %v4217_v16, 0.0  ;;  %v4048_v45 = vrot.slane %v3920_v4, 1  ;;  %v4049_v17 = vrot.slane %v3921_v60, 1 }
 0x435   : > { %v9332_v62 = vmax.f32 %v4225_v19, 0.0  ;;  %v9334_v21 = vmax.f32 %v4233_v14, 0.0  ;;  %v4072_v37 = vrot.slane %v3936_v26, 1  ;;  %v4073_v29 = vrot.slane %v3937_v39, 1 }
 0x436   : > { %11539 = vst [vmem:[#allocation35_spill] sm:$0xff] %v9328_v8  ;;  %11540 = vst [vmem:[#allocation61_spill] sm:$0xff] %v9330_v6  ;;  %v4428_v5 = vmul.f32 %v9326_v13, %v9328_v8  ;;  %v4588_v7 = vmul.f32 %v9324_v33, %v9330_v6  ;;  %v4050_v2 = vsel %vm2821_vm3, %v4048_v45, %v4049_v17  ;;  %v4096_v40 = vrot.slane %v3952_v25, 1  ;;  %v9342_v19 = vpop.permute.xlu0 %4568  ;;  %v9344_v14 = vpop.permute.xlu1 %4404 }
 0x437   : > { %11541 = vst [vmem:[#allocation34_spill] sm:$0xff] %v9332_v62  ;;  %11542 = vst [vmem:[#allocation129_spill] sm:$0xff] %v9334_v21  ;;  %v4074_v16 = vsel %vm2821_vm3, %v4072_v37, %v4073_v29  ;;  %v4097_v34 = vrot.slane %v3953_v46, 1  ;;  %v4120_v4 = vrot.slane %v3968_v1, 1  ;;  %v4121_v60 = vrot.slane %v3969_v55, 1  ;;  %v11546_v46 = vld [vmem:[#allocation10_spill] sm:$0xff] }
 0x438   : > { %11543 = vst [vmem:[#allocation17_spill] sm:$0xff] %v9342_v19  ;;  %11544 = vst [vmem:[#allocation147_spill] sm:$0xff] %v9344_v14  ;;  %v9346_v26 = vadd.f32 %v4588_v7, %v4428_v5  ;;  %v4176_v39 = vadd.f32 %v4050_v2, %v9142_v27  ;;  %v4184_v8 = vadd.f32 %v4074_v16, %v9174_v50  ;;  %v11547_v55 = vld [vmem:[#allocation50_spill] sm:$0xff]  ;;  %v11548_v2 = vld [vmem:[#allocation88_spill] sm:$0xff] }
 0x439   : > { %v3928_v6 = vmul.f32 %v9243_v0, %v11545_v10  ;;  %v4098_v25 = vsel %vm2821_vm3, %v4096_v40, %v4097_v34  ;;  %v4122_v29 = vsel %vm2821_vm3, %v4120_v4, %v4121_v60  ;;  %v3929_v1 = vmul.f32 %v9243_v0, %v11546_v46  ;;  %v11549_v34 = vld [vmem:[#allocation55_spill] sm:$0xff]  ;;  %v11550_v7 = vld [vmem:[#allocation165_spill] sm:$0xff]  ;;  %v11551_v16 = vld [vmem:[#allocation114_spill] sm:$0xff] }
 0x43a   : > { %v3944_v45 = vmul.f32 %v9246_v32, %v11547_v55  ;;  %v4192_v17 = vadd.f32 %v4098_v25, %v9204_v42  ;;  %v4200_v37 = vadd.f32 %v4122_v29, %v9228_v61  ;;  %v4208_v27 = vadd.f32 %v4176_v39, %v11531_v9  ;;  %v9370_v60 = vpop.permute.xlu0 %4576  ;;  %v9372_v42 = vpop.permute.xlu1 %4408  ;;  %v11554_v29 = vld [vmem:[#allocation182_spill] sm:$0xff] }
 0x43b   : > { %v4216_v50 = vadd.f32 %v4184_v8, %v11532_v57  ;;  %v3945_v10 = vmul.f32 %v9246_v32, %v11548_v2  ;;  %v3960_v5 = vmul.f32 %v9249_v20, %v11549_v34  ;;  %v3961_v40 = vmul.f32 %v9249_v20, %v11550_v7  ;;  %11552 = vst [vmem:[#allocation149_spill] sm:$0xff] %v9370_v60 }
 0x43c   : > { %v3976_v4 = vmul.f32 %v9252_v3, %v11551_v16  ;;  %11553 = vst [vmem:[#allocation9_spill] sm:$0xff] %v9372_v42  ;;  %v4224_v61 = vadd.f32 %v4192_v17, %v11535_v49  ;;  %v4232_v8 = vadd.f32 %v4200_v37, %v11536_v15  ;;  %v9376_v39 = vmax.f32 %v4208_v27, 0.0 }
 0x43d   : > { %v9378_v25 = vmax.f32 %v4216_v50, 0.0  ;;  %v3977_v46 = vmul.f32 %v9252_v3, %v11554_v29  ;;  %v4060_v55 = vrot.slane %v3928_v6, 1  ;;  %v4061_v2 = vrot.slane %v3929_v1, 1 }
 0x43e   : > { %v4084_v34 = vrot.slane %v3944_v45, 1  ;;  %v9382_v7 = vmax.f32 %v4224_v61, 0.0  ;;  %v9384_v16 = vmax.f32 %v4232_v8, 0.0  ;;  %v4427_v60 = vmul.f32 %v9326_v13, %v9376_v39  ;;  %v9391_v42 = vpop.permute.xlu0 %4584  ;;  %v9393_v6 = vpop.permute.xlu1 %4416 }
 0x43f   : > { %v4587_v17 = vmul.f32 %v9324_v33, %v9378_v25  ;;  %v4062_v37 = vsel %vm2821_vm3, %v4060_v55, %v4061_v2  ;;  %v4085_v27 = vrot.slane %v3945_v10, 1  ;;  %v4108_v50 = vrot.slane %v3960_v5, 1  ;;  %11556 = vst [vmem:[#allocation148_spill] sm:$0xff] %v9391_v42  ;;  %11557 = vst [vmem:[#allocation33_spill] sm:$0xff] %v9393_v6  ;;  %v11559_v10 = vld [vmem:[#allocation67_spill] sm:$0xff] }
 0x440   : > { %11555 = vst [vmem:[#allocation130_spill] sm:$0xff] %v9384_v16  ;;  %v4109_v19 = vrot.slane %v3961_v40, 1  ;;  %v4132_v45 = vrot.slane %v3976_v4, 1  ;;  %v4133_v61 = vrot.slane %v3977_v46, 1  ;;  %v4180_v8 = vadd.f32 %v4062_v37, %v9158_v28  ;;  %v11560_v46 = vld [vmem:[#allocation48_spill] sm:$0xff] }
 0x441   : > { %v9395_v1 = vadd.f32 %v4587_v17, %v4427_v60  ;;  %v4086_v29 = vsel %vm2821_vm3, %v4084_v34, %v4085_v27  ;;  %v3924_v55 = vmul.f32 %v9243_v0, %v11558_v12  ;;  %v3925_v5 = vmul.f32 %v9243_v0, %v11559_v10  ;;  %v11562_v12 = vld [vmem:[#allocation54_spill] sm:$0xff]  ;;  %v11568_v10 = vld [vmem:[#allocation181_spill] sm:$0xff] }
 0x442   : > { %v4110_v14 = vsel %vm2821_vm3, %v4108_v50, %v4109_v19  ;;  %v4134_v40 = vsel %vm2821_vm3, %v4132_v45, %v4133_v61  ;;  %v4188_v2 = vadd.f32 %v4086_v29, %v9190_v24  ;;  %v4212_v4 = vadd.f32 %v4180_v8, %v11531_v9  ;;  %v11561_v19 = vld [vmem:[#allocation53_spill] sm:$0xff]  ;;  %v9415_v27 = vpop.permute.xlu1 %4424  ;;  %v11567_v8 = vld [vmem:[#allocation112_spill] sm:$0xff] }
 0x443   : > { %v4196_v60 = vadd.f32 %v4110_v14, %v9218_v18  ;;  %v4204_v28 = vadd.f32 %v4134_v40, %v9236_v56  ;;  %v3940_v34 = vmul.f32 %v9246_v32, %v11560_v46  ;;  %v3941_v17 = vmul.f32 %v9246_v32, %v11561_v19  ;;  %11563 = vst [vmem:[#allocation132_spill] sm:$0xff] %v9415_v27  ;;  %v11565_v14 = vld [vmem:[#allocation168_spill] sm:$0xff]  ;;  %v9423_v45 = vpop.permute.xlu0 %4720 }
 0x444   : > { %v3956_v37 = vmul.f32 %v9249_v20, %v11562_v12  ;;  %v4220_v50 = vadd.f32 %v4188_v2, %v11532_v57  ;;  %v9419_v18 = vmax.f32 %v4212_v4, 0.0  ;;  %v3957_v56 = vmul.f32 %v9249_v20, %v11565_v14  ;;  %11566 = vst [vmem:[#allocation150_spill] sm:$0xff] %v9423_v45 }
 0x445   : > { %v4228_v24 = vadd.f32 %v4196_v60, %v11535_v49  ;;  %v4236_v61 = vadd.f32 %v4204_v28, %v11536_v15  ;;  %v3972_v29 = vmul.f32 %v9252_v3, %v11567_v8  ;;  %v3973_v40 = vmul.f32 %v9252_v3, %v11568_v10 }
 0x446   : > { %11564 = vst [vmem:[#allocation70_spill] sm:$0xff] %v9419_v18  ;;  %v4054_v46 = vrot.slane %v3924_v55, 1  ;;  %v9430_v19 = vmax.f32 %v4220_v50, 0.0  ;;  %v4431_v60 = vmul.f32 %v9326_v13, %v9419_v18  ;;  %v4055_v4 = vrot.slane %v3925_v5, 1 }
 0x447   : > { %v9432_v2 = vmax.f32 %v4228_v24, 0.0  ;;  %v9436_v12 = vmax.f32 %v4236_v61, 0.0  ;;  %v4078_v14 = vrot.slane %v3940_v34, 1  ;;  %v4079_v42 = vrot.slane %v3941_v17, 1  ;;  %v9441_v50 = vpop.permute.xlu0 %4732  ;;  %v9443_v24 = vpop.permute.xlu1 %4560  ;;  %v11573_v61 = vld [vmem:[#allocation46_spill] sm:$0xff] }
 0x448   : > { %11569 = vst [vmem:[#allocation44_spill] sm:$0xff] %v9430_v19  ;;  %v4102_v28 = vrot.slane %v3956_v37, 1  ;;  %v4591_v8 = vmul.f32 %v9324_v33, %v9430_v19  ;;  %v4056_v27 = vsel %vm2821_vm3, %v4054_v46, %v4055_v4  ;;  %v4103_v10 = vrot.slane %v3957_v56, 1  ;;  %11572 = vst [vmem:[#allocation195_spill] sm:$0xff] %v9441_v50  ;;  %v11574_v56 = vld [vmem:[#allocation22_spill] sm:$0xff] }
 0x449   : > { %11570 = vst [vmem:[#allocation64_spill] sm:$0xff] %v9432_v2  ;;  %11571 = vst [vmem:[#allocation131_spill] sm:$0xff] %v9436_v12  ;;  %v4126_v55 = vrot.slane %v3972_v29, 1  ;;  %v4080_v6 = vsel %vm2821_vm3, %v4078_v14, %v4079_v42  ;;  %v4127_v18 = vrot.slane %v3973_v40, 1  ;;  %v4178_v5 = vadd.f32 %v4056_v27, %v9150_v30  ;;  %v11575_v40 = vld [vmem:[#allocation108_spill] sm:$0xff]  ;;  %v11576_v14 = vld [vmem:[#allocation158_spill] sm:$0xff] }
 0x44a   : > { %v3932_v34 = vmul.f32 %v9243_v0, %v11573_v61  ;;  %v9449_v17 = vadd.f32 %v4591_v8, %v4431_v60  ;;  %v4104_v37 = vsel %vm2821_vm3, %v4102_v28, %v4103_v10  ;;  %v4186_v46 = vadd.f32 %v4080_v6, %v9182_v36  ;;  %v11577_v36 = vld [vmem:[#allocation56_spill] sm:$0xff] }
 0x44b   : > { %v3933_v29 = vmul.f32 %v9243_v0, %v11574_v56  ;;  %v4128_v4 = vsel %vm2821_vm3, %v4126_v55, %v4127_v18  ;;  %v4194_v50 = vadd.f32 %v4104_v37, %v9212_v44  ;;  %v4210_v42 = vadd.f32 %v4178_v5, %v11531_v9  ;;  %v9466_v8 = vpop.permute.xlu0 %4740  ;;  %v9468_v18 = vpop.permute.xlu1 %4564  ;;  %v11581_v55 = vld [vmem:[#allocation176_spill] sm:$0xff] }
 0x44c   : > { %v3948_v30 = vmul.f32 %v9246_v32, %v11575_v40  ;;  %v4202_v27 = vadd.f32 %v4128_v4, %v9232_v59  ;;  %v4218_v60 = vadd.f32 %v4186_v46, %v11532_v57  ;;  %v3949_v28 = vmul.f32 %v9246_v32, %v11576_v14  ;;  %11578 = vst [vmem:[#allocation63_spill] sm:$0xff] %v9466_v8  ;;  %v11583_v46 = vld [vmem:[#allocation192_spill] sm:$0xff] }
 0x44d   : > { %v3964_v6 = vmul.f32 %v9249_v20, %v11577_v36  ;;  %11579 = vst [vmem:[#allocation18_spill] sm:$0xff] %v9468_v18  ;;  %v4226_v44 = vadd.f32 %v4194_v50, %v11535_v49  ;;  %v9471_v10 = vmax.f32 %v4210_v42, 0.0  ;;  %v3965_v5 = vmul.f32 %v9249_v20, %v11581_v55 }
 0x44e   : > { %v3980_v59 = vmul.f32 %v9252_v3, %v11480_v63  ;;  %v4234_v61 = vadd.f32 %v4202_v27, %v11536_v15  ;;  %v9478_v37 = vmax.f32 %v4218_v60, 0.0  ;;  %v3981_v56 = vmul.f32 %v9252_v3, %v11583_v46 }
 0x44f   : > { %11580 = vst [vmem:[#allocation95_spill] sm:$0xff] %v9471_v10  ;;  %v4066_v4 = vrot.slane %v3932_v34, 1  ;;  %v9482_v40 = vmax.f32 %v4226_v44, 0.0  ;;  %v4429_v50 = vmul.f32 %v9326_v13, %v9471_v10  ;;  %v4067_v42 = vrot.slane %v3933_v29, 1  ;;  %v9490_v60 = vpop.permute.xlu1 %4572 }
 0x450   : > { %11582 = vst [vmem:[#allocation167_spill] sm:$0xff] %v9478_v37  ;;  %v4090_v14 = vrot.slane %v3948_v30, 1  ;;  %v9486_v36 = vmax.f32 %v4234_v61, 0.0  ;;  %v4589_v63 = vmul.f32 %v9324_v33, %v9478_v37  ;;  %v4091_v55 = vrot.slane %v3949_v28, 1  ;;  %11586 = vst [vmem:[#allocation30_spill] sm:$0xff] %v9490_v60  ;;  %v9493_v18 = vpop.permute.xlu0 %4876  ;;  %v11587_v61 = vld [vmem:[#allocation103_spill] sm:$0xff] }
 0x451   : > { %11584 = vst [vmem:[#allocation180_spill] sm:$0xff] %v9482_v40  ;;  %v4114_v27 = vrot.slane %v3964_v6, 1  ;;  %v4068_v8 = vsel %vm2821_vm3, %v4066_v4, %v4067_v42  ;;  %v4115_v46 = vrot.slane %v3965_v5, 1  ;;  %v4138_v34 = vrot.slane %v3980_v59, 1 }
 0x452   : > { %11585 = vst [vmem:[#allocation66_spill] sm:$0xff] %v9486_v36  ;;  %v4139_v44 = vrot.slane %v3981_v56, 1  ;;  %v4653_v19 = vadd.f32 %v4589_v63, %v4429_v50  ;;  %v4092_v29 = vsel %vm2821_vm3, %v4090_v14, %v4091_v55  ;;  %v4182_v30 = vadd.f32 %v4068_v8, %v9166_v41  ;;  %v11589_v63 = vld [vmem:[#allocation38_spill] sm:$0xff] }
 0x453   : > { %v3926_v10 = vmul.f32 %v9243_v0, %v11587_v61  ;;  %v4908_v28 = vmul.f32 %v9493_v18, %v9334_v21  ;;  %v4907_v6 = vmul.f32 %v9493_v18, %v9384_v16  ;;  %v4911_v5 = vmul.f32 %v9493_v18, %v9436_v12  ;;  %v9511_v50 = vpop.permute.xlu1 %4580  ;;  %v11590_v61 = vld [vmem:[#allocation49_spill] sm:$0xff] }
 0x454   : > { %v4909_v59 = vmul.f32 %v9493_v18, %v9486_v36  ;;  %v4116_v56 = vsel %vm2821_vm3, %v4114_v27, %v4115_v46  ;;  %v4140_v4 = vsel %vm2821_vm3, %v4138_v34, %v4139_v44  ;;  %v4190_v41 = vadd.f32 %v4092_v29, %v9198_v11  ;;  %11588 = vst [vmem:[#allocation65_spill] sm:$0xff] %v9511_v50  ;;  %v11592_v34 = vld [vmem:[#allocation19_spill] sm:$0xff]  ;;  %v11593_v44 = vld [vmem:[#allocation81_spill] sm:$0xff] }
 0x455   : > { %v4214_v8 = vadd.f32 %v4182_v30, %v11531_v9  ;;  %v4198_v42 = vadd.f32 %v4116_v56, %v9224_v51  ;;  %v4206_v14 = vadd.f32 %v4140_v4, %v9240_v43  ;;  %v3927_v55 = vmul.f32 %v9243_v0, %v11589_v63  ;;  %v11594_v30 = vld [vmem:[#allocation163_spill] sm:$0xff]  ;;  %v11595_v4 = vld [vmem:[#allocation113_spill] sm:$0xff] }
 0x456   : > { %v3942_v60 = vmul.f32 %v9246_v32, %v11590_v61  ;;  %v4222_v27 = vadd.f32 %v4190_v41, %v11532_v57  ;;  %v3943_v11 = vmul.f32 %v9246_v32, %v11592_v34  ;;  %v3958_v29 = vmul.f32 %v9249_v20, %v11593_v44 }
 0x457   : > { %v9520_v46 = vmax.f32 %v4214_v8, 0.0  ;;  %v4230_v51 = vadd.f32 %v4198_v42, %v11535_v49  ;;  %v4238_v43 = vadd.f32 %v4206_v14, %v11536_v15  ;;  %v3959_v56 = vmul.f32 %v9249_v20, %v11594_v30  ;;  %v11597_v8 = vld [vmem:[#allocation179_spill] sm:$0xff] }
 0x458   : > { %v3974_v63 = vmul.f32 %v9252_v3, %v11595_v4  ;;  %v9532_v61 = vmax.f32 %v4222_v27, 0.0  ;;  %v3975_v34 = vmul.f32 %v9252_v3, %v11597_v8  ;;  %v4057_v50 = vrot.slane %v3926_v10, 1  ;;  %v9542_v36 = vpop.permute.xlu1 %4716 }
 0x459   : > { %11591 = vst [vmem:[#allocation14_spill] sm:$0xff] %v9520_v46  ;;  %v4433_v41 = vmul.f32 %v9326_v13, %v9520_v46  ;;  %v9538_v44 = vmax.f32 %v4230_v51, 0.0  ;;  %v9540_v42 = vmax.f32 %v4238_v43, 0.0  ;;  %v4058_v14 = vrot.slane %v3927_v55, 1 }
 0x45a   : > { %11596 = vst [vmem:[#allocation69_spill] sm:$0xff] %v9532_v61  ;;  %v4081_v12 = vrot.slane %v3942_v60, 1  ;;  %v4593_v30 = vmul.f32 %v9324_v33, %v9532_v61  ;;  %v4082_v27 = vrot.slane %v3943_v11, 1  ;;  %v4105_v4 = vrot.slane %v3958_v29, 1 }
 0x45b   : > { %11598 = vst [vmem:[#allocation196_spill] sm:$0xff] %v9538_v44  ;;  %11599 = vst [vmem:[#allocation68_spill] sm:$0xff] %v9540_v42  ;;  %v4106_v37 = vrot.slane %v3959_v56, 1  ;;  %v4748_v46 = vmul.f32 %v9542_v36, %v9332_v62  ;;  %v4747_v10 = vmul.f32 %v9542_v36, %v9382_v7  ;;  %v4751_v51 = vmul.f32 %v9542_v36, %v9432_v2 }
 0x45c   : > { %v4749_v60 = vmul.f32 %v9542_v36, %v9482_v40  ;;  %v4657_v55 = vadd.f32 %v4593_v30, %v4433_v41  ;;  %v4753_v43 = vmul.f32 %v9542_v36, %v9538_v44  ;;  %v4913_v11 = vmul.f32 %v9493_v18, %v9540_v42  ;;  %v9562_v2 = vpop.permute.xlu1 %4724 }
 0x45d   : > { %v4059_v29 = vsel %vm2821_vm3, %v4057_v50, %v4058_v14  ;;  %v4812_v56 = vadd.f32 %v4748_v46, %v9346_v26  ;;  %v4811_v8 = vadd.f32 %v4747_v10, %v9395_v1  ;;  %v4815_v61 = vadd.f32 %v4751_v51, %v9449_v17  ;;  %v9568_v17 = vpop.permute.xlu0 %4888 }
 0x45e   : > { %v4813_v21 = vadd.f32 %v4749_v60, %v4653_v19  ;;  %v4817_v62 = vadd.f32 %v4753_v43, %v4657_v55  ;;  %v4083_v41 = vsel %vm2821_vm3, %v4081_v12, %v4082_v27  ;;  %v4107_v30 = vsel %vm2821_vm3, %v4105_v4, %v4106_v37  ;;  %v11602_v4 = vld [vmem:[#allocation51_spill] sm:$0xff] }
 0x45f   : > { %v4129_v44 = vrot.slane %v3974_v63, 1  ;;  %v4972_v40 = vadd.f32 %v4908_v28, %v4812_v56  ;;  %v4971_v16 = vadd.f32 %v4907_v6, %v4811_v8  ;;  %v4975_v42 = vadd.f32 %v4911_v5, %v4815_v61  ;;  %v11603_v55 = vld [vmem:[#allocation11_spill] sm:$0xff]  ;;  %v11605_v56 = vld [vmem:[#allocation84_spill] sm:$0xff] }
 0x460   : > { %v4973_v45 = vadd.f32 %v4909_v59, %v4813_v21  ;;  %v4977_v50 = vadd.f32 %v4913_v11, %v4817_v62  ;;  %v4130_v14 = vrot.slane %v3975_v34, 1  ;;  %v4179_v26 = vadd.f32 %v4059_v29, %v9146_v31  ;;  %v9578_v63 = vpop.permute.xlu1 %4728 }
 0x461   : > { %v4187_v1 = vadd.f32 %v4083_v41, %v9178_v38  ;;  %v5036_v19 = vadd.f32 %v4972_v40, %v9255_v47  ;;  %v5035_v46 = vadd.f32 %v4971_v16, %v9255_v47  ;;  %v5039_v12 = vadd.f32 %v4975_v42, %v9255_v47  ;;  %v11601_v42 = vld [vmem:[#allocation41_spill] sm:$0xff]  ;;  %v9598_v11 = vpop.permute.xlu0 %4896  ;;  %v11606_v41 = vld [vmem:[#allocation166_spill] sm:$0xff] }
 0x462   : > { %v5037_v37 = vadd.f32 %v4973_v45, %v9255_v47  ;;  %v5041_v28 = vadd.f32 %v4977_v50, %v9255_v47  ;;  %v4131_v21 = vsel %vm2821_vm3, %v4129_v44, %v4130_v14  ;;  %v4195_v62 = vadd.f32 %v4107_v30, %v9208_v58  ;;  %v11600_v58 = vld [vmem:[#allocation104_spill] sm:$0xff]  ;;  %11604 = vst [vmem:[#allocation15_spill] sm:$0xff] %v9598_v11  ;;  %v11607_v50 = vld [vmem:[#allocation115_spill] sm:$0xff] }
 0x463   : > { %v4211_v31 = vadd.f32 %v4179_v26, %v11531_v9  ;;  %v5100_v6 = vmax.f32 %v5036_v19, 0.0  ;;  %v5099_v38 = vmax.f32 %v5035_v46, 0.0  ;;  %v5103_v5 = vmax.f32 %v5039_v12, 0.0  ;;  %v11608_v46 = vld [vmem:[#allocation183_spill] sm:$0xff] }
 0x464   : > { %v5101_v59 = vmax.f32 %v5037_v37, 0.0  ;;  %v5105_v40 = vmax.f32 %v5041_v28, 0.0  ;;  %v4203_v16 = vadd.f32 %v4131_v21, %v9230_v54  ;;  %v4219_v61 = vadd.f32 %v4187_v1, %v11532_v57 }
 0x465   : > { %v4227_v45 = vadd.f32 %v4195_v62, %v11535_v49  ;;  %5231 = vperm.xlu0 %5938, %v5100_v6   ;;  %5228 = vperm.xlu1 %5939, %v5099_v38   ;;  %v9583_v34 = vmax.f32 %v4211_v31, 0.0  ;;  %v3930_v44 = vmul.f32 %v9243_v0, %v11600_v58  ;;  %v3931_v27 = vmul.f32 %v9243_v0, %v11601_v42  ;;  %v9616_v31 = vpop.permute.xlu1 %4736 }
 0x466   : > { %v3946_v10 = vmul.f32 %v9246_v32, %v11602_v4  ;;  %v4235_v51 = vadd.f32 %v4203_v16, %v11536_v15  ;;  %v9592_v54 = vmax.f32 %v4219_v61, 0.0  ;;  %v3947_v43 = vmul.f32 %v9246_v32, %v11603_v55 }
 0x467   : > { %v9594_v60 = vmax.f32 %v4227_v45, 0.0  ;;  %v4430_v29 = vmul.f32 %v9326_v13, %v9583_v34  ;;  %v3962_v8 = vmul.f32 %v9249_v20, %v11605_v56  ;;  %v3963_v30 = vmul.f32 %v9249_v20, %v11606_v41  ;;  %v11611_v56 = vld [vmem:[#allocation36_spill] sm:$0xff] }
 0x468   : > { %v3978_v14 = vmul.f32 %v9252_v3, %v11607_v50  ;;  %v9608_v26 = vmax.f32 %v4235_v51, 0.0  ;;  %v4590_v1 = vmul.f32 %v9324_v33, %v9592_v54  ;;  %v3979_v12 = vmul.f32 %v9252_v3, %v11608_v46 }
 0x469   : > { %v4750_v19 = vmul.f32 %v9542_v36, %v9594_v60  ;;  %5240 = vperm.xlu0 %5938, %v5103_v5   ;;  %5234 = vperm.xlu1 %5939, %v5101_v59   ;;  %v4063_v37 = vrot.slane %v3930_v44, 1  ;;  %v4064_v28 = vrot.slane %v3931_v27, 1  ;;  %v4087_v21 = vrot.slane %v3946_v10, 1  ;;  %v9625_v10 = vpop.permute.xlu0 %4904 }
 0x46a   : > { %v4088_v62 = vrot.slane %v3947_v43, 1  ;;  %v4654_v6 = vadd.f32 %v4590_v1, %v4430_v29  ;;  %v4910_v38 = vmul.f32 %v9493_v18, %v9608_v26  ;;  %v4111_v16 = vrot.slane %v3962_v8, 1  ;;  %11609 = vst [vmem:[#allocation72_spill] sm:$0xff] %v9625_v10  ;;  %v11610_v43 = vld [vmem:[#allocation60_spill] sm:$0xff]  ;;  %v11614_v1 = vld [vmem:[#allocation21_spill] sm:$0xff] }
 0x46b   : > { %v4112_v61 = vrot.slane %v3963_v30, 1  ;;  %v4065_v45 = vsel %vm2821_vm3, %v4063_v37, %v4064_v28  ;;  %v4135_v42 = vrot.slane %v3978_v14, 1  ;;  %v4136_v4 = vrot.slane %v3979_v12, 1  ;;  %v11612_v8 = vld [vmem:[#allocation40_spill] sm:$0xff]  ;;  %v11617_v37 = vld [vmem:[#allocation13_spill] sm:$0xff]  ;;  %v9647_v28 = vpop.permute.xlu1 %4744 }
 0x46c   : > { %v4089_v58 = vsel %vm2821_vm3, %v4087_v21, %v4088_v62  ;;  %v4814_v5 = vadd.f32 %v4750_v19, %v4654_v6  ;;  %v4181_v44 = vadd.f32 %v4065_v45, %v9154_v48  ;;  %v3934_v29 = vmul.f32 %v9243_v0, %v11610_v43  ;;  %v11615_v19 = vld [vmem:[#allocation26_spill] sm:$0xff]  ;;  %11618 = vst [vmem:[#allocation32_spill] sm:$0xff] %v9647_v28  ;;  %v11621_v45 = vld [vmem:[#allocation28_spill] sm:$0xff] }
 0x46d   : > { %v4113_v59 = vsel %vm2821_vm3, %v4111_v16, %v4112_v61  ;;  %v4189_v27 = vadd.f32 %v4089_v58, %v9186_v53  ;;  %5246 = vperm.xlu0 %5938, %v5105_v40   ;;  %v4137_v51 = vsel %vm2821_vm3, %v4135_v42, %v4136_v4  ;;  %v11613_v41 = vrot.slane %v11611_v56, %v11612_v8  ;;  %v11619_v16 = vld [vmem:[#allocation98_spill] sm:$0xff]  ;;  %v11622_v42 = vld [vmem:[#allocation117_spill] sm:$0xff]  ;;  %v11646_v10 = vld [vmem:[#allocation68_spill] sm:$0xff] }
 0x46e   : > { %v4197_v55 = vadd.f32 %v4113_v59, %v9215_v22  ;;  %v4974_v50 = vadd.f32 %v4910_v38, %v4814_v5  ;;  %v4205_v48 = vadd.f32 %v4137_v51, %v9234_v23  ;;  %v4213_v53 = vadd.f32 %v4181_v44, %v11531_v9 }
 0x46f   : > { %v3935_v30 = vmul.f32 %v9243_v0, %v11613_v41  ;;  %v4221_v14 = vadd.f32 %v4189_v27, %v11532_v57  ;;  %v3950_v22 = vmul.f32 %v9246_v32, %v11614_v1  ;;  %v11616_v46 = vrot.slane %v11615_v19, %v11612_v8  ;;  %v9680_v19 = vpop.permute.xlu1 %4880 }
 0x470   : > { %v4229_v40 = vadd.f32 %v4197_v55, %v11535_v49  ;;  %v3966_v0 = vmul.f32 %v9249_v20, %v11617_v37  ;;  %v5038_v23 = vadd.f32 %v4974_v50, %v9255_v47  ;;  %v4237_v21 = vadd.f32 %v4205_v48, %v11536_v15  ;;  %v9673_v55 = vpop.permute.xlu0 %4400 }
 0x471   : > { %v3951_v12 = vmul.f32 %v9246_v32, %v11616_v46  ;;  %v9651_v62 = vmax.f32 %v4213_v53, 0.0  ;;  %v9653_v6 = vmax.f32 %v4221_v14, 0.0  ;;  %v11620_v61 = vrot.slane %v11619_v16, %v11612_v8  ;;  %v11624_v16 = vld [vmem:[#allocation144_spill] sm:$0xff] }
 0x472   : > { %v9655_v38 = vmax.f32 %v4229_v40, 0.0  ;;  %v3982_v58 = vmul.f32 %v9252_v3, %v11621_v45  ;;  %v11623_v4 = vrot.slane %v11622_v42, %v11612_v8  ;;  %v5102_v59 = vmax.f32 %v5038_v23, 0.0 }
 0x473   : > { %v3967_v32 = vmul.f32 %v9249_v20, %v11620_v61  ;;  %v9667_v44 = vmax.f32 %v4237_v21, 0.0  ;;  %v4432_v27 = vmul.f32 %v9326_v13, %v9651_v62  ;;  %v4592_v51 = vmul.f32 %v9324_v33, %v9653_v6 }
 0x474   : > { %v3983_v5 = vmul.f32 %v9252_v3, %v11623_v4  ;;  %v4752_v20 = vmul.f32 %v9542_v36, %v9655_v38  ;;  %v4069_v43 = vrot.slane %v3934_v29, 1  ;;  %v4070_v56 = vrot.slane %v3935_v30, 1  ;;  %5237 = vperm.xlu1 %5939, %v5102_v59   ;;  %v11626_v4 = vld [vmem:[#allocation150_spill] sm:$0xff] }
 0x475   : > { %v4093_v41 = vrot.slane %v3950_v22, 1  ;;  %v4656_v8 = vadd.f32 %v4592_v51, %v4432_v27  ;;  %v4912_v3 = vmul.f32 %v9493_v18, %v9667_v44  ;;  %v4094_v50 = vrot.slane %v3951_v12, 1  ;;  %v11627_v59 = vld [vmem:[#allocation130_spill] sm:$0xff] }
 0x476   : > { %v4117_v48 = vrot.slane %v3966_v0, 1  ;;  %v4071_v53 = vsel %vm2821_vm3, %v4069_v43, %v4070_v56  ;;  %v4118_v14 = vrot.slane %v3967_v32, 1  ;;  %v4141_v40 = vrot.slane %v3982_v58, 1  ;;  %v11625_v32 = vld [vmem:[#allocation156_spill] sm:$0xff] }
 0x477   : > { %v4142_v1 = vrot.slane %v3983_v5, 1  ;;  %v4816_v46 = vadd.f32 %v4752_v20, %v4656_v8  ;;  %v4095_v37 = vsel %vm2821_vm3, %v4093_v41, %v4094_v50  ;;  %v4183_v29 = vadd.f32 %v4071_v53, %v9162_v52  ;;  %v11628_v41 = vld [vmem:[#allocation35_spill] sm:$0xff]  ;;  %v11629_v8 = vld [vmem:[#allocation61_spill] sm:$0xff] }
 0x478   : > { %v4435_v30 = vmul.f32 %v9673_v55, %v9376_v39  ;;  %v4119_v22 = vsel %vm2821_vm3, %v4117_v48, %v4118_v14  ;;  %v4191_v0 = vadd.f32 %v4095_v37, %v9194_v35  ;;  %v4595_v23 = vmul.f32 %v9443_v24, %v9378_v25 }
 0x479   : > { %v4143_v12 = vsel %vm2821_vm3, %v4141_v40, %v4142_v1  ;;  %v4976_v21 = vadd.f32 %v4912_v3, %v4816_v46  ;;  %v4199_v61 = vadd.f32 %v4119_v22, %v11624_v16  ;;  %v4215_v58 = vadd.f32 %v4183_v29, %v11531_v9  ;;  %v11632_v1 = vld [vmem:[#allocation34_spill] sm:$0xff]  ;;  %v11636_v16 = vld [vmem:[#allocation167_spill] sm:$0xff] }
 0x47a   : > { %v4207_v45 = vadd.f32 %v4143_v12, %v11625_v32  ;;  %v4223_v52 = vadd.f32 %v4191_v0, %v11532_v57  ;;  %v4659_v42 = vadd.f32 %v4595_v23, %v4435_v30  ;;  %v4755_v5 = vmul.f32 %v11626_v4, %v9382_v7  ;;  %v11633_v30 = vld [vmem:[#allocation129_spill] sm:$0xff]  ;;  %v11634_v12 = vld [vmem:[#allocation95_spill] sm:$0xff]  ;;  %v11637_v32 = vld [vmem:[#allocation180_spill] sm:$0xff] }
 0x47b   : > { %v4915_v27 = vmul.f32 %v9680_v19, %v11627_v59  ;;  %v5040_v35 = vadd.f32 %v4976_v21, %v9255_v47  ;;  %v4231_v51 = vadd.f32 %v4199_v61, %v11535_v49  ;;  %v9702_v43 = vmax.f32 %v4215_v58, 0.0 }
 0x47c   : > { %v4239_v20 = vadd.f32 %v4207_v45, %v11536_v15  ;;  %v9704_v56 = vmax.f32 %v4223_v52, 0.0  ;;  %v4819_v9 = vadd.f32 %v4755_v5, %v4659_v42  ;;  %v4436_v57 = vmul.f32 %v9673_v55, %v11628_v41 }
 0x47d   : > { %v4596_v3 = vmul.f32 %v9443_v24, %v11629_v8  ;;  %v5104_v50 = vmax.f32 %v5040_v35, 0.0  ;;  %v9710_v48 = vmax.f32 %v4231_v51, 0.0  ;;  %v4434_v49 = vmul.f32 %v9326_v13, %v9702_v43 }
 0x47e   : > { %v9712_v53 = vmax.f32 %v4239_v20, 0.0  ;;  %v4594_v15 = vmul.f32 %v9324_v33, %v9704_v56  ;;  %v4979_v14 = vadd.f32 %v4915_v27, %v4819_v9  ;;  %v4756_v46 = vmul.f32 %v11626_v4, %v11632_v1  ;;  %v11635_v33 = vld [vmem:[#allocation128_spill] sm:$0xff] }
 0x47f   : > { %11630 = vst [vmem:[#allocation71_spill] sm:$0xff] %v9710_v48  ;;  %v4660_v40 = vadd.f32 %v4596_v3, %v4436_v57  ;;  %5243 = vperm.xlu1 %5939, %v5104_v50   ;;  %v4754_v37 = vmul.f32 %v9542_v36, %v9710_v48  ;;  %v4916_v22 = vmul.f32 %v9680_v19, %v11633_v30  ;;  %v11638_v36 = vld [vmem:[#allocation66_spill] sm:$0xff] }
 0x480   : > { %11631 = vst [vmem:[#allocation39_spill] sm:$0xff] %v9712_v53  ;;  %v4914_v29 = vmul.f32 %v9493_v18, %v9712_v53  ;;  %v4437_v13 = vmul.f32 %v9673_v55, %v11634_v12  ;;  %v4658_v0 = vadd.f32 %v4594_v15, %v4434_v49  ;;  %v5043_v23 = vadd.f32 %v4979_v14, %v11635_v33  ;;  %v11639_v57 = vld [vmem:[#allocation70_spill] sm:$0xff]  ;;  %v11640_v14 = vld [vmem:[#allocation44_spill] sm:$0xff] }
 0x481   : > { %v4820_v21 = vadd.f32 %v4756_v46, %v4660_v40  ;;  %v4597_v61 = vmul.f32 %v9443_v24, %v11636_v16  ;;  %v4757_v45 = vmul.f32 %v11626_v4, %v11637_v32  ;;  %v4917_v58 = vmul.f32 %v9680_v19, %v11638_v36 }
 0x482   : > { %v4438_v18 = vmul.f32 %v9673_v55, %v9583_v34  ;;  %v4598_v52 = vmul.f32 %v9443_v24, %v9592_v54  ;;  %v4818_v42 = vadd.f32 %v4754_v37, %v4658_v0  ;;  %v5107_v5 = vmax.f32 %v5043_v23, 0.0  ;;  %v11641_v37 = vld [vmem:[#allocation64_spill] sm:$0xff] }
 0x483   : > { %v4980_v27 = vadd.f32 %v4916_v22, %v4820_v21  ;;  %v4661_v35 = vadd.f32 %v4597_v61, %v4437_v13  ;;  %v4758_v20 = vmul.f32 %v11626_v4, %v9594_v60  ;;  %v4918_v9 = vmul.f32 %v9680_v19, %v9608_v26  ;;  %v11642_v13 = vld [vmem:[#allocation131_spill] sm:$0xff] }
 0x484   : > { %v4662_v51 = vadd.f32 %v4598_v52, %v4438_v18  ;;  %v4439_v3 = vmul.f32 %v9673_v55, %v11639_v57  ;;  %v4978_v50 = vadd.f32 %v4914_v29, %v4818_v42  ;;  %5252 = vperm.xlu0 %5938, %v5107_v5   ;;  %v4599_v40 = vmul.f32 %v9443_v24, %v11640_v14 }
 0x485   : > { %v5044_v49 = vadd.f32 %v4980_v27, %v11635_v33  ;;  %v4821_v15 = vadd.f32 %v4757_v45, %v4661_v35  ;;  %v4759_v22 = vmul.f32 %v11626_v4, %v11641_v37  ;;  %v4919_v0 = vmul.f32 %v9680_v19, %v11642_v13 }
 0x486   : > { %v4822_v46 = vadd.f32 %v4758_v20, %v4662_v51  ;;  %v4440_v23 = vmul.f32 %v9673_v55, %v9651_v62  ;;  %v5042_v21 = vadd.f32 %v4978_v50, %v9255_v47  ;;  %v4663_v18 = vadd.f32 %v4599_v40, %v4439_v3  ;;  %v11643_v20 = vld [vmem:[#allocation14_spill] sm:$0xff] }
 0x487   : > { %v5108_v29 = vmax.f32 %v5044_v49, 0.0  ;;  %v4981_v61 = vadd.f32 %v4917_v58, %v4821_v15  ;;  %v4600_v45 = vmul.f32 %v9443_v24, %v9653_v6  ;;  %v4760_v42 = vmul.f32 %v11626_v4, %v9655_v38  ;;  %v11645_v49 = vld [vmem:[#allocation196_spill] sm:$0xff] }
 0x488   : > { %v4982_v52 = vadd.f32 %v4918_v9, %v4822_v46  ;;  %v4920_v5 = vmul.f32 %v9680_v19, %v9667_v44  ;;  %v5106_v27 = vmax.f32 %v5042_v21, 0.0  ;;  %v4823_v51 = vadd.f32 %v4759_v22, %v4663_v18  ;;  %v11644_v9 = vld [vmem:[#allocation69_spill] sm:$0xff] }
 0x489   : > { %v5045_v35 = vadd.f32 %v4981_v61, %v11635_v33  ;;  %v4441_v47 = vmul.f32 %v9673_v55, %v11643_v20  ;;  %v4664_v3 = vadd.f32 %v4600_v45, %v4440_v23  ;;  %v4601_v50 = vmul.f32 %v9443_v24, %v11644_v9  ;;  %v9773_v61 = vpop.permute.xlu1 %4884 }
 0x48a   : > { %v5046_v58 = vadd.f32 %v4982_v52, %v11635_v33  ;;  %v4761_v15 = vmul.f32 %v11626_v4, %v11645_v49  ;;  %5249 = vperm.xlu1 %5939, %v5106_v27   ;;  %v4983_v46 = vadd.f32 %v4919_v0, %v4823_v51  ;;  %v4921_v21 = vmul.f32 %v9680_v19, %v11646_v10 }
 0x48b   : > { %v5109_v40 = vmax.f32 %v5045_v35, 0.0  ;;  %v4442_v22 = vmul.f32 %v9673_v55, %v9702_v43  ;;  %v4824_v52 = vadd.f32 %v4760_v42, %v4664_v3  ;;  %v4665_v23 = vadd.f32 %v4601_v50, %v4441_v47  ;;  %v11647_v35 = vld [vmem:[#allocation147_spill] sm:$0xff]  ;;  %v11648_v42 = vld [vmem:[#allocation18_spill] sm:$0xff] }
 0x48c   : > { %v5110_v18 = vmax.f32 %v5046_v58, 0.0  ;;  %v4602_v45 = vmul.f32 %v9443_v24, %v9704_v56  ;;  %v5047_v28 = vadd.f32 %v4983_v46, %v11635_v33  ;;  %v4762_v0 = vmul.f32 %v11626_v4, %v9710_v48 }
 0x48d   : > { %5258 = vperm.xlu0 %5938, %v5109_v40   ;;  %v4922_v27 = vmul.f32 %v9680_v19, %v9712_v53  ;;  %v4443_v55 = vmul.f32 %v11647_v35, %v9376_v39  ;;  %v4984_v51 = vadd.f32 %v4920_v5, %v4824_v52  ;;  %v4825_v11 = vadd.f32 %v4761_v15, %v4665_v23 }
 0x48e   : > { %v4666_v58 = vadd.f32 %v4602_v45, %v4442_v22  ;;  %v4603_v47 = vmul.f32 %v11648_v42, %v9378_v25  ;;  %5255 = vperm.xlu1 %5939, %v5108_v29   ;;  %v5111_v24 = vmax.f32 %v5047_v28, 0.0  ;;  %v4763_v3 = vmul.f32 %v9562_v2, %v9382_v7 }
 0x48f   : > { %v4923_v4 = vmul.f32 %v9773_v61, %v11627_v59  ;;  %v4444_v19 = vmul.f32 %v11647_v35, %v11628_v41  ;;  %v5048_v50 = vadd.f32 %v4984_v51, %v11635_v33  ;;  %v4985_v40 = vadd.f32 %v4921_v21, %v4825_v11 }
 0x490   : > { %v4826_v5 = vadd.f32 %v4762_v0, %v4666_v58  ;;  %v4667_v15 = vadd.f32 %v4603_v47, %v4443_v55  ;;  %v4604_v46 = vmul.f32 %v11648_v42, %v11629_v8  ;;  %v4764_v28 = vmul.f32 %v9562_v2, %v11632_v1 }
 0x491   : > { %5264 = vperm.xlu0 %5938, %v5111_v24   ;;  %v4924_v29 = vmul.f32 %v9773_v61, %v11633_v30  ;;  %v4445_v22 = vmul.f32 %v11647_v35, %v11634_v12  ;;  %v5112_v52 = vmax.f32 %v5048_v50, 0.0  ;;  %v5049_v23 = vadd.f32 %v4985_v40, %v11635_v33 }
 0x492   : > { %v4986_v45 = vadd.f32 %v4922_v27, %v4826_v5  ;;  %v4827_v11 = vadd.f32 %v4763_v3, %v4667_v15  ;;  %5261 = vperm.xlu1 %5939, %v5110_v18   ;;  %v4668_v21 = vadd.f32 %v4604_v46, %v4444_v19  ;;  %v4605_v0 = vmul.f32 %v11648_v42, %v11636_v16  ;;  %v11649_v5 = vld [vmem:[#allocation157_spill] sm:$0xff] }
 0x493   : > { %v4765_v55 = vmul.f32 %v9562_v2, %v11637_v32  ;;  %v4925_v51 = vmul.f32 %v9773_v61, %v11638_v36  ;;  %v5113_v58 = vmax.f32 %v5049_v23, 0.0  ;;  %v4446_v50 = vmul.f32 %v11647_v35, %v9583_v34 }
 0x494   : > { %v5050_v47 = vadd.f32 %v4986_v45, %v11635_v33  ;;  %v4987_v24 = vadd.f32 %v4923_v4, %v4827_v11  ;;  %v4828_v27 = vadd.f32 %v4764_v28, %v4668_v21  ;;  %v4669_v3 = vadd.f32 %v4605_v0, %v4445_v22 }
 0x495   : > { %v4606_v18 = vmul.f32 %v11648_v42, %v9592_v54  ;;  %v4766_v19 = vmul.f32 %v9562_v2, %v9594_v60  ;;  %5270 = vperm.xlu0 %5938, %v5113_v58   ;;  %v4926_v46 = vmul.f32 %v9773_v61, %v9608_v26  ;;  %v4447_v33 = vmul.f32 %v11647_v35, %v11639_v57 }
 0x496   : > { %v5114_v40 = vmax.f32 %v5050_v47, 0.0  ;;  %v5051_v15 = vadd.f32 %v4987_v24, %v11649_v5  ;;  %5267 = vperm.xlu1 %5939, %v5112_v52   ;;  %v4988_v4 = vadd.f32 %v4924_v29, %v4828_v27  ;;  %v4829_v28 = vadd.f32 %v4765_v55, %v4669_v3 }
 0x497   : > { %v4670_v22 = vadd.f32 %v4606_v18, %v4446_v50  ;;  %v4607_v23 = vmul.f32 %v11648_v42, %v11640_v14  ;;  %v4767_v11 = vmul.f32 %v9562_v2, %v11641_v37  ;;  %v4927_v21 = vmul.f32 %v9773_v61, %v11642_v13 }
 0x498   : > { %v5115_v45 = vmax.f32 %v5051_v15, 0.0  ;;  %v4448_v0 = vmul.f32 %v11647_v35, %v9651_v62  ;;  %v5052_v58 = vadd.f32 %v4988_v4, %v11649_v5  ;;  %v4989_v47 = vadd.f32 %v4925_v51, %v4829_v28 }
 0x499   : > { %v4830_v52 = vadd.f32 %v4766_v19, %v4670_v22  ;;  %v4671_v29 = vadd.f32 %v4607_v23, %v4447_v33  ;;  %v4608_v55 = vmul.f32 %v11648_v42, %v9653_v6  ;;  %v4768_v24 = vmul.f32 %v9562_v2, %v9655_v38 }
 0x49a   : > { %5276 = vperm.xlu0 %5938, %v5115_v45   ;;  %v4928_v50 = vmul.f32 %v9773_v61, %v9667_v44  ;;  %v4449_v27 = vmul.f32 %v11647_v35, %v11643_v20  ;;  %5273 = vperm.xlu1 %5939, %v5114_v40   ;;  %v5116_v3 = vmax.f32 %v5052_v58, 0.0  ;;  %v5053_v18 = vadd.f32 %v4989_v47, %v11649_v5 }
 0x49b   : > { %v4990_v51 = vadd.f32 %v4926_v46, %v4830_v52  ;;  %v4831_v19 = vadd.f32 %v4767_v11, %v4671_v29  ;;  %v4672_v15 = vadd.f32 %v4608_v55, %v4448_v0  ;;  %v4609_v33 = vmul.f32 %v11648_v42, %v11644_v9 }
 0x49c   : > { %v4769_v4 = vmul.f32 %v9562_v2, %v11645_v49  ;;  %v4929_v28 = vmul.f32 %v9773_v61, %v11646_v10  ;;  %v5117_v22 = vmax.f32 %v5053_v18, 0.0  ;;  %v4450_v40 = vmul.f32 %v11647_v35, %v9702_v43  ;;  %v11651_v18 = vld [vmem:[#allocation17_spill] sm:$0xff] }
 0x49d   : > { %v5054_v23 = vadd.f32 %v4990_v51, %v11649_v5  ;;  %v4991_v45 = vadd.f32 %v4927_v21, %v4831_v19  ;;  %v4832_v58 = vadd.f32 %v4768_v24, %v4672_v15  ;;  %v4673_v46 = vadd.f32 %v4609_v33, %v4449_v27  ;;  %v11650_v21 = vld [vmem:[#allocation9_spill] sm:$0xff] }
 0x49e   : > { %v4610_v11 = vmul.f32 %v11648_v42, %v9704_v56  ;;  %v4770_v0 = vmul.f32 %v9562_v2, %v9710_v48  ;;  %5279 = vperm.xlu1 %5939, %v5116_v3   ;;  %5282 = vperm.xlu0 %5938, %v5117_v22   ;;  %v4930_v29 = vmul.f32 %v9773_v61, %v9712_v53 }
 0x49f   : > { %v5118_v47 = vmax.f32 %v5054_v23, 0.0  ;;  %v5055_v52 = vadd.f32 %v4991_v45, %v11649_v5  ;;  %v4451_v55 = vmul.f32 %v11650_v21, %v9376_v39  ;;  %v4992_v35 = vadd.f32 %v4928_v50, %v4832_v58 }
 0x4a0   : > { %v4833_v24 = vadd.f32 %v4769_v4, %v4673_v46  ;;  %v4674_v27 = vadd.f32 %v4610_v11, %v4450_v40  ;;  %v4611_v42 = vmul.f32 %v11651_v18, %v9378_v25  ;;  %v4771_v2 = vmul.f32 %v9578_v63, %v9382_v7 }
 0x4a1   : > { %v5119_v51 = vmax.f32 %v5055_v52, 0.0  ;;  %v4931_v3 = vmul.f32 %v9568_v17, %v11627_v59  ;;  %v4452_v19 = vmul.f32 %v11650_v21, %v11628_v41  ;;  %v5056_v61 = vadd.f32 %v4992_v35, %v11649_v5 }
 0x4a2   : > { %v4993_v15 = vadd.f32 %v4929_v28, %v4833_v24  ;;  %v4834_v33 = vadd.f32 %v4770_v0, %v4674_v27  ;;  %v4675_v50 = vadd.f32 %v4611_v42, %v4451_v55  ;;  %5285 = vperm.xlu1 %5939, %v5118_v47   ;;  %v4612_v4 = vmul.f32 %v11651_v18, %v11629_v8 }
 0x4a3   : > { %5288 = vperm.xlu0 %5938, %v5119_v51   ;;  %v4772_v22 = vmul.f32 %v9578_v63, %v11632_v1  ;;  %v4932_v23 = vmul.f32 %v9568_v17, %v11633_v30  ;;  %v5120_v45 = vmax.f32 %v5056_v61, 0.0  ;;  %v4453_v28 = vmul.f32 %v11650_v21, %v11634_v12 }
 0x4a4   : > { %v5057_v40 = vadd.f32 %v4993_v15, %v11649_v5  ;;  %v4994_v58 = vadd.f32 %v4930_v29, %v4834_v33  ;;  %v4835_v46 = vadd.f32 %v4771_v2, %v4675_v50  ;;  %v4676_v11 = vadd.f32 %v4612_v4, %v4452_v19  ;;  %v11652_v19 = vld [vmem:[#allocation145_spill] sm:$0xff] }
 0x4a5   : > { %v4613_v0 = vmul.f32 %v11651_v18, %v11636_v16  ;;  %v4773_v47 = vmul.f32 %v9578_v63, %v11637_v32  ;;  %v4933_v24 = vmul.f32 %v9568_v17, %v11638_v36  ;;  %v4454_v42 = vmul.f32 %v11650_v21, %v9583_v34 }
 0x4a6   : > { %v5121_v52 = vmax.f32 %v5057_v40, 0.0  ;;  %v5058_v55 = vadd.f32 %v4994_v58, %v11649_v5  ;;  %v4995_v35 = vadd.f32 %v4931_v3, %v4835_v46  ;;  %5291 = vperm.xlu1 %5939, %v5120_v45   ;;  %v4836_v29 = vadd.f32 %v4772_v22, %v4676_v11 }
 0x4a7   : > { %v4677_v27 = vadd.f32 %v4613_v0, %v4453_v28  ;;  %v4614_v51 = vmul.f32 %v11651_v18, %v9592_v54  ;;  %v4774_v5 = vmul.f32 %v9578_v63, %v9594_v60  ;;  %v4934_v3 = vmul.f32 %v9568_v17, %v9608_v26 }
 0x4a8   : > { %5294 = vperm.xlu0 %5938, %v5121_v52   ;;  %v5122_v2 = vmax.f32 %v5058_v55, 0.0  ;;  %v5059_v61 = vadd.f32 %v4995_v35, %v11652_v19  ;;  %v4996_v15 = vadd.f32 %v4932_v23, %v4836_v29  ;;  %v4455_v4 = vmul.f32 %v11650_v21, %v11639_v57 }
 0x4a9   : > { %v4837_v33 = vadd.f32 %v4773_v47, %v4677_v27  ;;  %v4678_v50 = vadd.f32 %v4614_v51, %v4454_v42  ;;  %v4615_v45 = vmul.f32 %v11651_v18, %v11640_v14  ;;  %v4775_v40 = vmul.f32 %v9578_v63, %v11641_v37  ;;  %v9910_v42 = vpop.permute.xlu0 %4412 }
 0x4aa   : > { %v5123_v22 = vmax.f32 %v5059_v61, 0.0  ;;  %v4935_v58 = vmul.f32 %v9568_v17, %v11642_v13  ;;  %5297 = vperm.xlu1 %5939, %v5122_v2   ;;  %v5060_v46 = vadd.f32 %v4996_v15, %v11652_v19  ;;  %v4456_v28 = vmul.f32 %v11650_v21, %v9651_v62 }
 0x4ab   : > { %v4997_v11 = vadd.f32 %v4933_v24, %v4837_v33  ;;  %v4838_v23 = vadd.f32 %v4774_v5, %v4678_v50  ;;  %v4679_v0 = vadd.f32 %v4615_v45, %v4455_v4  ;;  %v4616_v47 = vmul.f32 %v11651_v18, %v9653_v6  ;;  %v9921_v4 = vpop.permute.xlu1 %4892 }
 0x4ac   : > { %5300 = vperm.xlu0 %5938, %v5123_v22   ;;  %v4776_v52 = vmul.f32 %v9578_v63, %v9655_v38  ;;  %v4936_v55 = vmul.f32 %v9568_v17, %v9667_v44  ;;  %v5124_v35 = vmax.f32 %v5060_v46, 0.0  ;;  %v4457_v24 = vmul.f32 %v11650_v21, %v11643_v20 }
 0x4ad   : > { %v5061_v29 = vadd.f32 %v4997_v11, %v11652_v19  ;;  %v4998_v27 = vadd.f32 %v4934_v3, %v4838_v23  ;;  %v4839_v51 = vadd.f32 %v4775_v40, %v4679_v0  ;;  %v4680_v2 = vadd.f32 %v4616_v47, %v4456_v28 }
 0x4ae   : > { %v4617_v61 = vmul.f32 %v11651_v18, %v11644_v9  ;;  %v4777_v5 = vmul.f32 %v9578_v63, %v11645_v49  ;;  %5303 = vperm.xlu1 %5939, %v5124_v35   ;;  %v4937_v3 = vmul.f32 %v9568_v17, %v11646_v10  ;;  %v4458_v50 = vmul.f32 %v11650_v21, %v9702_v43  ;;  %v11653_v35 = vld [vmem:[#allocation30_spill] sm:$0xff] }
 0x4af   : > { %v5125_v15 = vmax.f32 %v5061_v29, 0.0  ;;  %v5062_v33 = vadd.f32 %v4998_v27, %v11652_v19  ;;  %v4999_v22 = vadd.f32 %v4935_v58, %v4839_v51  ;;  %v4840_v45 = vadd.f32 %v4776_v52, %v4680_v2  ;;  %v11654_v29 = vld [vmem:[#allocation195_spill] sm:$0xff] }
 0x4b0   : > { %v4681_v40 = vadd.f32 %v4617_v61, %v4457_v24  ;;  %v4618_v46 = vmul.f32 %v11651_v18, %v9704_v56  ;;  %v4778_v23 = vmul.f32 %v9578_v63, %v9710_v48  ;;  %v4938_v28 = vmul.f32 %v9568_v17, %v9712_v53 }
 0x4b1   : > { %5306 = vperm.xlu0 %5938, %v5125_v15   ;;  %v5126_v11 = vmax.f32 %v5062_v33, 0.0  ;;  %v4459_v0 = vmul.f32 %v9910_v42, %v9376_v39  ;;  %v5063_v21 = vadd.f32 %v4999_v22, %v11652_v19  ;;  %v5000_v47 = vadd.f32 %v4936_v55, %v4840_v45 }
 0x4b2   : > { %v4841_v58 = vadd.f32 %v4777_v5, %v4681_v40  ;;  %v4682_v52 = vadd.f32 %v4618_v46, %v4458_v50  ;;  %v4619_v18 = vmul.f32 %v11653_v35, %v9378_v25  ;;  %v4779_v27 = vmul.f32 %v11654_v29, %v9382_v7 }
 0x4b3   : > { %5309 = vperm.xlu1 %5939, %v5126_v11   ;;  %v4939_v63 = vmul.f32 %v9921_v4, %v11627_v59  ;;  %v4460_v17 = vmul.f32 %v9910_v42, %v11628_v41  ;;  %v5127_v24 = vmax.f32 %v5063_v21, 0.0  ;;  %v5064_v51 = vadd.f32 %v5000_v47, %v11652_v19 }
 0x4b4   : > { %v5001_v2 = vadd.f32 %v4937_v3, %v4841_v58  ;;  %v4842_v55 = vadd.f32 %v4778_v23, %v4682_v52  ;;  %v4683_v61 = vadd.f32 %v4619_v18, %v4459_v0  ;;  %v4620_v5 = vmul.f32 %v11653_v35, %v11629_v8 }
 0x4b5   : > { %v4780_v15 = vmul.f32 %v11654_v29, %v11632_v1  ;;  %v4940_v33 = vmul.f32 %v9921_v4, %v11633_v30  ;;  %5312 = vperm.xlu0 %5938, %v5127_v24   ;;  %v5128_v50 = vmax.f32 %v5064_v51, 0.0  ;;  %v4461_v40 = vmul.f32 %v9910_v42, %v11634_v12 }
 0x4b6   : > { %v5065_v22 = vadd.f32 %v5001_v2, %v11652_v19  ;;  %v5002_v45 = vadd.f32 %v4938_v28, %v4842_v55  ;;  %v4843_v3 = vadd.f32 %v4779_v27, %v4683_v61  ;;  %v4684_v46 = vadd.f32 %v4620_v5, %v4460_v17  ;;  %v11655_v2 = vld [vmem:[#allocation16_spill] sm:$0xff] }
 0x4b7   : > { %v4621_v11 = vmul.f32 %v11653_v35, %v11636_v16  ;;  %v4781_v23 = vmul.f32 %v11654_v29, %v11637_v32  ;;  %5315 = vperm.xlu1 %5939, %v5128_v50   ;;  %v4941_v47 = vmul.f32 %v9921_v4, %v11638_v36  ;;  %v4462_v28 = vmul.f32 %v9910_v42, %v9583_v34 }
 0x4b8   : > { %v5129_v0 = vmax.f32 %v5065_v22, 0.0  ;;  %v5066_v21 = vadd.f32 %v5002_v45, %v11652_v19  ;;  %v5003_v58 = vadd.f32 %v4939_v63, %v4843_v3  ;;  %v4844_v52 = vadd.f32 %v4780_v15, %v4684_v46 }
 0x4b9   : > { %v4685_v18 = vadd.f32 %v4621_v11, %v4461_v40  ;;  %v4622_v27 = vmul.f32 %v11653_v35, %v9592_v54  ;;  %v4782_v24 = vmul.f32 %v11654_v29, %v9594_v60  ;;  %v4942_v19 = vmul.f32 %v9921_v4, %v9608_v26 }
 0x4ba   : > { %5318 = vperm.xlu0 %5938, %v5129_v0   ;;  %v5130_v17 = vmax.f32 %v5066_v21, 0.0  ;;  %v4463_v51 = vmul.f32 %v9910_v42, %v11639_v57  ;;  %v5067_v55 = vadd.f32 %v5003_v58, %v11655_v2  ;;  %v5004_v61 = vadd.f32 %v4940_v33, %v4844_v52 }
 0x4bb   : > { %v4845_v63 = vadd.f32 %v4781_v23, %v4685_v18  ;;  %v4686_v5 = vadd.f32 %v4622_v27, %v4462_v28  ;;  %v4623_v15 = vmul.f32 %v11653_v35, %v11640_v14  ;;  %v4783_v50 = vmul.f32 %v11654_v29, %v11641_v37 }
 0x4bc   : > { %5321 = vperm.xlu1 %5939, %v5130_v17   ;;  %v4943_v22 = vmul.f32 %v9921_v4, %v11642_v13  ;;  %v4464_v45 = vmul.f32 %v9910_v42, %v9651_v62  ;;  %v5131_v40 = vmax.f32 %v5067_v55, 0.0  ;;  %v5068_v3 = vadd.f32 %v5004_v61, %v11655_v2 }
 0x4bd   : > { %v5005_v46 = vadd.f32 %v4941_v47, %v4845_v63  ;;  %v4846_v33 = vadd.f32 %v4782_v24, %v4686_v5  ;;  %v4687_v11 = vadd.f32 %v4623_v15, %v4463_v51  ;;  %v4624_v23 = vmul.f32 %v11653_v35, %v9653_v6 }
 0x4be   : > { %v4784_v0 = vmul.f32 %v11654_v29, %v9655_v38  ;;  %v4944_v21 = vmul.f32 %v9921_v4, %v9667_v44  ;;  %5324 = vperm.xlu0 %5938, %v5131_v40   ;;  %v5132_v28 = vmax.f32 %v5068_v3, 0.0  ;;  %v4465_v18 = vmul.f32 %v9910_v42, %v11643_v20 }
 0x4bf   : > { %v5069_v58 = vadd.f32 %v5005_v46, %v11655_v2  ;;  %v5006_v52 = vadd.f32 %v4942_v19, %v4846_v33  ;;  %v4847_v47 = vadd.f32 %v4783_v50, %v4687_v11  ;;  %v4688_v27 = vadd.f32 %v4624_v23, %v4464_v45  ;;  %v11656_v46 = vld [vmem:[#allocation33_spill] sm:$0xff] }
 0x4c0   : > { %v4625_v17 = vmul.f32 %v11653_v35, %v11644_v9  ;;  %v4785_v24 = vmul.f32 %v11654_v29, %v11645_v49  ;;  %5327 = vperm.xlu1 %5939, %v5132_v28   ;;  %v4945_v61 = vmul.f32 %v9921_v4, %v11646_v10  ;;  %v4466_v19 = vmul.f32 %v9910_v42, %v9702_v43 }
 0x4c1   : > { %v5133_v51 = vmax.f32 %v5069_v58, 0.0  ;;  %v5070_v55 = vadd.f32 %v5006_v52, %v11655_v2  ;;  %v5007_v63 = vadd.f32 %v4943_v22, %v4847_v47  ;;  %v4848_v5 = vadd.f32 %v4784_v0, %v4688_v27  ;;  %v11657_v0 = vld [vmem:[#allocation149_spill] sm:$0xff] }
 0x4c2   : > { %v4689_v15 = vadd.f32 %v4625_v17, %v4465_v18  ;;  %v4626_v50 = vmul.f32 %v11653_v35, %v9704_v56  ;;  %v4786_v40 = vmul.f32 %v11654_v29, %v9710_v48  ;;  %v4946_v3 = vmul.f32 %v9921_v4, %v9712_v53  ;;  %v11658_v29 = vld [vmem:[#allocation15_spill] sm:$0xff] }
 0x4c3   : > { %5330 = vperm.xlu0 %5938, %v5133_v51   ;;  %v5134_v45 = vmax.f32 %v5070_v55, 0.0  ;;  %v4467_v33 = vmul.f32 %v11656_v46, %v9376_v39  ;;  %v5071_v11 = vadd.f32 %v5007_v63, %v11655_v2  ;;  %v5008_v42 = vadd.f32 %v4944_v21, %v4848_v5 }
 0x4c4   : > { %v4849_v22 = vadd.f32 %v4785_v24, %v4689_v15  ;;  %v4690_v23 = vadd.f32 %v4626_v50, %v4466_v19  ;;  %v4627_v35 = vmul.f32 %v11657_v0, %v9378_v25  ;;  %v4787_v28 = vmul.f32 %v9616_v31, %v9382_v7 }
 0x4c5   : > { %5333 = vperm.xlu1 %5939, %v5134_v45   ;;  %v4947_v58 = vmul.f32 %v11658_v29, %v11627_v59  ;;  %v4468_v4 = vmul.f32 %v11656_v46, %v11628_v41  ;;  %v5135_v52 = vmax.f32 %v5071_v11, 0.0  ;;  %v5072_v18 = vadd.f32 %v5008_v42, %v11655_v2 }
 0x4c6   : > { %v5009_v47 = vadd.f32 %v4945_v61, %v4849_v22  ;;  %v4850_v21 = vadd.f32 %v4786_v40, %v4690_v23  ;;  %v4691_v27 = vadd.f32 %v4627_v35, %v4467_v33  ;;  %v4628_v17 = vmul.f32 %v11657_v0, %v11629_v8 }
 0x4c7   : > { %v4788_v24 = vmul.f32 %v9616_v31, %v11632_v1  ;;  %v4948_v51 = vmul.f32 %v11658_v29, %v11633_v30  ;;  %5336 = vperm.xlu0 %5938, %v5135_v52   ;;  %v5136_v55 = vmax.f32 %v5072_v18, 0.0  ;;  %v4469_v5 = vmul.f32 %v11656_v46, %v11634_v12  ;;  %v11659_v18 = vld [vmem:[#allocation146_spill] sm:$0xff] }
 0x4c8   : > { %v5073_v19 = vadd.f32 %v5009_v47, %v11655_v2  ;;  %v5010_v63 = vadd.f32 %v4946_v3, %v4850_v21  ;;  %v4851_v61 = vadd.f32 %v4787_v28, %v4691_v27  ;;  %v4692_v15 = vadd.f32 %v4628_v17, %v4468_v4  ;;  %v10040_v17 = vpop.permute.xlu0 %4420 }
 0x4c9   : > { %v4629_v50 = vmul.f32 %v11657_v0, %v11636_v16  ;;  %v4789_v45 = vmul.f32 %v9616_v31, %v11637_v32  ;;  %5339 = vperm.xlu1 %5939, %v5136_v55   ;;  %v4949_v11 = vmul.f32 %v11658_v29, %v11638_v36  ;;  %v4470_v3 = vmul.f32 %v11656_v46, %v9583_v34 }
 0x4ca   : > { %v5137_v40 = vmax.f32 %v5073_v19, 0.0  ;;  %v5074_v33 = vadd.f32 %v5010_v63, %v11655_v2  ;;  %v5011_v42 = vadd.f32 %v4947_v58, %v4851_v61  ;;  %v4852_v22 = vadd.f32 %v4788_v24, %v4692_v15 }
 0x4cb   : > { %v4693_v23 = vadd.f32 %v4629_v50, %v4469_v5  ;;  %v4630_v35 = vmul.f32 %v11657_v0, %v9592_v54  ;;  %v4790_v4 = vmul.f32 %v9616_v31, %v9594_v60  ;;  %v4950_v2 = vmul.f32 %v11658_v29, %v9608_v26  ;;  %v10051_v50 = vpop.permute.xlu1 %4900 }
 0x4cc   : > { %5342 = vperm.xlu0 %5938, %v5137_v40   ;;  %v5138_v28 = vmax.f32 %v5074_v33, 0.0  ;;  %v4471_v52 = vmul.f32 %v11656_v46, %v11639_v57  ;;  %v5075_v47 = vadd.f32 %v5011_v42, %v11659_v18  ;;  %v5012_v21 = vadd.f32 %v4948_v51, %v4852_v22 }
 0x4cd   : > { %v4853_v58 = vadd.f32 %v4789_v45, %v4693_v23  ;;  %v4694_v27 = vadd.f32 %v4630_v35, %v4470_v3  ;;  %v4631_v24 = vmul.f32 %v11657_v0, %v11640_v14  ;;  %v4791_v55 = vmul.f32 %v9616_v31, %v11641_v37 }
 0x4ce   : > { %5345 = vperm.xlu1 %5939, %v5138_v28   ;;  %v4951_v19 = vmul.f32 %v11658_v29, %v11642_v13  ;;  %v4472_v63 = vmul.f32 %v11656_v46, %v9651_v62  ;;  %v5139_v5 = vmax.f32 %v5075_v47, 0.0  ;;  %v5076_v51 = vadd.f32 %v5012_v21, %v11659_v18  ;;  %v11661_v47 = vld [vmem:[#allocation63_spill] sm:$0xff] }
 0x4cf   : > { %v5013_v61 = vadd.f32 %v4949_v11, %v4853_v58  ;;  %v4854_v15 = vadd.f32 %v4790_v4, %v4694_v27  ;;  %v4695_v45 = vadd.f32 %v4631_v24, %v4471_v52  ;;  %v4632_v40 = vmul.f32 %v11657_v0, %v9653_v6  ;;  %v11660_v4 = vld [vmem:[#allocation65_spill] sm:$0xff] }
 0x4d0   : > { %v4792_v33 = vmul.f32 %v9616_v31, %v9655_v38  ;;  %v4952_v3 = vmul.f32 %v11658_v29, %v9667_v44  ;;  %5348 = vperm.xlu0 %5938, %v5139_v5   ;;  %v5140_v42 = vmax.f32 %v5076_v51, 0.0  ;;  %v4475_v11 = vmul.f32 %v10040_v17, %v9376_v39 }
 0x4d1   : > { %v5077_v22 = vadd.f32 %v5013_v61, %v11659_v18  ;;  %v5014_v23 = vadd.f32 %v4950_v2, %v4854_v15  ;;  %v4855_v35 = vadd.f32 %v4791_v55, %v4695_v45  ;;  %v4696_v28 = vadd.f32 %v4632_v40, %v4472_v63  ;;  %v11662_v40 = vld [vmem:[#allocation132_spill] sm:$0xff] }
 0x4d2   : > { %v4635_v52 = vmul.f32 %v11660_v4, %v9378_v25  ;;  %v4795_v21 = vmul.f32 %v11661_v47, %v9382_v7  ;;  %5351 = vperm.xlu1 %5939, %v5140_v42   ;;  %v4955_v24 = vmul.f32 %v10051_v50, %v11627_v59  ;;  %v4476_v2 = vmul.f32 %v10040_v17, %v11628_v41 }
 0x4d3   : > { %v5141_v58 = vmax.f32 %v5077_v22, 0.0  ;;  %v5078_v27 = vadd.f32 %v5014_v23, %v11659_v18  ;;  %v5015_v5 = vadd.f32 %v4951_v19, %v4855_v35  ;;  %v4856_v51 = vadd.f32 %v4792_v33, %v4696_v28  ;;  %v11664_v28 = vld [vmem:[#allocation32_spill] sm:$0xff] }
 0x4d4   : > { %v4699_v55 = vadd.f32 %v4635_v52, %v4475_v11  ;;  %v4636_v63 = vmul.f32 %v11660_v4, %v11629_v8  ;;  %v4796_v15 = vmul.f32 %v11661_v47, %v11632_v1  ;;  %v4956_v45 = vmul.f32 %v10051_v50, %v11633_v30  ;;  %v11663_v11 = vld [vmem:[#allocation148_spill] sm:$0xff] }
 0x4d5   : > { %5354 = vperm.xlu0 %5938, %v5141_v58   ;;  %v5142_v61 = vmax.f32 %v5078_v27, 0.0  ;;  %v4483_v42 = vmul.f32 %v11662_v40, %v9376_v39  ;;  %v5079_v22 = vadd.f32 %v5015_v5, %v11659_v18  ;;  %v5016_v23 = vadd.f32 %v4952_v3, %v4856_v51  ;;  %v11665_v58 = vld [vmem:[#allocation72_spill] sm:$0xff]  ;;  %v11666_v51 = vld [vmem:[#allocation62_spill] sm:$0xff] }
 0x4d6   : > { %v4859_v19 = vadd.f32 %v4795_v21, %v4699_v55  ;;  %v4700_v33 = vadd.f32 %v4636_v63, %v4476_v2  ;;  %v4643_v35 = vmul.f32 %v11663_v11, %v9378_v25  ;;  %v4803_v52 = vmul.f32 %v11664_v28, %v9382_v7 }
 0x4d7   : > { %5357 = vperm.xlu1 %5939, %v5142_v61   ;;  %v4963_v27 = vmul.f32 %v11665_v58, %v11627_v59  ;;  %v4484_v53 = vmul.f32 %v11662_v40, %v11628_v41  ;;  %v5143_v48 = vmax.f32 %v5079_v22, 0.0  ;;  %v5080_v39 = vadd.f32 %v5016_v23, %v11659_v18 }
 0x4d8   : > { %v5019_v5 = vadd.f32 %v4955_v24, %v4859_v19  ;;  %v4860_v3 = vadd.f32 %v4796_v15, %v4700_v33  ;;  %v4707_v21 = vadd.f32 %v4643_v35, %v4483_v42  ;;  %v4644_v2 = vmul.f32 %v11663_v11, %v11629_v8 }
 0x4d9   : > { %v4804_v25 = vmul.f32 %v11664_v28, %v11632_v1  ;;  %v4964_v7 = vmul.f32 %v11665_v58, %v11633_v30  ;;  %5360 = vperm.xlu0 %5938, %v5143_v48   ;;  %v5144_v59 = vmax.f32 %v5080_v39, 0.0  ;;  %v4477_v63 = vmul.f32 %v10040_v17, %v11634_v12  ;;  %v11667_v39 = vld [vmem:[#allocation8_spill] sm:$0xff] }
 0x4da   : > { %v5083_v55 = vadd.f32 %v5019_v5, %v11666_v51  ;;  %v5020_v41 = vadd.f32 %v4956_v45, %v4860_v3  ;;  %v4867_v24 = vadd.f32 %v4803_v52, %v4707_v21  ;;  %v4708_v61 = vadd.f32 %v4644_v2, %v4484_v53 }
 0x4db   : > { %v4637_v15 = vmul.f32 %v11660_v4, %v11636_v16  ;;  %v4797_v8 = vmul.f32 %v11661_v47, %v11637_v32  ;;  %5363 = vperm.xlu1 %5939, %v5144_v59   ;;  %v4957_v48 = vmul.f32 %v10051_v50, %v11638_v36  ;;  %v4485_v45 = vmul.f32 %v11662_v40, %v11634_v12 }
 0x4dc   : > { %v5147_v1 = vmax.f32 %v5083_v55, 0.0  ;;  %v5084_v30 = vadd.f32 %v5020_v41, %v11666_v51  ;;  %v5027_v42 = vadd.f32 %v4963_v27, %v4867_v24  ;;  %v4868_v22 = vadd.f32 %v4804_v25, %v4708_v61 }
 0x4dd   : > { %v4701_v23 = vadd.f32 %v4637_v15, %v4477_v63  ;;  %v4645_v53 = vmul.f32 %v11663_v11, %v11636_v16  ;;  %v4805_v33 = vmul.f32 %v11664_v28, %v11637_v32  ;;  %v4965_v35 = vmul.f32 %v11665_v58, %v11638_v36 }
 0x4de   : > { %5372 = vperm.xlu0 %5938, %v5147_v1   ;;  %v5148_v19 = vmax.f32 %v5084_v30, 0.0  ;;  %v4478_v52 = vmul.f32 %v10040_v17, %v9583_v34  ;;  %v5091_v5 = vadd.f32 %v5027_v42, %v11667_v39  ;;  %v5028_v12 = vadd.f32 %v4964_v7, %v4868_v22 }
 0x4df   : > { %v4861_v27 = vadd.f32 %v4797_v8, %v4701_v23  ;;  %v4709_v3 = vadd.f32 %v4645_v53, %v4485_v45  ;;  %v4638_v16 = vmul.f32 %v11660_v4, %v9592_v54  ;;  %v4798_v21 = vmul.f32 %v11661_v47, %v9594_v60 }
 0x4e0   : > { %5375 = vperm.xlu1 %5939, %v5148_v19   ;;  %v4958_v32 = vmul.f32 %v10051_v50, %v9608_v26  ;;  %v4486_v36 = vmul.f32 %v11662_v40, %v9583_v34  ;;  %v5155_v2 = vmax.f32 %v5091_v5, 0.0  ;;  %v5092_v25 = vadd.f32 %v5028_v12, %v11667_v39 }
 0x4e1   : > { %v5021_v59 = vadd.f32 %v4957_v48, %v4861_v27  ;;  %v4869_v7 = vadd.f32 %v4805_v33, %v4709_v3  ;;  %v4702_v55 = vadd.f32 %v4638_v16, %v4478_v52  ;;  %v4646_v41 = vmul.f32 %v11663_v11, %v9592_v54 }
 0x4e2   : > { %v4806_v63 = vmul.f32 %v11664_v28, %v9594_v60  ;;  %v4966_v24 = vmul.f32 %v11665_v58, %v9608_v26  ;;  %5396 = vperm.xlu0 %5938, %v5155_v2   ;;  %v5156_v61 = vmax.f32 %v5092_v25, 0.0  ;;  %v4479_v8 = vmul.f32 %v10040_v17, %v11639_v57 }
 0x4e3   : > { %v5085_v15 = vadd.f32 %v5021_v59, %v11666_v51  ;;  %v5029_v34 = vadd.f32 %v4965_v35, %v4869_v7  ;;  %v4862_v1 = vadd.f32 %v4798_v21, %v4702_v55  ;;  %v4710_v30 = vadd.f32 %v4646_v41, %v4486_v36 }
 0x4e4   : > { %v4639_v48 = vmul.f32 %v11660_v4, %v11640_v14  ;;  %v4799_v54 = vmul.f32 %v11661_v47, %v11641_v37  ;;  %5399 = vperm.xlu1 %5939, %v5156_v61   ;;  %v4959_v45 = vmul.f32 %v10051_v50, %v11642_v13  ;;  %v4487_v42 = vmul.f32 %v11662_v40, %v11639_v57 }
 0x4e5   : > { %v5149_v60 = vmax.f32 %v5085_v15, 0.0  ;;  %v5093_v26 = vadd.f32 %v5029_v34, %v11667_v39  ;;  %v5022_v22 = vadd.f32 %v4958_v32, %v4862_v1  ;;  %v4870_v23 = vadd.f32 %v4806_v63, %v4710_v30 }
 0x4e6   : > { %v4703_v53 = vadd.f32 %v4639_v48, %v4479_v8  ;;  %v4647_v19 = vmul.f32 %v11663_v11, %v11640_v14  ;;  %v4807_v35 = vmul.f32 %v11664_v28, %v11641_v37  ;;  %v4480_v52 = vmul.f32 %v10040_v17, %v9651_v62 }
 0x4e7   : > { %5378 = vperm.xlu0 %5938, %v5149_v60   ;;  %v5157_v33 = vmax.f32 %v5093_v26, 0.0  ;;  %v5086_v5 = vadd.f32 %v5022_v22, %v11666_v51  ;;  %v5030_v12 = vadd.f32 %v4966_v24, %v4870_v23  ;;  %v4967_v57 = vmul.f32 %v11665_v58, %v11642_v13  ;;  %v10168_v24 = vpop.permute.xlu1 %5228 }
 0x4e8   : > { %v4863_v27 = vadd.f32 %v4799_v54, %v4703_v53  ;;  %v4711_v3 = vadd.f32 %v4647_v19, %v4487_v42  ;;  %v4640_v14 = vmul.f32 %v11660_v4, %v9653_v6  ;;  %v4800_v16 = vmul.f32 %v11661_v47, %v9655_v38 }
 0x4e9   : > { %5402 = vperm.xlu1 %5939, %v5157_v33   ;;  %v4488_v37 = vmul.f32 %v11662_v40, %v9651_v62  ;;  %v5150_v21 = vmax.f32 %v5086_v5, 0.0  ;;  %v5094_v32 = vadd.f32 %v5030_v12, %v11667_v39  ;;  %v4960_v59 = vmul.f32 %v10051_v50, %v9667_v44  ;;  %v5232_v5 = vpop.permute.xlu0 %5231 }
 0x4ea   : > { %v5023_v36 = vadd.f32 %v4959_v45, %v4863_v27  ;;  %v4871_v2 = vadd.f32 %v4807_v35, %v4711_v3  ;;  %v4704_v25 = vadd.f32 %v4640_v14, %v4480_v52  ;;  %v4648_v13 = vmul.f32 %v11663_v11, %v9653_v6 }
 0x4eb   : > { %v4808_v7 = vmul.f32 %v11664_v28, %v9655_v38  ;;  %5381 = vperm.xlu0 %5938, %v5150_v21   ;;  %v5158_v55 = vmax.f32 %v5094_v32, 0.0  ;;  %v4473_v63 = vmul.f32 %v11656_v46, %v11643_v20  ;;  %v4633_v34 = vmul.f32 %v11657_v0, %v11644_v9 }
 0x4ec   : > { %v5087_v41 = vadd.f32 %v5023_v36, %v11666_v51  ;;  %v5031_v62 = vadd.f32 %v4967_v57, %v4871_v2  ;;  %v4864_v61 = vadd.f32 %v4800_v16, %v4704_v25  ;;  %v4712_v15 = vadd.f32 %v4648_v13, %v4488_v37  ;;  %v5235_v57 = vpop.permute.xlu1 %5234 }
 0x4ed   : > { %v4793_v6 = vmul.f32 %v9616_v31, %v11645_v49  ;;  %5405 = vperm.xlu1 %5939, %v5158_v55   ;;  %v4968_v1 = vmul.f32 %v11665_v58, %v9667_v44  ;;  %v4481_v30 = vmul.f32 %v10040_v17, %v11643_v20  ;;  %v4697_v60 = vadd.f32 %v4633_v34, %v4473_v63  ;;  %v11671_v34 = vld [vmem:[#allocation39_spill] sm:$0xff] }
 0x4ee   : > { %v5151_v38 = vmax.f32 %v5087_v41, 0.0  ;;  %v5095_v8 = vadd.f32 %v5031_v62, %v11667_v39  ;;  %v5024_v48 = vadd.f32 %v4960_v59, %v4864_v61  ;;  %v4872_v54 = vadd.f32 %v4808_v7, %v4712_v15  ;;  %v11669_v59 = vld [vmem:[#allocation71_spill] sm:$0xff] }
 0x4ef   : > { %v4641_v26 = vmul.f32 %v11660_v4, %v11644_v9  ;;  %v4953_v42 = vmul.f32 %v11658_v29, %v11646_v10  ;;  %v4801_v22 = vmul.f32 %v11661_v47, %v11645_v49  ;;  %v4961_v44 = vmul.f32 %v10051_v50, %v11646_v10  ;;  %v11670_v41 = vld [vmem:[#allocation23_spill] sm:$0xff] }
 0x4f0   : > { %5384 = vperm.xlu0 %5938, %v5151_v38   ;;  %v5159_v45 = vmax.f32 %v5095_v8, 0.0  ;;  %v5088_v23 = vadd.f32 %v5024_v48, %v11666_v51  ;;  %v5032_v53 = vadd.f32 %v4968_v1, %v4872_v54  ;;  %v4857_v19 = vadd.f32 %v4793_v6, %v4697_v60  ;;  %v5241_v6 = vpop.permute.xlu0 %5240  ;;  %v5238_v38 = vpop.permute.xlu1 %5237 }
 0x4f1   : > { %v4705_v33 = vadd.f32 %v4641_v26, %v4481_v30  ;;  %v11668_v35 = vlaneseq  ;;  %v4489_v12 = vmul.f32 %v11662_v40, %v11643_v20  ;;  %v4649_v27 = vmul.f32 %v11663_v11, %v11644_v9 }
 0x4f2   : > { %5408 = vperm.xlu1 %5939, %v5159_v45   ;;  %v4809_v3 = vmul.f32 %v11664_v28, %v11645_v49  ;;  %v5152_v14 = vmax.f32 %v5088_v23, 0.0  ;;  %v5096_v16 = vadd.f32 %v5032_v53, %v11667_v39  ;;  %v5017_v37 = vadd.f32 %v4953_v42, %v4857_v19 }
 0x4f3   : > { %v5420_v52 = vand.u32 127, %v11668_v35  ;;  %v4865_v21 = vadd.f32 %v4801_v22, %v4705_v33  ;;  %v4713_v32 = vadd.f32 %v4649_v27, %v4489_v12  ;;  %v4474_v36 = vmul.f32 %v11656_v46, %v9702_v43 }
 0x4f4   : > { %v4634_v2 = vmul.f32 %v11657_v0, %v9704_v56  ;;  %5387 = vperm.xlu0 %5938, %v5152_v14   ;;  %v5160_v20 = vmax.f32 %v5096_v16, 0.0  ;;  %v5081_v9 = vadd.f32 %v5017_v37, %v11659_v18  ;;  %v4794_v49 = vmul.f32 %v9616_v31, %v11669_v59 }
 0x4f5   : > { %v5025_v25 = vadd.f32 %v4961_v44, %v4865_v21  ;;  %v4873_v13 = vadd.f32 %v4809_v3, %v4713_v32  ;;  %v4969_v7 = vmul.f32 %v11665_v58, %v11646_v10  ;;  %v10206_v62 = vsub.s32 %v5420_v52, %v11670_v41 }
 0x4f6   : > { %v4698_v55 = vadd.f32 %v4634_v2, %v4474_v36  ;;  %5411 = vperm.xlu1 %5939, %v5160_v20   ;;  %v5145_v46 = vmax.f32 %v5081_v9, 0.0  ;;  %v4482_v63 = vmul.f32 %v10040_v17, %v9702_v43  ;;  %v4954_v31 = vmul.f32 %v11658_v29, %v11671_v34 }
 0x4f7   : > { %v5089_v0 = vadd.f32 %v5025_v25, %v11666_v51  ;;  %v5033_v61 = vadd.f32 %v4969_v7, %v4873_v13  ;;  %v4642_v10 = vmul.f32 %v11660_v4, %v9704_v56  ;;  %v4802_v1 = vmul.f32 %v11661_v47, %v11669_v59 }
 0x4f8   : > { %v4858_v15 = vadd.f32 %v4794_v49, %v4698_v55  ;;  %5366 = vperm.xlu0 %5938, %v5145_v46   ;;  %v4962_v30 = vmul.f32 %v10051_v50, %v11671_v34  ;;  %v4490_v29 = vmul.f32 %v11662_v40, %v9702_v43  ;;  %v5428_v4 = vrot.slane %v5232_v5, %v10206_v62 }
 0x4f9   : > { %v5153_v8 = vmax.f32 %v5089_v0, 0.0  ;;  %v5097_v17 = vadd.f32 %v5033_v61, %v11667_v39  ;;  %v4706_v54 = vadd.f32 %v4642_v10, %v4482_v63  ;;  %v5424_v60 = vrot.slane %v10168_v24, %v10206_v62  ;;  %v5247_v24 = vpop.permute.xlu0 %5246 }
 0x4fa   : > { %v5018_v48 = vadd.f32 %v4954_v31, %v4858_v15  ;;  %v4650_v26 = vmul.f32 %v11663_v11, %v9704_v56  ;;  %v4810_v47 = vmul.f32 %v11664_v28, %v11669_v59  ;;  %v5432_v22 = vrot.slane %v5235_v57, %v10206_v62  ;;  %v5244_v53 = vpop.permute.xlu1 %5243 }
 0x4fb   : > { %5390 = vperm.xlu1 %5939, %v5153_v8   ;;  %v5161_v50 = vmax.f32 %v5097_v17, 0.0  ;;  %v4866_v42 = vadd.f32 %v4802_v1, %v4706_v54  ;;  %v5436_v40 = vrot.slane %v5238_v38, %v10206_v62  ;;  %v5678_v56 = vsel %vm5677_vm4, %v5428_v4, %v5424_v60 }
 0x4fc   : > { %v5082_v45 = vadd.f32 %v5018_v48, %v11659_v18  ;;  %v4714_v43 = vadd.f32 %v4650_v26, %v4490_v29  ;;  %v4970_v28 = vmul.f32 %v11665_v58, %v11671_v34  ;;  %v5680_v19 = vsel %vm5679_vm5, %v5432_v22, %v5678_v56 }
 0x4fd   : > { %5414 = vperm.xlu0 %5938, %v5161_v50   ;;  %v5026_v23 = vadd.f32 %v4962_v30, %v4866_v42  ;;  %v5682_v35 = vsel %vm5681_vm6, %v5436_v40, %v5680_v19  ;;  %v5444_v52 = vrot.slane %v5244_v53, %v10206_v62  ;;  %v5440_v5 = vrot.slane %v5241_v6, %v10206_v62 }
 0x4fe   : > { %v5146_v44 = vmax.f32 %v5082_v45, 0.0  ;;  %v4874_v11 = vadd.f32 %v4810_v47, %v4714_v43  ;;  %v5448_v14 = vrot.slane %v5247_v24, %v10206_v62 }
 0x4ff   : > { %v5090_v18 = vadd.f32 %v5026_v23, %v11666_v51  ;;  %v5253_v27 = vpop.permute.xlu0 %5252  ;;  %v5684_v58 = vsel %vm5683_vm7, %v5440_v5, %v5682_v35 }
 0x500   : > { %5369 = vperm.xlu1 %5939, %v5146_v44   ;;  %v5034_v33 = vadd.f32 %v4970_v28, %v4874_v11  ;;  %v5686_v57 = vsel %vm5685_vm8, %v5444_v52, %v5684_v58  ;;  %v5456_v36 = vrot.slane %v5253_v27, %v10206_v62 }
 0x501   : > { %v5154_v12 = vmax.f32 %v5090_v18, 0.0  ;;  %v5688_v21 = vsel %vm5687_vm9, %v5448_v14, %v5686_v57 }
 0x502   : > { %v5098_v3 = vadd.f32 %v5034_v33, %v11667_v39 }
 0x503   : > { %5393 = vperm.xlu0 %5938, %v5154_v12  }
 0x504   : > { %v5162_v51 = vmax.f32 %v5098_v3, 0.0 }
 0x505   : > { %v5250_v16 = vpop.permute.xlu1 %5249 }
 0x506   : > { %5417 = vperm.xlu1 %5939, %v5162_v51   ;;  %v5452_v37 = vrot.slane %v5250_v16, %v10206_v62 }
 0x508   : > { %v5259_v32 = vpop.permute.xlu0 %5258  ;;  %v5690_v39 = vsel %vm5689_vm10, %v5452_v37, %v5688_v21 }
 0x509   : > { %5749 = vst.msk [vmem:[%s10250_s10] sm:$0xff] %vm5748_vm11, %v5690_v39  ;;  %v5256_v2 = vpop.permute.xlu1 %5255  ;;  %v5464_v20 = vrot.slane %v5259_v32, %v10206_v62 }
 0x50a   : > { %v5460_v9 = vrot.slane %v5256_v2, %v10206_v62 }
 0x50c   : > { %v5265_v25 = vpop.permute.xlu0 %5264  ;;  %v5691_v59 = vsel %vm5677_vm4, %v5460_v9, %v5456_v36 }
 0x50d   : > { %v5692_v49 = vsel %vm5679_vm5, %v5464_v20, %v5691_v59  ;;  %v5262_v13 = vpop.permute.xlu1 %5261  ;;  %v5472_v7 = vrot.slane %v5265_v25, %v10206_v62 }
 0x50e   : > { %v5468_v55 = vrot.slane %v5262_v13, %v10206_v62 }
 0x510   : > { %v5693_v41 = vsel %vm5681_vm6, %v5468_v55, %v5692_v49  ;;  %v5271_v46 = vpop.permute.xlu0 %5270 }
 0x511   : > { %v5694_v0 = vsel %vm5683_vm7, %v5472_v7, %v5693_v41  ;;  %v5268_v63 = vpop.permute.xlu1 %5267  ;;  %v5480_v61 = vrot.slane %v5271_v46, %v10206_v62 }
 0x512   : > { %v5476_v15 = vrot.slane %v5268_v63, %v10206_v62 }
 0x514   : > { %v5695_v34 = vsel %vm5685_vm8, %v5476_v15, %v5694_v0 }
 0x515   : > { %v5277_v31 = vpop.permute.xlu0 %5276  ;;  %v5696_v6 = vsel %vm5687_vm9, %v5480_v61, %v5695_v34  ;;  %v5274_v10 = vpop.permute.xlu1 %5273 }
 0x516   : > { %v5484_v38 = vrot.slane %v5274_v10, %v10206_v62  ;;  %v5488_v1 = vrot.slane %v5277_v31, %v10206_v62 }
 0x518   : > { %v5697_v8 = vsel %vm5689_vm10, %v5484_v38, %v5696_v6 }
 0x519   : > { %5750 = vst.msk [vmem:[%s10250_s10 + $0x8] sm:$0xff] %vm5748_vm11, %v5697_v8  ;;  %v5280_v30 = vpop.permute.xlu1 %5279  ;;  %v5283_v17 = vpop.permute.xlu0 %5282 }
 0x51a   : > { %v5492_v48 = vrot.slane %v5280_v30, %v10206_v62  ;;  %v5496_v54 = vrot.slane %v5283_v17, %v10206_v62 }
 0x51c   : > { %v5698_v29 = vsel %vm5677_vm4, %v5492_v48, %v5488_v1 }
 0x51d   : > { %v5699_v4 = vsel %vm5679_vm5, %v5496_v54, %v5698_v29  ;;  %v5286_v60 = vpop.permute.xlu1 %5285 }
 0x51e   : > { %v5289_v26 = vpop.permute.xlu0 %5288  ;;  %v5500_v47 = vrot.slane %v5286_v60, %v10206_v62 }
 0x51f   : > { %v5504_v50 = vrot.slane %v5289_v26, %v10206_v62 }
 0x520   : > { %v5700_v45 = vsel %vm5681_vm6, %v5500_v47, %v5699_v4 }
 0x521   : > { %v5701_v42 = vsel %vm5683_vm7, %v5504_v50, %v5700_v45  ;;  %v5292_v22 = vpop.permute.xlu1 %5291 }
 0x522   : > { %v5508_v43 = vrot.slane %v5292_v22, %v10206_v62 }
 0x523   : > { %v5295_v40 = vpop.permute.xlu0 %5294 }
 0x524   : > { %v5512_v44 = vrot.slane %v5295_v40, %v10206_v62  ;;  %v5702_v23 = vsel %vm5685_vm8, %v5508_v43, %v5701_v42 }
 0x525   : > { %v5298_v53 = vpop.permute.xlu1 %5297 }
 0x526   : > { %v5703_v24 = vsel %vm5687_vm9, %v5512_v44, %v5702_v23  ;;  %v5516_v56 = vrot.slane %v5298_v53, %v10206_v62 }
 0x527   : > { %v5301_v11 = vpop.permute.xlu0 %5300 }
 0x528   : > { %v5704_v28 = vsel %vm5689_vm10, %v5516_v56, %v5703_v24  ;;  %v5520_v19 = vrot.slane %v5301_v11, %v10206_v62 }
 0x529   : > { %5751 = vst.msk [vmem:[%s10250_s10 + $0x10] sm:$0xff] %vm5748_vm11, %v5704_v28  ;;  %v5304_v18 = vpop.permute.xlu1 %5303 }
 0x52a   : > { %v5524_v33 = vrot.slane %v5304_v18, %v10206_v62 }
 0x52c   : > { %v5307_v35 = vpop.permute.xlu0 %5306  ;;  %v5705_v12 = vsel %vm5677_vm4, %v5524_v33, %v5520_v19 }
 0x52d   : > { %v5528_v52 = vrot.slane %v5307_v35, %v10206_v62 }
 0x52e   : > { %v5310_v5 = vpop.permute.xlu1 %5309 }
 0x52f   : > { %v5532_v27 = vrot.slane %v5310_v5, %v10206_v62  ;;  %v5706_v3 = vsel %vm5679_vm5, %v5528_v52, %v5705_v12 }
 0x530   : > { %v5313_v58 = vpop.permute.xlu0 %5312 }
 0x531   : > { %v5536_v51 = vrot.slane %v5313_v58, %v10206_v62  ;;  %v5707_v57 = vsel %vm5681_vm6, %v5532_v27, %v5706_v3 }
 0x532   : > { %v5316_v14 = vpop.permute.xlu1 %5315 }
 0x533   : > { %v5708_v16 = vsel %vm5683_vm7, %v5536_v51, %v5707_v57  ;;  %v5540_v37 = vrot.slane %v5316_v14, %v10206_v62 }
 0x535   : > { %v5319_v21 = vpop.permute.xlu0 %5318  ;;  %v5709_v39 = vsel %vm5685_vm8, %v5540_v37, %v5708_v16 }
 0x536   : > { %v5544_v32 = vrot.slane %v5319_v21, %v10206_v62 }
 0x537   : > { %v5322_v36 = vpop.permute.xlu1 %5321 }
 0x538   : > { %v5710_v2 = vsel %vm5687_vm9, %v5544_v32, %v5709_v39  ;;  %v5548_v20 = vrot.slane %v5322_v36, %v10206_v62 }
 0x539   : > { %v5325_v25 = vpop.permute.xlu0 %5324 }
 0x53a   : > { %v5711_v9 = vsel %vm5689_vm10, %v5548_v20, %v5710_v2  ;;  %v5552_v49 = vrot.slane %v5325_v25, %v10206_v62 }
 0x53b   : > { %5752 = vst.msk [vmem:[%s10250_s10 + $0x18] sm:$0xff] %vm5748_vm11, %v5711_v9  ;;  %v5328_v59 = vpop.permute.xlu1 %5327 }
 0x53c   : > { %v5556_v13 = vrot.slane %v5328_v59, %v10206_v62 }
 0x53e   : > { %v5331_v7 = vpop.permute.xlu0 %5330  ;;  %v5712_v46 = vsel %vm5677_vm4, %v5556_v13, %v5552_v49 }
 0x53f   : > { %v5560_v55 = vrot.slane %v5331_v7, %v10206_v62 }
 0x540   : > { %v5334_v41 = vpop.permute.xlu1 %5333 }
 0x541   : > { %v5564_v0 = vrot.slane %v5334_v41, %v10206_v62  ;;  %v5713_v63 = vsel %vm5679_vm5, %v5560_v55, %v5712_v46 }
 0x542   : > { %v5337_v61 = vpop.permute.xlu0 %5336 }
 0x543   : > { %v5568_v15 = vrot.slane %v5337_v61, %v10206_v62  ;;  %v5714_v34 = vsel %vm5681_vm6, %v5564_v0, %v5713_v63 }
 0x544   : > { %v5340_v31 = vpop.permute.xlu1 %5339 }
 0x545   : > { %v5715_v6 = vsel %vm5683_vm7, %v5568_v15, %v5714_v34  ;;  %v5572_v10 = vrot.slane %v5340_v31, %v10206_v62 }
 0x547   : > { %v5343_v38 = vpop.permute.xlu0 %5342  ;;  %v5716_v1 = vsel %vm5685_vm8, %v5572_v10, %v5715_v6 }
 0x548   : > { %v5576_v8 = vrot.slane %v5343_v38, %v10206_v62 }
 0x549   : > { %v5346_v30 = vpop.permute.xlu1 %5345 }
 0x54a   : > { %v5717_v17 = vsel %vm5687_vm9, %v5576_v8, %v5716_v1  ;;  %v5580_v48 = vrot.slane %v5346_v30, %v10206_v62 }
 0x54b   : > { %v5349_v29 = vpop.permute.xlu0 %5348 }
 0x54c   : > { %v5718_v54 = vsel %vm5689_vm10, %v5580_v48, %v5717_v17  ;;  %v5584_v11 = vrot.slane %v5349_v29, %v10206_v62 }
 0x54d   : > { %5753 = vst.msk [vmem:[%s10250_s10 + $0x20] sm:$0xff] %vm5748_vm11, %v5718_v54  ;;  %v5352_v4 = vpop.permute.xlu1 %5351 }
 0x54e   : > { %v5588_v28 = vrot.slane %v5352_v4, %v10206_v62 }
 0x550   : > { %v5355_v60 = vpop.permute.xlu0 %5354  ;;  %v5719_v35 = vsel %vm5677_vm4, %v5588_v28, %v5584_v11 }
 0x551   : > { %v5592_v18 = vrot.slane %v5355_v60, %v10206_v62 }
 0x552   : > { %v5358_v26 = vpop.permute.xlu1 %5357 }
 0x553   : > { %v5596_v52 = vrot.slane %v5358_v26, %v10206_v62  ;;  %v5720_v5 = vsel %vm5679_vm5, %v5592_v18, %v5719_v35 }
 0x554   : > { %v5361_v47 = vpop.permute.xlu0 %5360 }
 0x555   : > { %v5600_v12 = vrot.slane %v5361_v47, %v10206_v62  ;;  %v5721_v58 = vsel %vm5681_vm6, %v5596_v52, %v5720_v5 }
 0x556   : > { %v5364_v50 = vpop.permute.xlu1 %5363 }
 0x557   : > { %v5604_v51 = vrot.slane %v5364_v50, %v10206_v62  ;;  %v5722_v57 = vsel %vm5683_vm7, %v5600_v12, %v5721_v58 }
 0x559   : > { %v5373_v45 = vpop.permute.xlu0 %5372  ;;  %v5723_v36 = vsel %vm5685_vm8, %v5604_v51, %v5722_v57 }
 0x55a   : > { %v5616_v14 = vrot.slane %v5373_v45, %v10206_v62 }
 0x55b   : > { %v5376_v42 = vpop.permute.xlu1 %5375 }
 0x55c   : > { %v5620_v16 = vrot.slane %v5376_v42, %v10206_v62 }
 0x55d   : > { %v5397_v22 = vpop.permute.xlu0 %5396 }
 0x55e   : > { %v5648_v2 = vrot.slane %v5397_v22, %v10206_v62  ;;  %v5726_v59 = vsel %vm5677_vm4, %v5620_v16, %v5616_v14 }
 0x55f   : > { %v5400_v43 = vpop.permute.xlu1 %5399 }
 0x560   : > { %v5652_v20 = vrot.slane %v5400_v43, %v10206_v62 }
 0x562   : > { %v5379_v40 = vpop.permute.xlu0 %5378  ;;  %v5733_v34 = vsel %vm5677_vm4, %v5652_v20, %v5648_v2 }
 0x563   : > { %v5624_v37 = vrot.slane %v5379_v40, %v10206_v62 }
 0x564   : > { %v5403_v44 = vpop.permute.xlu1 %5402 }
 0x565   : > { %v5656_v49 = vrot.slane %v5403_v44, %v10206_v62  ;;  %v5727_v55 = vsel %vm5679_vm5, %v5624_v37, %v5726_v59 }
 0x566   : > { %v5382_v23 = vpop.permute.xlu0 %5381 }
 0x567   : > { %v5628_v39 = vrot.slane %v5382_v23, %v10206_v62  ;;  %v5734_v38 = vsel %vm5679_vm5, %v5656_v49, %v5733_v34 }
 0x568   : > { %v5406_v24 = vpop.permute.xlu1 %5405 }
 0x569   : > { %v5660_v41 = vrot.slane %v5406_v24, %v10206_v62  ;;  %v5728_v63 = vsel %vm5681_vm6, %v5628_v39, %v5727_v55 }
 0x56b   : > { %v5385_v53 = vpop.permute.xlu0 %5384  ;;  %v5735_v17 = vsel %vm5681_vm6, %v5660_v41, %v5734_v38 }
 0x56c   : > { %v5632_v9 = vrot.slane %v5385_v53, %v10206_v62 }
 0x56d   : > { %v5409_v56 = vpop.permute.xlu1 %5408 }
 0x56e   : > { %v5664_v61 = vrot.slane %v5409_v56, %v10206_v62  ;;  %v5729_v31 = vsel %vm5683_vm7, %v5632_v9, %v5728_v63 }
 0x56f   : > { %v5388_v19 = vpop.permute.xlu0 %5387 }
 0x570   : > { %v5636_v13 = vrot.slane %v5388_v19, %v10206_v62  ;;  %v5736_v54 = vsel %vm5683_vm7, %v5664_v61, %v5735_v17 }
 0x571   : > { %v5412_v33 = vpop.permute.xlu1 %5411 }
 0x572   : > { %v5668_v6 = vrot.slane %v5412_v33, %v10206_v62  ;;  %v5730_v8 = vsel %vm5685_vm8, %v5636_v13, %v5729_v31 }
 0x573   : > { %v5367_v27 = vpop.permute.xlu0 %5366 }
 0x574   : > { %v5608_v21 = vrot.slane %v5367_v27, %v10206_v62  ;;  %v5737_v60 = vsel %vm5685_vm8, %v5668_v6, %v5736_v54 }
 0x576   : > { %v5391_v3 = vpop.permute.xlu1 %5390  ;;  %v5724_v46 = vsel %vm5687_vm9, %v5608_v21, %v5723_v36 }
 0x577   : > { %v5640_v0 = vrot.slane %v5391_v3, %v10206_v62 }
 0x578   : > { %v5415_v32 = vpop.permute.xlu0 %5414 }
 0x579   : > { %v5672_v1 = vrot.slane %v5415_v32, %v10206_v62  ;;  %v5731_v48 = vsel %vm5687_vm9, %v5640_v0, %v5730_v8 }
 0x57b   : > { %v5370_v25 = vpop.permute.xlu1 %5369  ;;  %v5738_v47 = vsel %vm5687_vm9, %v5672_v1, %v5737_v60 }
 0x57c   : > { %v5612_v7 = vrot.slane %v5370_v25, %v10206_v62 }
 0x57e   : > { %v5725_v15 = vsel %vm5689_vm10, %v5612_v7, %v5724_v46  ;;  %v5394_v10 = vpop.permute.xlu0 %5393 }
 0x57f   : > { %5754 = vst.msk [vmem:[%s10250_s10 + $0x28] sm:$0xff] %vm5748_vm11, %v5725_v15  ;;  %v5644_v30 = vrot.slane %v5394_v10, %v10206_v62 }
 0x581   : > { %v5732_v29 = vsel %vm5689_vm10, %v5644_v30, %v5731_v48  ;;  %v5418_v4 = vpop.permute.xlu1 %5417 }
 0x582   : > { %5755 = vst.msk [vmem:[%s10250_s10 + $0x30] sm:$0xff] %vm5748_vm11, %v5732_v29  ;;  %v5676_v26 = vrot.slane %v5418_v4, %v10206_v62 }
 0x584   : > { %v5739_v50 = vsel %vm5689_vm10, %v5676_v26, %v5738_v47 }
 0x585   : > { %5756 = vst.msk [vmem:[%s10250_s10 + $0x38] sm:$0xff] %vm5748_vm11, %v5739_v50 }
 0x586   : > { %5983 = shalt.err (!%p5980_p10)
}
 0x587   : > { %s5984_s15 = scalar_lea.hbm %s10373_s22, 1024  ;;  %s5988_s7 = scalar_lea.hbm %s10427_s5, 2048 }
 0x588   : > { %p5985_p0 = scmp.ne.s32.totalorder %s10373_s22, %s5984_s15  ;;  %p5989_p1 = scmp.lt.s32.totalorder %s10373_s22, %s10427_s5 }
 0x589   : > { %p5990_p3 = scmp.lt.s32.totalorder %s5988_s7, %s5984_s15 }
 0x58a   : > { %p5986_p2 = pnand %p5985_p0, %p11672_p12 }
 0x58b   : > { %p5991_p6 = por %p5990_p3, %p5989_p1 }
 0x58c   : > { %p5987_p9 = pneg %p5986_p2 }
 0x58e   : > { %p5992_p11 = pnand %p5991_p6, %p5987_p9 }
 0x590   : > { %5995 = shalt.err (!%p5992_p11)
}
 0x591   : > { %s6058_s25 = smov 128   ;;  %s6059_s13 = smov 8  }
 0x592   : > { %5865 = dma.vmem_to_hbm [thread:$0]  (%p11672_p12), %s10375_s11, 1024, %s10373_s22, %s5758_s26, %s6058_s25, %s6058_s25, %s6059_s13  }
 0x593 PF: > { %s5786_s17 = sand.u32 1, %s6022_s18   ;;  %p11673_p13 = scmp.ne.s32.totalorder %s10761_s6, 0 }
 0x594   : > { %p11674_p4 = scmp.ge.s32.totalorder %s6034_s21, 2  ;;  %s5787_s28 = scalar_lea.sflag [#allocation4], %s5786_s17 }
 0x596   : > { %p5872_p5 = pnand %p11674_p4, %p11673_p13 }
 0x598   : > { %p5873_p7 = pneg %p5872_p5 }
 0x59a   : > { %6017 = dma.done.wait (%p5873_p7), %s5787_s28, 1024  }
 0x59b   : > { %6019 = vsyncadd (%p5873_p7), %s5787_s28, 4294966272  ;;  %p18_p8 = scmp.ge.s32.totalorder %s6115_s24, 4   ;;  %s11675_s18 = smov %s6026_s19 }
 0x59c   : > { %s11676_s19 = smov %s6030_s20  ;;  %s11677_s20 = smov %s6127_s27 }
 0x59d   : > { %s11678_s21 = smov %s6115_s24  ;;  %20 = sbr.rel (!%p18_p8) target bundleno = 5 (0x5), region = 85 }
 0x5a2   :  { %5792 = vsyncpa [#allocation3], 1 }
 0x5a3   :  { %5794 = vsyncpa [#allocation3 + $0x1], 1 }
 0x5a4   :  { %5795 = vsyncpa [#allocation4], 1 }
 0x5a5   :  { %5797 = vsyncpa [#allocation4 + $0x1], 1 }

</bundles_post_ra>
